<compile_context>
chip_gen: v6e
topology: v6e:2x2x1
jax: 0.10.0
libtpu: 0.0.40
codegen_flags: <defaults>
</compile_context>

<pallas_src>
import jax
import jax.numpy as jnp
from jax import lax
from jax.experimental import pallas as pl
from jax.experimental.pallas import tpu as pltpu


def _round_up(n, m):
    return ((n + m - 1) // m) * m


def _pad_to(a, shape):
    return jnp.pad(a, [(0, s - d) for d, s in zip(a.shape, shape)])


def _pad_gate_cols(a, h, h_pad):
    """Pad the trailing 4H gate axis (PyTorch gate order i|f|g|o) so each gate
    block is h_pad wide; keeps the gate slices lane-aligned inside the kernel."""
    lead = a.shape[:-1]
    a4 = a.reshape(*lead, 4, h)
    a4 = jnp.pad(a4, [(0, 0)] * (len(lead) + 1) + [(0, h_pad - h)])
    return a4.reshape(*lead, 4 * h_pad)


def _derive_t_chunk(T, B_pad, H_pad, C_pad, budget_bytes):
    """Largest time chunk whose working set fits the VMEM budget.

    Conservative accounting (everything double-buffered):
      gates_x chunk (bf16) + W_hh (bf16) + W_fc/b_fc/out (f32) + h/c state (f32).
    """
    fixed = (2 * H_pad * 4 * H_pad * 2                              # W_hh (bf16, x2)
             + 2 * (H_pad * C_pad + C_pad + B_pad * C_pad) * 4      # FC head + out (x2)
             + 2 * B_pad * H_pad * 4)                               # h, c scratch
    per_t = 2 * B_pad * 4 * H_pad * 2                               # gx rows/step (bf16, x2)
    t = max(1, (budget_bytes - fixed) // per_t)
    t = int(min(t, T, 512))
    if t > 32:
        t = (t // 8) * 8          # keep the 8-wide partial unroll exact
    return max(t, 1)


def rnn_model_forward(x_btd, w_ih, w_hh, b, w_fc, b_fc, *,
                      t_chunk=None, vmem_budget_bytes=44 * 2**20):
    """x_btd: (B, T, D_in) batch_first, like the PyTorch module. Returns (B, C).

    Weights are pre-transposed for `x @ W`: w_ih (D, 4H), w_hh (H, 4H),
    b (1, 4H) = b_ih + b_hh, w_fc (H, C), b_fc (1, C); gate order i, f, g, o.
    """
    B, T, D = x_btd.shape
    H = w_hh.shape[0]
    C = w_fc.shape[1]

    # Pad to TPU-friendly layouts. Batch is padded to 16 sublanes so every
    # per-timestep row slice of the bf16 gates_x block is tile-aligned (bf16
    # packs 16 rows per sublane tile); features to 128 lanes.
    B_pad = _round_up(B, 16)
    H_pad = _round_up(H, 128)
    C_pad = _round_up(C, 128)

    if t_chunk is None:
        T_CHUNK = _derive_t_chunk(T, B_pad, H_pad, C_pad, vmem_budget_bytes)
    else:
        T_CHUNK = max(1, min(int(t_chunk), T))
    n_chunks = pl.cdiv(T, T_CHUNK)
    T_pad = n_chunks * T_CHUNK
    tail_mask = (T % T_CHUNK) != 0

    # ---- time-parallel input projection, precomputed OUTSIDE the kernel ----
    # One big XLA matmul; the serial Pallas kernel only runs the recurrence.
    gx = jnp.einsum("btd,dg->btg", x_btd.astype(jnp.float32), w_ih) + b    # (B,T,4H)
    gx = jnp.transpose(gx, (1, 0, 2))                                      # (T,B,4H)
    gx = _pad_gate_cols(gx, H, H_pad)                                      # (T,B,4H_pad)
    gx = _pad_to(gx, (T_pad, B_pad, 4 * H_pad))
    gx_flat = gx.reshape(T_pad * B_pad, 4 * H_pad).astype(jnp.bfloat16)

    # Zero-padding keeps padded hidden lanes exactly 0 through the recurrence
    # (padded gate preactivations are 0 -> g=0, c stays 0, h stays 0).
    w_hh_p = _pad_to(_pad_gate_cols(w_hh, H, H_pad),
                     (H_pad, 4 * H_pad)).astype(jnp.bfloat16)
    w_fc_p = _pad_to(w_fc, (H_pad, C_pad)).astype(jnp.float32)
    b_fc_p = _pad_to(b_fc, (1, C_pad)).astype(jnp.float32)

    UNROLL = 8

    def kernel(gx_ref, w_hh_ref, w_fc_ref, b_fc_ref, out_ref, h_ref, c_ref):
        chunk = pl.program_id(0)

        # --- init recurrent state (h0 = c0 = 0, like PyTorch) + output insurance ---
        @pl.when(chunk == 0)
        def _():
            h_ref[...] = jnp.zeros_like(h_ref)
            c_ref[...] = jnp.zeros_like(c_ref)
            out_ref[...] = jnp.zeros_like(out_ref)

        if tail_mask:
            # Number of valid timesteps in this chunk (only needed when T % T_CHUNK != 0).
            steps = jnp.minimum(T_CHUNK, T - chunk * T_CHUNK)

        def cell(t, h, c):
            row = t * B_pad
            if isinstance(row, int):
                gx_t = gx_ref[row:row + B_pad, :].astype(jnp.float32)
            else:
                gx_t = gx_ref[pl.ds(pl.multiple_of(row, 16), B_pad), :].astype(jnp.float32)
            # bf16 MXU operands, f32 accumulation; state stays f32.
            gates = gx_t + jnp.dot(h.astype(jnp.bfloat16), w_hh_ref[...],
                                   preferred_element_type=jnp.float32)
            # Lane-aligned gate slices (H_pad is a multiple of 128).
            i_g = jax.nn.sigmoid(gates[:, 0 * H_pad:1 * H_pad])
            f_g = jax.nn.sigmoid(gates[:, 1 * H_pad:2 * H_pad])
            g_g = jnp.tanh(gates[:, 2 * H_pad:3 * H_pad])
            o_g = jax.nn.sigmoid(gates[:, 3 * H_pad:4 * H_pad])
            c_new = f_g * c + i_g * g_g
            h_new = o_g * jnp.tanh(c_new)
            if tail_mask:
                valid = t < steps
                h_new = jnp.where(valid, h_new, h)
                c_new = jnp.where(valid, c_new, c)
            return h_new, c_new

        h0, c0 = h_ref[...], c_ref[...]
        if T_CHUNK <= 32:
            # Full trace-time unroll: static slices, maximal scheduler visibility.
            h, c = h0, c0
            for t in range(T_CHUNK):
                h, c = cell(t, h, c)
        else:
            # Static trip count with 8-wide manual unroll (T_CHUNK % 8 == 0 by construction).
            def block(bi, carry):
                h, c = carry
                for u in range(UNROLL):
                    h, c = cell(bi * UNROLL + u, h, c)
                return h, c
            h, c = lax.fori_loop(0, T_CHUNK // UNROLL, block, (h0, c0))

        h_ref[...] = h
        c_ref[...] = c

        # --- at the last chunk, apply the Linear head on the final hidden state ---
        @pl.when(chunk == pl.num_programs(0) - 1)
        def _():
            out_ref[...] = (jnp.dot(h, w_fc_ref[...],
                                    preferred_element_type=jnp.float32)
                            + b_fc_ref[...])

    # Explicit VMEM limit so large T_CHUNK isn't rejected by the small default
    # scoped limit, capped below v7x's 64 MiB physical VMEM.
    gx_bytes = 2 * T_CHUNK * B_pad * 4 * H_pad * 2
    w_bytes = 2 * (H_pad * 4 * H_pad * 2
                   + (H_pad * C_pad + C_pad + B_pad * C_pad) * 4)
    state_bytes = 2 * B_pad * H_pad * 4
    vmem_limit = int(min(56 * 2**20,
                         max(32 * 2**20,
                             gx_bytes + w_bytes + state_bytes + (4 << 20))))

    def build_call(const_pipeline_mode):
        kw = {} if const_pipeline_mode is None else {"pipeline_mode": const_pipeline_mode}
        return pl.pallas_call(
            kernel,
            out_shape=jax.ShapeDtypeStruct((B_pad, C_pad), jnp.float32),
            grid_spec=pltpu.PrefetchScalarGridSpec(
                num_scalar_prefetch=0,
                grid=(n_chunks,),
                in_specs=[
                    pl.BlockSpec((T_CHUNK * B_pad, 4 * H_pad),
                                 lambda c: (c, 0)),                          # gates_x chunk
                    pl.BlockSpec((H_pad, 4 * H_pad), lambda c: (0, 0), **kw),  # W_hh (bf16)
                    pl.BlockSpec((H_pad, C_pad), lambda c: (0, 0), **kw),      # W_fc
                    pl.BlockSpec((1, C_pad), lambda c: (0, 0), **kw),          # b_fc
                ],
                out_specs=pl.BlockSpec((B_pad, C_pad), lambda c: (0, 0)),
                scratch_shapes=[
                    pltpu.VMEM((B_pad, H_pad), jnp.float32),   # h state
                    pltpu.VMEM((B_pad, H_pad), jnp.float32),   # c state
                ],
            ),
            compiler_params=pltpu.CompilerParams(
                dimension_semantics=("arbitrary",),   # serial recurrence over time chunks
                vmem_limit_bytes=vmem_limit,
            ),
        )

    args = (gx_flat, w_hh_p, w_fc_p, b_fc_p)
    try:
        # Single-buffer the constant-index weight operands (constant index_map ->
        # double-buffering only doubles their VMEM footprint).
        out_padded = jax.block_until_ready(build_call(pl.Buffered(1))(*args))
    except Exception:
        # Graceful fallback if pipeline_mode on pallas_call is unsupported here.
        out_padded = build_call(None)(*args)

    return out_padded[:B, :C]


def rnn_model_reference(x_btd, w_ih, w_hh, b, w_fc, b_fc):
    """Pure-JAX reference (same math, all f32) for a correctness check."""
    B = x_btd.shape[0]
    H = w_hh.shape[0]

    def step(carry, x_t):
        h, c = carry
        gates = x_t @ w_ih + h @ w_hh + b
        i_g = jax.nn.sigmoid(gates[:, 0 * H:1 * H])
        f_g = jax.nn.sigmoid(gates[:, 1 * H:2 * H])
        g_g = jnp.tanh(gates[:, 2 * H:3 * H])
        o_g = jax.nn.sigmoid(gates[:, 3 * H:4 * H])
        c = f_g * c + i_g * g_g
        h = o_g * jnp.tanh(c)
        return (h, c), None

    x_tbd = jnp.transpose(x_btd, (1, 0, 2))
    (h, _), _ = lax.scan(step, (jnp.zeros((B, H), jnp.float32),
                                jnp.zeros((B, H), jnp.float32)), x_tbd)
    return h @ w_fc + b_fc


if __name__ == "__main__":
    # Small deterministic shapes consistent with the module's forward:
    # x: (batch, seq, input_size); LSTM hidden_size=64 (as in the spec); Linear -> num_classes.
    batch, seq, input_size = 4, 8, 16
    hidden_size = 64
    num_classes = 5

    key = jax.random.PRNGKey(0)
    k_x, k_wih, k_whh, k_bih, k_bhh, k_wfc, k_bfc = jax.random.split(key, 7)

    x = jax.random.normal(k_x, (batch, seq, input_size), jnp.float32)

    scale = 0.1
    # Stored pre-transposed for `x @ W` inside the kernel (PyTorch gate order i,f,g,o).
    w_ih = scale * jax.random.normal(k_wih, (input_size, 4 * hidden_size), jnp.float32)
    w_hh = scale * jax.random.normal(k_whh, (hidden_size, 4 * hidden_size), jnp.float32)
    b_ih = scale * jax.random.normal(k_bih, (1, 4 * hidden_size), jnp.float32)
    b_hh = scale * jax.random.normal(k_bhh, (1, 4 * hidden_size), jnp.float32)
    b = b_ih + b_hh
    w_fc = scale * jax.random.normal(k_wfc, (hidden_size, num_classes), jnp.float32)
    b_fc = scale * jax.random.normal(k_bfc, (1, num_classes), jnp.float32)

    out = rnn_model_forward(x, w_ih, w_hh, b, w_fc, b_fc)
    out = jax.block_until_ready(out)

    ref = rnn_model_reference(x, w_ih, w_hh, b, w_fc, b_fc)
    assert out.shape == (batch, num_classes)
    # bf16 MXU operands (per perf review) -> tolerance loosened vs. pure-f32.
    assert jnp.allclose(out, ref, atol=1e-2, rtol=1e-2), "mismatch vs reference"

    print("KERNEL_OK")
</pallas_src>

<mosaic_0001>
module attributes {stable_mosaic.version = 11 : i64} {
  func.func @kernel(%arg0: i32, %arg1: memref<128x512xbf16, #tpu.memory_space<vmem>>, %arg2: memref<128x512xbf16, #tpu.memory_space<vmem>>, %arg3: memref<128x128xf32, #tpu.memory_space<vmem>>, %arg4: memref<1x128xf32, #tpu.memory_space<vmem>>, %arg5: memref<16x128xf32, #tpu.memory_space<vmem>>, %arg6: memref<16x128xf32, #tpu.memory_space<vmem>>, %arg7: memref<16x128xf32, #tpu.memory_space<vmem>>) attributes {dimension_semantics = [#tpu.dimension_semantics<arbitrary>], iteration_bounds = array<i64: 1>, scalar_prefetch = 0 : i64, scratch_operands = 2 : i64, tpu.core_type = #tpu.core_type<tc>, window_params = [{transform_indices = @transform_0, window_bounds = array<i64: 128, 512>}, {pipeline_mode = #tpu.pipeline_mode<synchronous>, transform_indices = @transform_1, window_bounds = array<i64: 128, 512>}, {pipeline_mode = #tpu.pipeline_mode<synchronous>, transform_indices = @transform_2, window_bounds = array<i64: 128, 128>}, {pipeline_mode = #tpu.pipeline_mode<synchronous>, transform_indices = @transform_3, window_bounds = array<i64: 1, 128>}, {pipeline_mode = #tpu.pipeline_mode<synchronous>, transform_indices = @transform_4, window_bounds = array<i64: 16, 128>}]} {
    %c0_i32 = arith.constant 0 : i32
    %0 = arith.cmpi eq, %arg0, %c0_i32 : i32
    %1 = arith.extui %0 : i1 to i32
    %c0_i32_0 = arith.constant 0 : i32
    %2 = arith.cmpi ne, %1, %c0_i32_0 : i32
    scf.if %2 {
      %cst_66 = arith.constant 0.000000e+00 : f32
      %258 = vector.broadcast %cst_66 : f32 to vector<16x128xf32>
      %c0_67 = arith.constant 0 : index
      %c0_68 = arith.constant 0 : index
      %259 = vector.load %arg6[%c0_67, %c0_68] : memref<16x128xf32, #tpu.memory_space<vmem>>, vector<16x128xf32>
      tpu.vector_store %arg6[%c0_67, %c0_68], %258 {strides = array<i32>} : memref<16x128xf32, #tpu.memory_space<vmem>>, vector<16x128xf32>,
      %cst_69 = arith.constant 0.000000e+00 : f32
      %260 = vector.broadcast %cst_69 : f32 to vector<16x128xf32>
      %c0_70 = arith.constant 0 : index
      %c0_71 = arith.constant 0 : index
      %261 = vector.load %arg7[%c0_70, %c0_71] : memref<16x128xf32, #tpu.memory_space<vmem>>, vector<16x128xf32>
      tpu.vector_store %arg7[%c0_70, %c0_71], %260 {strides = array<i32>} : memref<16x128xf32, #tpu.memory_space<vmem>>, vector<16x128xf32>,
      %cst_72 = arith.constant 0.000000e+00 : f32
      %262 = vector.broadcast %cst_72 : f32 to vector<16x128xf32>
      %c0_73 = arith.constant 0 : index
      %c0_74 = arith.constant 0 : index
      %263 = vector.load %arg5[%c0_73, %c0_74] : memref<16x128xf32, #tpu.memory_space<vmem>>, vector<16x128xf32>
      tpu.vector_store %arg5[%c0_73, %c0_74], %262 {strides = array<i32>} : memref<16x128xf32, #tpu.memory_space<vmem>>, vector<16x128xf32>,
    } else {
    }
    %c0 = arith.constant 0 : index
    %c0_1 = arith.constant 0 : index
    %3 = vector.load %arg6[%c0, %c0_1] : memref<16x128xf32, #tpu.memory_space<vmem>>, vector<16x128xf32>
    %c0_2 = arith.constant 0 : index
    %c0_3 = arith.constant 0 : index
    %4 = vector.load %arg7[%c0_2, %c0_3] : memref<16x128xf32, #tpu.memory_space<vmem>>, vector<16x128xf32>
    %c0_4 = arith.constant 0 : index
    %c0_5 = arith.constant 0 : index
    %5 = vector.load %arg1[%c0_4, %c0_5] : memref<128x512xbf16, #tpu.memory_space<vmem>>, vector<16x512xbf16>
    %6 = arith.extf %5 : vector<16x512xbf16> to vector<16x512xf32>
    %7 = arith.truncf %3 : vector<16x128xf32> to vector<16x128xbf16>
    %c0_6 = arith.constant 0 : index
    %c0_7 = arith.constant 0 : index
    %8 = vector.load %arg2[%c0_6, %c0_7] : memref<128x512xbf16, #tpu.memory_space<vmem>>, vector<128x512xbf16>
    %cst = arith.constant dense<0.000000e+00> : vector<16x512xf32>
    %9 = tpu.matmul %7, %8, %cst {dimension_numbers = #tpu.dot_dimension_numbers<[1], [0], [0], [1], [0, 0, 1, 1], [], []>} : vector<16x128xbf16>, vector<128x512xbf16>, vector<16x512xf32> -> vector<16x512xf32>
    %10 = arith.addf %6, %9 : vector<16x512xf32>
    %11 = vector.extract_strided_slice %10 {offsets = [0, 0], sizes = [16, 128], strides = [1, 1]} : vector<16x512xf32> to vector<16x128xf32>
    %12 = arith.negf %11 : vector<16x128xf32>
    %13 = math.exp %12 : vector<16x128xf32>
    %cst_8 = arith.constant 1.000000e+00 : f32
    %14 = vector.broadcast %cst_8 : f32 to vector<16x128xf32>
    %15 = arith.addf %14, %13 : vector<16x128xf32>
    %16 = arith.divf %14, %15 : vector<16x128xf32>
    %17 = vector.extract_strided_slice %10 {offsets = [0, 128], sizes = [16, 128], strides = [1, 1]} : vector<16x512xf32> to vector<16x128xf32>
    %18 = arith.negf %17 : vector<16x128xf32>
    %19 = math.exp %18 : vector<16x128xf32>
    %cst_9 = arith.constant 1.000000e+00 : f32
    %20 = vector.broadcast %cst_9 : f32 to vector<16x128xf32>
    %21 = arith.addf %20, %19 : vector<16x128xf32>
    %22 = arith.divf %20, %21 : vector<16x128xf32>
    %23 = vector.extract_strided_slice %10 {offsets = [0, 256], sizes = [16, 128], strides = [1, 1]} : vector<16x512xf32> to vector<16x128xf32>
    %24 = math.tanh %23 : vector<16x128xf32>
    %25 = vector.extract_strided_slice %10 {offsets = [0, 384], sizes = [16, 128], strides = [1, 1]} : vector<16x512xf32> to vector<16x128xf32>
    %26 = arith.negf %25 : vector<16x128xf32>
    %27 = math.exp %26 : vector<16x128xf32>
    %cst_10 = arith.constant 1.000000e+00 : f32
    %28 = vector.broadcast %cst_10 : f32 to vector<16x128xf32>
    %29 = arith.addf %28, %27 : vector<16x128xf32>
    %30 = arith.divf %28, %29 : vector<16x128xf32>
    %31 = arith.mulf %22, %4 : vector<16x128xf32>
    %32 = arith.mulf %16, %24 : vector<16x128xf32>
    %33 = arith.addf %31, %32 : vector<16x128xf32>
    %34 = math.tanh %33 : vector<16x128xf32>
    %35 = arith.mulf %30, %34 : vector<16x128xf32>
    %c16 = arith.constant 16 : index
    %c0_11 = arith.constant 0 : index
    %36 = vector.load %arg1[%c16, %c0_11] : memref<128x512xbf16, #tpu.memory_space<vmem>>, vector<16x512xbf16>
    %37 = arith.extf %36 : vector<16x512xbf16> to vector<16x512xf32>
    %38 = arith.truncf %35 : vector<16x128xf32> to vector<16x128xbf16>
    %c0_12 = arith.constant 0 : index
    %c0_13 = arith.constant 0 : index
    %39 = vector.load %arg2[%c0_12, %c0_13] : memref<128x512xbf16, #tpu.memory_space<vmem>>, vector<128x512xbf16>
    %cst_14 = arith.constant dense<0.000000e+00> : vector<16x512xf32>
    %40 = tpu.matmul %38, %39, %cst_14 {dimension_numbers = #tpu.dot_dimension_numbers<[1], [0], [0], [1], [0, 0, 1, 1], [], []>} : vector<16x128xbf16>, vector<128x512xbf16>, vector<16x512xf32> -> vector<16x512xf32>
    %41 = arith.addf %37, %40 : vector<16x512xf32>
    %42 = vector.extract_strided_slice %41 {offsets = [0, 0], sizes = [16, 128], strides = [1, 1]} : vector<16x512xf32> to vector<16x128xf32>
    %43 = arith.negf %42 : vector<16x128xf32>
    %44 = math.exp %43 : vector<16x128xf32>
    %cst_15 = arith.constant 1.000000e+00 : f32
    %45 = vector.broadcast %cst_15 : f32 to vector<16x128xf32>
    %46 = arith.addf %45, %44 : vector<16x128xf32>
    %47 = arith.divf %45, %46 : vector<16x128xf32>
    %48 = vector.extract_strided_slice %41 {offsets = [0, 128], sizes = [16, 128], strides = [1, 1]} : vector<16x512xf32> to vector<16x128xf32>
    %49 = arith.negf %48 : vector<16x128xf32>
    %50 = math.exp %49 : vector<16x128xf32>
    %cst_16 = arith.constant 1.000000e+00 : f32
    %51 = vector.broadcast %cst_16 : f32 to vector<16x128xf32>
    %52 = arith.addf %51, %50 : vector<16x128xf32>
    %53 = arith.divf %51, %52 : vector<16x128xf32>
    %54 = vector.extract_strided_slice %41 {offsets = [0, 256], sizes = [16, 128], strides = [1, 1]} : vector<16x512xf32> to vector<16x128xf32>
    %55 = math.tanh %54 : vector<16x128xf32>
    %56 = vector.extract_strided_slice %41 {offsets = [0, 384], sizes = [16, 128], strides = [1, 1]} : vector<16x512xf32> to vector<16x128xf32>
    %57 = arith.negf %56 : vector<16x128xf32>
    %58 = math.exp %57 : vector<16x128xf32>
    %cst_17 = arith.constant 1.000000e+00 : f32
    %59 = vector.broadcast %cst_17 : f32 to vector<16x128xf32>
    %60 = arith.addf %59, %58 : vector<16x128xf32>
    %61 = arith.divf %59, %60 : vector<16x128xf32>
    %62 = arith.mulf %53, %33 : vector<16x128xf32>
    %63 = arith.mulf %47, %55 : vector<16x128xf32>
    %64 = arith.addf %62, %63 : vector<16x128xf32>
    %65 = math.tanh %64 : vector<16x128xf32>
    %66 = arith.mulf %61, %65 : vector<16x128xf32>
    %c32 = arith.constant 32 : index
    %c0_18 = arith.constant 0 : index
    %67 = vector.load %arg1[%c32, %c0_18] : memref<128x512xbf16, #tpu.memory_space<vmem>>, vector<16x512xbf16>
    %68 = arith.extf %67 : vector<16x512xbf16> to vector<16x512xf32>
    %69 = arith.truncf %66 : vector<16x128xf32> to vector<16x128xbf16>
    %c0_19 = arith.constant 0 : index
    %c0_20 = arith.constant 0 : index
    %70 = vector.load %arg2[%c0_19, %c0_20] : memref<128x512xbf16, #tpu.memory_space<vmem>>, vector<128x512xbf16>
    %cst_21 = arith.constant dense<0.000000e+00> : vector<16x512xf32>
    %71 = tpu.matmul %69, %70, %cst_21 {dimension_numbers = #tpu.dot_dimension_numbers<[1], [0], [0], [1], [0, 0, 1, 1], [], []>} : vector<16x128xbf16>, vector<128x512xbf16>, vector<16x512xf32> -> vector<16x512xf32>
    %72 = arith.addf %68, %71 : vector<16x512xf32>
    %73 = vector.extract_strided_slice %72 {offsets = [0, 0], sizes = [16, 128], strides = [1, 1]} : vector<16x512xf32> to vector<16x128xf32>
    %74 = arith.negf %73 : vector<16x128xf32>
    %75 = math.exp %74 : vector<16x128xf32>
    %cst_22 = arith.constant 1.000000e+00 : f32
    %76 = vector.broadcast %cst_22 : f32 to vector<16x128xf32>
    %77 = arith.addf %76, %75 : vector<16x128xf32>
    %78 = arith.divf %76, %77 : vector<16x128xf32>
    %79 = vector.extract_strided_slice %72 {offsets = [0, 128], sizes = [16, 128], strides = [1, 1]} : vector<16x512xf32> to vector<16x128xf32>
    %80 = arith.negf %79 : vector<16x128xf32>
    %81 = math.exp %80 : vector<16x128xf32>
    %cst_23 = arith.constant 1.000000e+00 : f32
    %82 = vector.broadcast %cst_23 : f32 to vector<16x128xf32>
    %83 = arith.addf %82, %81 : vector<16x128xf32>
    %84 = arith.divf %82, %83 : vector<16x128xf32>
    %85 = vector.extract_strided_slice %72 {offsets = [0, 256], sizes = [16, 128], strides = [1, 1]} : vector<16x512xf32> to vector<16x128xf32>
    %86 = math.tanh %85 : vector<16x128xf32>
    %87 = vector.extract_strided_slice %72 {offsets = [0, 384], sizes = [16, 128], strides = [1, 1]} : vector<16x512xf32> to vector<16x128xf32>
    %88 = arith.negf %87 : vector<16x128xf32>
    %89 = math.exp %88 : vector<16x128xf32>
    %cst_24 = arith.constant 1.000000e+00 : f32
    %90 = vector.broadcast %cst_24 : f32 to vector<16x128xf32>
    %91 = arith.addf %90, %89 : vector<16x128xf32>
    %92 = arith.divf %90, %91 : vector<16x128xf32>
    %93 = arith.mulf %84, %64 : vector<16x128xf32>
    %94 = arith.mulf %78, %86 : vector<16x128xf32>
    %95 = arith.addf %93, %94 : vector<16x128xf32>
    %96 = math.tanh %95 : vector<16x128xf32>
    %97 = arith.mulf %92, %96 : vector<16x128xf32>
    %c48 = arith.constant 48 : index
    %c0_25 = arith.constant 0 : index
    %98 = vector.load %arg1[%c48, %c0_25] : memref<128x512xbf16, #tpu.memory_space<vmem>>, vector<16x512xbf16>
    %99 = arith.extf %98 : vector<16x512xbf16> to vector<16x512xf32>
    %100 = arith.truncf %97 : vector<16x128xf32> to vector<16x128xbf16>
    %c0_26 = arith.constant 0 : index
    %c0_27 = arith.constant 0 : index
    %101 = vector.load %arg2[%c0_26, %c0_27] : memref<128x512xbf16, #tpu.memory_space<vmem>>, vector<128x512xbf16>
    %cst_28 = arith.constant dense<0.000000e+00> : vector<16x512xf32>
    %102 = tpu.matmul %100, %101, %cst_28 {dimension_numbers = #tpu.dot_dimension_numbers<[1], [0], [0], [1], [0, 0, 1, 1], [], []>} : vector<16x128xbf16>, vector<128x512xbf16>, vector<16x512xf32> -> vector<16x512xf32>
    %103 = arith.addf %99, %102 : vector<16x512xf32>
    %104 = vector.extract_strided_slice %103 {offsets = [0, 0], sizes = [16, 128], strides = [1, 1]} : vector<16x512xf32> to vector<16x128xf32>
    %105 = arith.negf %104 : vector<16x128xf32>
    %106 = math.exp %105 : vector<16x128xf32>
    %cst_29 = arith.constant 1.000000e+00 : f32
    %107 = vector.broadcast %cst_29 : f32 to vector<16x128xf32>
    %108 = arith.addf %107, %106 : vector<16x128xf32>
    %109 = arith.divf %107, %108 : vector<16x128xf32>
    %110 = vector.extract_strided_slice %103 {offsets = [0, 128], sizes = [16, 128], strides = [1, 1]} : vector<16x512xf32> to vector<16x128xf32>
    %111 = arith.negf %110 : vector<16x128xf32>
    %112 = math.exp %111 : vector<16x128xf32>
    %cst_30 = arith.constant 1.000000e+00 : f32
    %113 = vector.broadcast %cst_30 : f32 to vector<16x128xf32>
    %114 = arith.addf %113, %112 : vector<16x128xf32>
    %115 = arith.divf %113, %114 : vector<16x128xf32>
    %116 = vector.extract_strided_slice %103 {offsets = [0, 256], sizes = [16, 128], strides = [1, 1]} : vector<16x512xf32> to vector<16x128xf32>
    %117 = math.tanh %116 : vector<16x128xf32>
    %118 = vector.extract_strided_slice %103 {offsets = [0, 384], sizes = [16, 128], strides = [1, 1]} : vector<16x512xf32> to vector<16x128xf32>
    %119 = arith.negf %118 : vector<16x128xf32>
    %120 = math.exp %119 : vector<16x128xf32>
    %cst_31 = arith.constant 1.000000e+00 : f32
    %121 = vector.broadcast %cst_31 : f32 to vector<16x128xf32>
    %122 = arith.addf %121, %120 : vector<16x128xf32>
    %123 = arith.divf %121, %122 : vector<16x128xf32>
    %124 = arith.mulf %115, %95 : vector<16x128xf32>
    %125 = arith.mulf %109, %117 : vector<16x128xf32>
    %126 = arith.addf %124, %125 : vector<16x128xf32>
    %127 = math.tanh %126 : vector<16x128xf32>
    %128 = arith.mulf %123, %127 : vector<16x128xf32>
    %c64 = arith.constant 64 : index
    %c0_32 = arith.constant 0 : index
    %129 = vector.load %arg1[%c64, %c0_32] : memref<128x512xbf16, #tpu.memory_space<vmem>>, vector<16x512xbf16>
    %130 = arith.extf %129 : vector<16x512xbf16> to vector<16x512xf32>
    %131 = arith.truncf %128 : vector<16x128xf32> to vector<16x128xbf16>
    %c0_33 = arith.constant 0 : index
    %c0_34 = arith.constant 0 : index
    %132 = vector.load %arg2[%c0_33, %c0_34] : memref<128x512xbf16, #tpu.memory_space<vmem>>, vector<128x512xbf16>
    %cst_35 = arith.constant dense<0.000000e+00> : vector<16x512xf32>
    %133 = tpu.matmul %131, %132, %cst_35 {dimension_numbers = #tpu.dot_dimension_numbers<[1], [0], [0], [1], [0, 0, 1, 1], [], []>} : vector<16x128xbf16>, vector<128x512xbf16>, vector<16x512xf32> -> vector<16x512xf32>
    %134 = arith.addf %130, %133 : vector<16x512xf32>
    %135 = vector.extract_strided_slice %134 {offsets = [0, 0], sizes = [16, 128], strides = [1, 1]} : vector<16x512xf32> to vector<16x128xf32>
    %136 = arith.negf %135 : vector<16x128xf32>
    %137 = math.exp %136 : vector<16x128xf32>
    %cst_36 = arith.constant 1.000000e+00 : f32
    %138 = vector.broadcast %cst_36 : f32 to vector<16x128xf32>
    %139 = arith.addf %138, %137 : vector<16x128xf32>
    %140 = arith.divf %138, %139 : vector<16x128xf32>
    %141 = vector.extract_strided_slice %134 {offsets = [0, 128], sizes = [16, 128], strides = [1, 1]} : vector<16x512xf32> to vector<16x128xf32>
    %142 = arith.negf %141 : vector<16x128xf32>
    %143 = math.exp %142 : vector<16x128xf32>
    %cst_37 = arith.constant 1.000000e+00 : f32
    %144 = vector.broadcast %cst_37 : f32 to vector<16x128xf32>
    %145 = arith.addf %144, %143 : vector<16x128xf32>
    %146 = arith.divf %144, %145 : vector<16x128xf32>
    %147 = vector.extract_strided_slice %134 {offsets = [0, 256], sizes = [16, 128], strides = [1, 1]} : vector<16x512xf32> to vector<16x128xf32>
    %148 = math.tanh %147 : vector<16x128xf32>
    %149 = vector.extract_strided_slice %134 {offsets = [0, 384], sizes = [16, 128], strides = [1, 1]} : vector<16x512xf32> to vector<16x128xf32>
    %150 = arith.negf %149 : vector<16x128xf32>
    %151 = math.exp %150 : vector<16x128xf32>
    %cst_38 = arith.constant 1.000000e+00 : f32
    %152 = vector.broadcast %cst_38 : f32 to vector<16x128xf32>
    %153 = arith.addf %152, %151 : vector<16x128xf32>
    %154 = arith.divf %152, %153 : vector<16x128xf32>
    %155 = arith.mulf %146, %126 : vector<16x128xf32>
    %156 = arith.mulf %140, %148 : vector<16x128xf32>
    %157 = arith.addf %155, %156 : vector<16x128xf32>
    %158 = math.tanh %157 : vector<16x128xf32>
    %159 = arith.mulf %154, %158 : vector<16x128xf32>
    %c80 = arith.constant 80 : index
    %c0_39 = arith.constant 0 : index
    %160 = vector.load %arg1[%c80, %c0_39] : memref<128x512xbf16, #tpu.memory_space<vmem>>, vector<16x512xbf16>
    %161 = arith.extf %160 : vector<16x512xbf16> to vector<16x512xf32>
    %162 = arith.truncf %159 : vector<16x128xf32> to vector<16x128xbf16>
    %c0_40 = arith.constant 0 : index
    %c0_41 = arith.constant 0 : index
    %163 = vector.load %arg2[%c0_40, %c0_41] : memref<128x512xbf16, #tpu.memory_space<vmem>>, vector<128x512xbf16>
    %cst_42 = arith.constant dense<0.000000e+00> : vector<16x512xf32>
    %164 = tpu.matmul %162, %163, %cst_42 {dimension_numbers = #tpu.dot_dimension_numbers<[1], [0], [0], [1], [0, 0, 1, 1], [], []>} : vector<16x128xbf16>, vector<128x512xbf16>, vector<16x512xf32> -> vector<16x512xf32>
    %165 = arith.addf %161, %164 : vector<16x512xf32>
    %166 = vector.extract_strided_slice %165 {offsets = [0, 0], sizes = [16, 128], strides = [1, 1]} : vector<16x512xf32> to vector<16x128xf32>
    %167 = arith.negf %166 : vector<16x128xf32>
    %168 = math.exp %167 : vector<16x128xf32>
    %cst_43 = arith.constant 1.000000e+00 : f32
    %169 = vector.broadcast %cst_43 : f32 to vector<16x128xf32>
    %170 = arith.addf %169, %168 : vector<16x128xf32>
    %171 = arith.divf %169, %170 : vector<16x128xf32>
    %172 = vector.extract_strided_slice %165 {offsets = [0, 128], sizes = [16, 128], strides = [1, 1]} : vector<16x512xf32> to vector<16x128xf32>
    %173 = arith.negf %172 : vector<16x128xf32>
    %174 = math.exp %173 : vector<16x128xf32>
    %cst_44 = arith.constant 1.000000e+00 : f32
    %175 = vector.broadcast %cst_44 : f32 to vector<16x128xf32>
    %176 = arith.addf %175, %174 : vector<16x128xf32>
    %177 = arith.divf %175, %176 : vector<16x128xf32>
    %178 = vector.extract_strided_slice %165 {offsets = [0, 256], sizes = [16, 128], strides = [1, 1]} : vector<16x512xf32> to vector<16x128xf32>
    %179 = math.tanh %178 : vector<16x128xf32>
    %180 = vector.extract_strided_slice %165 {offsets = [0, 384], sizes = [16, 128], strides = [1, 1]} : vector<16x512xf32> to vector<16x128xf32>
    %181 = arith.negf %180 : vector<16x128xf32>
    %182 = math.exp %181 : vector<16x128xf32>
    %cst_45 = arith.constant 1.000000e+00 : f32
    %183 = vector.broadcast %cst_45 : f32 to vector<16x128xf32>
    %184 = arith.addf %183, %182 : vector<16x128xf32>
    %185 = arith.divf %183, %184 : vector<16x128xf32>
    %186 = arith.mulf %177, %157 : vector<16x128xf32>
    %187 = arith.mulf %171, %179 : vector<16x128xf32>
    %188 = arith.addf %186, %187 : vector<16x128xf32>
    %189 = math.tanh %188 : vector<16x128xf32>
    %190 = arith.mulf %185, %189 : vector<16x128xf32>
    %c96 = arith.constant 96 : index
    %c0_46 = arith.constant 0 : index
    %191 = vector.load %arg1[%c96, %c0_46] : memref<128x512xbf16, #tpu.memory_space<vmem>>, vector<16x512xbf16>
    %192 = arith.extf %191 : vector<16x512xbf16> to vector<16x512xf32>
    %193 = arith.truncf %190 : vector<16x128xf32> to vector<16x128xbf16>
    %c0_47 = arith.constant 0 : index
    %c0_48 = arith.constant 0 : index
    %194 = vector.load %arg2[%c0_47, %c0_48] : memref<128x512xbf16, #tpu.memory_space<vmem>>, vector<128x512xbf16>
    %cst_49 = arith.constant dense<0.000000e+00> : vector<16x512xf32>
    %195 = tpu.matmul %193, %194, %cst_49 {dimension_numbers = #tpu.dot_dimension_numbers<[1], [0], [0], [1], [0, 0, 1, 1], [], []>} : vector<16x128xbf16>, vector<128x512xbf16>, vector<16x512xf32> -> vector<16x512xf32>
    %196 = arith.addf %192, %195 : vector<16x512xf32>
    %197 = vector.extract_strided_slice %196 {offsets = [0, 0], sizes = [16, 128], strides = [1, 1]} : vector<16x512xf32> to vector<16x128xf32>
    %198 = arith.negf %197 : vector<16x128xf32>
    %199 = math.exp %198 : vector<16x128xf32>
    %cst_50 = arith.constant 1.000000e+00 : f32
    %200 = vector.broadcast %cst_50 : f32 to vector<16x128xf32>
    %201 = arith.addf %200, %199 : vector<16x128xf32>
    %202 = arith.divf %200, %201 : vector<16x128xf32>
    %203 = vector.extract_strided_slice %196 {offsets = [0, 128], sizes = [16, 128], strides = [1, 1]} : vector<16x512xf32> to vector<16x128xf32>
    %204 = arith.negf %203 : vector<16x128xf32>
    %205 = math.exp %204 : vector<16x128xf32>
    %cst_51 = arith.constant 1.000000e+00 : f32
    %206 = vector.broadcast %cst_51 : f32 to vector<16x128xf32>
    %207 = arith.addf %206, %205 : vector<16x128xf32>
    %208 = arith.divf %206, %207 : vector<16x128xf32>
    %209 = vector.extract_strided_slice %196 {offsets = [0, 256], sizes = [16, 128], strides = [1, 1]} : vector<16x512xf32> to vector<16x128xf32>
    %210 = math.tanh %209 : vector<16x128xf32>
    %211 = vector.extract_strided_slice %196 {offsets = [0, 384], sizes = [16, 128], strides = [1, 1]} : vector<16x512xf32> to vector<16x128xf32>
    %212 = arith.negf %211 : vector<16x128xf32>
    %213 = math.exp %212 : vector<16x128xf32>
    %cst_52 = arith.constant 1.000000e+00 : f32
    %214 = vector.broadcast %cst_52 : f32 to vector<16x128xf32>
    %215 = arith.addf %214, %213 : vector<16x128xf32>
    %216 = arith.divf %214, %215 : vector<16x128xf32>
    %217 = arith.mulf %208, %188 : vector<16x128xf32>
    %218 = arith.mulf %202, %210 : vector<16x128xf32>
    %219 = arith.addf %217, %218 : vector<16x128xf32>
    %220 = math.tanh %219 : vector<16x128xf32>
    %221 = arith.mulf %216, %220 : vector<16x128xf32>
    %c112 = arith.constant 112 : index
    %c0_53 = arith.constant 0 : index
    %222 = vector.load %arg1[%c112, %c0_53] : memref<128x512xbf16, #tpu.memory_space<vmem>>, vector<16x512xbf16>
    %223 = arith.extf %222 : vector<16x512xbf16> to vector<16x512xf32>
    %224 = arith.truncf %221 : vector<16x128xf32> to vector<16x128xbf16>
    %c0_54 = arith.constant 0 : index
    %c0_55 = arith.constant 0 : index
    %225 = vector.load %arg2[%c0_54, %c0_55] : memref<128x512xbf16, #tpu.memory_space<vmem>>, vector<128x512xbf16>
    %cst_56 = arith.constant dense<0.000000e+00> : vector<16x512xf32>
    %226 = tpu.matmul %224, %225, %cst_56 {dimension_numbers = #tpu.dot_dimension_numbers<[1], [0], [0], [1], [0, 0, 1, 1], [], []>} : vector<16x128xbf16>, vector<128x512xbf16>, vector<16x512xf32> -> vector<16x512xf32>
    %227 = arith.addf %223, %226 : vector<16x512xf32>
    %228 = vector.extract_strided_slice %227 {offsets = [0, 0], sizes = [16, 128], strides = [1, 1]} : vector<16x512xf32> to vector<16x128xf32>
    %229 = arith.negf %228 : vector<16x128xf32>
    %230 = math.exp %229 : vector<16x128xf32>
    %cst_57 = arith.constant 1.000000e+00 : f32
    %231 = vector.broadcast %cst_57 : f32 to vector<16x128xf32>
    %232 = arith.addf %231, %230 : vector<16x128xf32>
    %233 = arith.divf %231, %232 : vector<16x128xf32>
    %234 = vector.extract_strided_slice %227 {offsets = [0, 128], sizes = [16, 128], strides = [1, 1]} : vector<16x512xf32> to vector<16x128xf32>
    %235 = arith.negf %234 : vector<16x128xf32>
    %236 = math.exp %235 : vector<16x128xf32>
    %cst_58 = arith.constant 1.000000e+00 : f32
    %237 = vector.broadcast %cst_58 : f32 to vector<16x128xf32>
    %238 = arith.addf %237, %236 : vector<16x128xf32>
    %239 = arith.divf %237, %238 : vector<16x128xf32>
    %240 = vector.extract_strided_slice %227 {offsets = [0, 256], sizes = [16, 128], strides = [1, 1]} : vector<16x512xf32> to vector<16x128xf32>
    %241 = math.tanh %240 : vector<16x128xf32>
    %242 = vector.extract_strided_slice %227 {offsets = [0, 384], sizes = [16, 128], strides = [1, 1]} : vector<16x512xf32> to vector<16x128xf32>
    %243 = arith.negf %242 : vector<16x128xf32>
    %244 = math.exp %243 : vector<16x128xf32>
    %cst_59 = arith.constant 1.000000e+00 : f32
    %245 = vector.broadcast %cst_59 : f32 to vector<16x128xf32>
    %246 = arith.addf %245, %244 : vector<16x128xf32>
    %247 = arith.divf %245, %246 : vector<16x128xf32>
    %248 = arith.mulf %239, %219 : vector<16x128xf32>
    %249 = arith.mulf %233, %241 : vector<16x128xf32>
    %250 = arith.addf %248, %249 : vector<16x128xf32>
    %251 = math.tanh %250 : vector<16x128xf32>
    %252 = arith.mulf %247, %251 : vector<16x128xf32>
    %c0_60 = arith.constant 0 : index
    %c0_61 = arith.constant 0 : index
    %253 = vector.load %arg6[%c0_60, %c0_61] : memref<16x128xf32, #tpu.memory_space<vmem>>, vector<16x128xf32>
    tpu.vector_store %arg6[%c0_60, %c0_61], %252 {strides = array<i32>} : memref<16x128xf32, #tpu.memory_space<vmem>>, vector<16x128xf32>,
    %c0_62 = arith.constant 0 : index
    %c0_63 = arith.constant 0 : index
    %254 = vector.load %arg7[%c0_62, %c0_63] : memref<16x128xf32, #tpu.memory_space<vmem>>, vector<16x128xf32>
    tpu.vector_store %arg7[%c0_62, %c0_63], %250 {strides = array<i32>} : memref<16x128xf32, #tpu.memory_space<vmem>>, vector<16x128xf32>,
    %c0_i32_64 = arith.constant 0 : i32
    %255 = arith.cmpi eq, %arg0, %c0_i32_64 : i32
    %256 = arith.extui %255 : i1 to i32
    %c0_i32_65 = arith.constant 0 : i32
    %257 = arith.cmpi ne, %256, %c0_i32_65 : i32
    scf.if %257 {
      %c0_66 = arith.constant 0 : index
      %c0_67 = arith.constant 0 : index
      %258 = vector.load %arg3[%c0_66, %c0_67] : memref<128x128xf32, #tpu.memory_space<vmem>>, vector<128x128xf32>
      %cst_68 = arith.constant dense<0.000000e+00> : vector<16x128xf32>
      %259 = tpu.matmul %252, %258, %cst_68 {dimension_numbers = #tpu.dot_dimension_numbers<[1], [0], [0], [1], [0, 0, 1, 1], [], []>} : vector<16x128xf32>, vector<128x128xf32>, vector<16x128xf32> -> vector<16x128xf32>
      %c0_69 = arith.constant 0 : index
      %c0_70 = arith.constant 0 : index
      %260 = vector.load %arg4[%c0_69, %c0_70] : memref<1x128xf32, #tpu.memory_space<vmem>>, vector<1x128xf32>
      %261 = vector.broadcast %260 : vector<1x128xf32> to vector<16x128xf32>
      %262 = arith.addf %259, %261 : vector<16x128xf32>
      %c0_71 = arith.constant 0 : index
      %c0_72 = arith.constant 0 : index
      %263 = vector.load %arg5[%c0_71, %c0_72] : memref<16x128xf32, #tpu.memory_space<vmem>>, vector<16x128xf32>
      tpu.vector_store %arg5[%c0_71, %c0_72], %262 {strides = array<i32>} : memref<16x128xf32, #tpu.memory_space<vmem>>, vector<16x128xf32>,
    } else {
    }
    return
  }
  func.func @transform_0(%arg0: i32) -> (i32, i32) {
    %c0_i32 = arith.constant 0 : i32
    %c0_i32_0 = arith.constant 0 : i32
    return %arg0, %c0_i32 : i32, i32
  }
  func.func @transform_1(%arg0: i32) -> (i32, i32) {
    %c0_i32 = arith.constant 0 : i32
    %c0_i32_0 = arith.constant 0 : i32
    %c0_i32_1 = arith.constant 0 : i32
    return %c0_i32, %c0_i32_0 : i32, i32
  }
  func.func @transform_2(%arg0: i32) -> (i32, i32) {
    %c0_i32 = arith.constant 0 : i32
    %c0_i32_0 = arith.constant 0 : i32
    %c0_i32_1 = arith.constant 0 : i32
    return %c0_i32, %c0_i32_0 : i32, i32
  }
  func.func @transform_3(%arg0: i32) -> (i32, i32) {
    %c0_i32 = arith.constant 0 : i32
    %c0_i32_0 = arith.constant 0 : i32
    %c0_i32_1 = arith.constant 0 : i32
    return %c0_i32, %c0_i32_0 : i32, i32
  }
  func.func @transform_4(%arg0: i32) -> (i32, i32) {
    %c0_i32 = arith.constant 0 : i32
    %c0_i32_0 = arith.constant 0 : i32
    %c0_i32_1 = arith.constant 0 : i32
    return %c0_i32, %c0_i32_0 : i32, i32
  }
}

module attributes {stable_mosaic.version = 11 : i64} {
  func.func @kernel(%arg0: i32, %arg1: memref<128x512xbf16, #tpu.memory_space<vmem>>, %arg2: memref<128x512xbf16, #tpu.memory_space<vmem>>, %arg3: memref<128x128xf32, #tpu.memory_space<vmem>>, %arg4: memref<1x128xf32, #tpu.memory_space<vmem>>, %arg5: memref<16x128xf32, #tpu.memory_space<vmem>>, %arg6: memref<16x128xf32, #tpu.memory_space<vmem>>, %arg7: memref<16x128xf32, #tpu.memory_space<vmem>>) attributes {dimension_semantics = [#tpu.dimension_semantics<arbitrary>], iteration_bounds = array<i64: 1>, scalar_prefetch = 0 : i64, scratch_operands = 2 : i64, tpu.core_type = #tpu.core_type<tc>, window_params = [{transform_indices = @transform_0, window_bounds = array<i64: 128, 512>}, {pipeline_mode = #tpu.pipeline_mode<synchronous>, transform_indices = @transform_1, window_bounds = array<i64: 128, 512>}, {pipeline_mode = #tpu.pipeline_mode<synchronous>, transform_indices = @transform_2, window_bounds = array<i64: 128, 128>}, {pipeline_mode = #tpu.pipeline_mode<synchronous>, transform_indices = @transform_3, window_bounds = array<i64: 1, 128>}, {pipeline_mode = #tpu.pipeline_mode<synchronous>, transform_indices = @transform_4, window_bounds = array<i64: 16, 128>}]} {
    %c0_i32 = arith.constant 0 : i32
    %0 = arith.cmpi eq, %arg0, %c0_i32 : i32
    %1 = arith.extui %0 : i1 to i32
    %c0_i32_0 = arith.constant 0 : i32
    %2 = arith.cmpi ne, %1, %c0_i32_0 : i32
    scf.if %2 {
      %cst_66 = arith.constant 0.000000e+00 : f32
      %258 = vector.broadcast %cst_66 : f32 to vector<16x128xf32>
      %c0_67 = arith.constant 0 : index
      %c0_68 = arith.constant 0 : index
      %259 = vector.load %arg6[%c0_67, %c0_68] : memref<16x128xf32, #tpu.memory_space<vmem>>, vector<16x128xf32>
      tpu.vector_store %arg6[%c0_67, %c0_68], %258 {strides = array<i32>} : memref<16x128xf32, #tpu.memory_space<vmem>>, vector<16x128xf32>,
      %cst_69 = arith.constant 0.000000e+00 : f32
      %260 = vector.broadcast %cst_69 : f32 to vector<16x128xf32>
      %c0_70 = arith.constant 0 : index
      %c0_71 = arith.constant 0 : index
      %261 = vector.load %arg7[%c0_70, %c0_71] : memref<16x128xf32, #tpu.memory_space<vmem>>, vector<16x128xf32>
      tpu.vector_store %arg7[%c0_70, %c0_71], %260 {strides = array<i32>} : memref<16x128xf32, #tpu.memory_space<vmem>>, vector<16x128xf32>,
      %cst_72 = arith.constant 0.000000e+00 : f32
      %262 = vector.broadcast %cst_72 : f32 to vector<16x128xf32>
      %c0_73 = arith.constant 0 : index
      %c0_74 = arith.constant 0 : index
      %263 = vector.load %arg5[%c0_73, %c0_74] : memref<16x128xf32, #tpu.memory_space<vmem>>, vector<16x128xf32>
      tpu.vector_store %arg5[%c0_73, %c0_74], %262 {strides = array<i32>} : memref<16x128xf32, #tpu.memory_space<vmem>>, vector<16x128xf32>,
    } else {
    }
    %c0 = arith.constant 0 : index
    %c0_1 = arith.constant 0 : index
    %3 = vector.load %arg6[%c0, %c0_1] : memref<16x128xf32, #tpu.memory_space<vmem>>, vector<16x128xf32>
    %c0_2 = arith.constant 0 : index
    %c0_3 = arith.constant 0 : index
    %4 = vector.load %arg7[%c0_2, %c0_3] : memref<16x128xf32, #tpu.memory_space<vmem>>, vector<16x128xf32>
    %c0_4 = arith.constant 0 : index
    %c0_5 = arith.constant 0 : index
    %5 = vector.load %arg1[%c0_4, %c0_5] : memref<128x512xbf16, #tpu.memory_space<vmem>>, vector<16x512xbf16>
    %6 = arith.extf %5 : vector<16x512xbf16> to vector<16x512xf32>
    %7 = arith.truncf %3 : vector<16x128xf32> to vector<16x128xbf16>
    %c0_6 = arith.constant 0 : index
    %c0_7 = arith.constant 0 : index
    %8 = vector.load %arg2[%c0_6, %c0_7] : memref<128x512xbf16, #tpu.memory_space<vmem>>, vector<128x512xbf16>
    %cst = arith.constant dense<0.000000e+00> : vector<16x512xf32>
    %9 = tpu.matmul %7, %8, %cst {dimension_numbers = #tpu.dot_dimension_numbers<[1], [0], [0], [1], [0, 0, 1, 1], [], []>} : vector<16x128xbf16>, vector<128x512xbf16>, vector<16x512xf32> -> vector<16x512xf32>
    %10 = arith.addf %6, %9 : vector<16x512xf32>
    %11 = vector.extract_strided_slice %10 {offsets = [0, 0], sizes = [16, 128], strides = [1, 1]} : vector<16x512xf32> to vector<16x128xf32>
    %12 = arith.negf %11 : vector<16x128xf32>
    %13 = math.exp %12 : vector<16x128xf32>
    %cst_8 = arith.constant 1.000000e+00 : f32
    %14 = vector.broadcast %cst_8 : f32 to vector<16x128xf32>
    %15 = arith.addf %14, %13 : vector<16x128xf32>
    %16 = arith.divf %14, %15 : vector<16x128xf32>
    %17 = vector.extract_strided_slice %10 {offsets = [0, 128], sizes = [16, 128], strides = [1, 1]} : vector<16x512xf32> to vector<16x128xf32>
    %18 = arith.negf %17 : vector<16x128xf32>
    %19 = math.exp %18 : vector<16x128xf32>
    %cst_9 = arith.constant 1.000000e+00 : f32
    %20 = vector.broadcast %cst_9 : f32 to vector<16x128xf32>
    %21 = arith.addf %20, %19 : vector<16x128xf32>
    %22 = arith.divf %20, %21 : vector<16x128xf32>
    %23 = vector.extract_strided_slice %10 {offsets = [0, 256], sizes = [16, 128], strides = [1, 1]} : vector<16x512xf32> to vector<16x128xf32>
    %24 = math.tanh %23 : vector<16x128xf32>
    %25 = vector.extract_strided_slice %10 {offsets = [0, 384], sizes = [16, 128], strides = [1, 1]} : vector<16x512xf32> to vector<16x128xf32>
    %26 = arith.negf %25 : vector<16x128xf32>
    %27 = math.exp %26 : vector<16x128xf32>
    %cst_10 = arith.constant 1.000000e+00 : f32
    %28 = vector.broadcast %cst_10 : f32 to vector<16x128xf32>
    %29 = arith.addf %28, %27 : vector<16x128xf32>
    %30 = arith.divf %28, %29 : vector<16x128xf32>
    %31 = arith.mulf %22, %4 : vector<16x128xf32>
    %32 = arith.mulf %16, %24 : vector<16x128xf32>
    %33 = arith.addf %31, %32 : vector<16x128xf32>
    %34 = math.tanh %33 : vector<16x128xf32>
    %35 = arith.mulf %30, %34 : vector<16x128xf32>
    %c16 = arith.constant 16 : index
    %c0_11 = arith.constant 0 : index
    %36 = vector.load %arg1[%c16, %c0_11] : memref<128x512xbf16, #tpu.memory_space<vmem>>, vector<16x512xbf16>
    %37 = arith.extf %36 : vector<16x512xbf16> to vector<16x512xf32>
    %38 = arith.truncf %35 : vector<16x128xf32> to vector<16x128xbf16>
    %c0_12 = arith.constant 0 : index
    %c0_13 = arith.constant 0 : index
    %39 = vector.load %arg2[%c0_12, %c0_13] : memref<128x512xbf16, #tpu.memory_space<vmem>>, vector<128x512xbf16>
    %cst_14 = arith.constant dense<0.000000e+00> : vector<16x512xf32>
    %40 = tpu.matmul %38, %39, %cst_14 {dimension_numbers = #tpu.dot_dimension_numbers<[1], [0], [0], [1], [0, 0, 1, 1], [], []>} : vector<16x128xbf16>, vector<128x512xbf16>, vector<16x512xf32> -> vector<16x512xf32>
    %41 = arith.addf %37, %40 : vector<16x512xf32>
    %42 = vector.extract_strided_slice %41 {offsets = [0, 0], sizes = [16, 128], strides = [1, 1]} : vector<16x512xf32> to vector<16x128xf32>
    %43 = arith.negf %42 : vector<16x128xf32>
    %44 = math.exp %43 : vector<16x128xf32>
    %cst_15 = arith.constant 1.000000e+00 : f32
    %45 = vector.broadcast %cst_15 : f32 to vector<16x128xf32>
    %46 = arith.addf %45, %44 : vector<16x128xf32>
    %47 = arith.divf %45, %46 : vector<16x128xf32>
    %48 = vector.extract_strided_slice %41 {offsets = [0, 128], sizes = [16, 128], strides = [1, 1]} : vector<16x512xf32> to vector<16x128xf32>
    %49 = arith.negf %48 : vector<16x128xf32>
    %50 = math.exp %49 : vector<16x128xf32>
    %cst_16 = arith.constant 1.000000e+00 : f32
    %51 = vector.broadcast %cst_16 : f32 to vector<16x128xf32>
    %52 = arith.addf %51, %50 : vector<16x128xf32>
    %53 = arith.divf %51, %52 : vector<16x128xf32>
    %54 = vector.extract_strided_slice %41 {offsets = [0, 256], sizes = [16, 128], strides = [1, 1]} : vector<16x512xf32> to vector<16x128xf32>
    %55 = math.tanh %54 : vector<16x128xf32>
    %56 = vector.extract_strided_slice %41 {offsets = [0, 384], sizes = [16, 128], strides = [1, 1]} : vector<16x512xf32> to vector<16x128xf32>
    %57 = arith.negf %56 : vector<16x128xf32>
    %58 = math.exp %57 : vector<16x128xf32>
    %cst_17 = arith.constant 1.000000e+00 : f32
    %59 = vector.broadcast %cst_17 : f32 to vector<16x128xf32>
    %60 = arith.addf %59, %58 : vector<16x128xf32>
    %61 = arith.divf %59, %60 : vector<16x128xf32>
    %62 = arith.mulf %53, %33 : vector<16x128xf32>
    %63 = arith.mulf %47, %55 : vector<16x128xf32>
    %64 = arith.addf %62, %63 : vector<16x128xf32>
    %65 = math.tanh %64 : vector<16x128xf32>
    %66 = arith.mulf %61, %65 : vector<16x128xf32>
    %c32 = arith.constant 32 : index
    %c0_18 = arith.constant 0 : index
    %67 = vector.load %arg1[%c32, %c0_18] : memref<128x512xbf16, #tpu.memory_space<vmem>>, vector<16x512xbf16>
    %68 = arith.extf %67 : vector<16x512xbf16> to vector<16x512xf32>
    %69 = arith.truncf %66 : vector<16x128xf32> to vector<16x128xbf16>
    %c0_19 = arith.constant 0 : index
    %c0_20 = arith.constant 0 : index
    %70 = vector.load %arg2[%c0_19, %c0_20] : memref<128x512xbf16, #tpu.memory_space<vmem>>, vector<128x512xbf16>
    %cst_21 = arith.constant dense<0.000000e+00> : vector<16x512xf32>
    %71 = tpu.matmul %69, %70, %cst_21 {dimension_numbers = #tpu.dot_dimension_numbers<[1], [0], [0], [1], [0, 0, 1, 1], [], []>} : vector<16x128xbf16>, vector<128x512xbf16>, vector<16x512xf32> -> vector<16x512xf32>
    %72 = arith.addf %68, %71 : vector<16x512xf32>
    %73 = vector.extract_strided_slice %72 {offsets = [0, 0], sizes = [16, 128], strides = [1, 1]} : vector<16x512xf32> to vector<16x128xf32>
    %74 = arith.negf %73 : vector<16x128xf32>
    %75 = math.exp %74 : vector<16x128xf32>
    %cst_22 = arith.constant 1.000000e+00 : f32
    %76 = vector.broadcast %cst_22 : f32 to vector<16x128xf32>
    %77 = arith.addf %76, %75 : vector<16x128xf32>
    %78 = arith.divf %76, %77 : vector<16x128xf32>
    %79 = vector.extract_strided_slice %72 {offsets = [0, 128], sizes = [16, 128], strides = [1, 1]} : vector<16x512xf32> to vector<16x128xf32>
    %80 = arith.negf %79 : vector<16x128xf32>
    %81 = math.exp %80 : vector<16x128xf32>
    %cst_23 = arith.constant 1.000000e+00 : f32
    %82 = vector.broadcast %cst_23 : f32 to vector<16x128xf32>
    %83 = arith.addf %82, %81 : vector<16x128xf32>
    %84 = arith.divf %82, %83 : vector<16x128xf32>
    %85 = vector.extract_strided_slice %72 {offsets = [0, 256], sizes = [16, 128], strides = [1, 1]} : vector<16x512xf32> to vector<16x128xf32>
    %86 = math.tanh %85 : vector<16x128xf32>
    %87 = vector.extract_strided_slice %72 {offsets = [0, 384], sizes = [16, 128], strides = [1, 1]} : vector<16x512xf32> to vector<16x128xf32>
    %88 = arith.negf %87 : vector<16x128xf32>
    %89 = math.exp %88 : vector<16x128xf32>
    %cst_24 = arith.constant 1.000000e+00 : f32
    %90 = vector.broadcast %cst_24 : f32 to vector<16x128xf32>
    %91 = arith.addf %90, %89 : vector<16x128xf32>
    %92 = arith.divf %90, %91 : vector<16x128xf32>
    %93 = arith.mulf %84, %64 : vector<16x128xf32>
    %94 = arith.mulf %78, %86 : vector<16x128xf32>
    %95 = arith.addf %93, %94 : vector<16x128xf32>
    %96 = math.tanh %95 : vector<16x128xf32>
    %97 = arith.mulf %92, %96 : vector<16x128xf32>
    %c48 = arith.constant 48 : index
    %c0_25 = arith.constant 0 : index
    %98 = vector.load %arg1[%c48, %c0_25] : memref<128x512xbf16, #tpu.memory_space<vmem>>, vector<16x512xbf16>
    %99 = arith.extf %98 : vector<16x512xbf16> to vector<16x512xf32>
    %100 = arith.truncf %97 : vector<16x128xf32> to vector<16x128xbf16>
    %c0_26 = arith.constant 0 : index
    %c0_27 = arith.constant 0 : index
    %101 = vector.load %arg2[%c0_26, %c0_27] : memref<128x512xbf16, #tpu.memory_space<vmem>>, vector<128x512xbf16>
    %cst_28 = arith.constant dense<0.000000e+00> : vector<16x512xf32>
    %102 = tpu.matmul %100, %101, %cst_28 {dimension_numbers = #tpu.dot_dimension_numbers<[1], [0], [0], [1], [0, 0, 1, 1], [], []>} : vector<16x128xbf16>, vector<128x512xbf16>, vector<16x512xf32> -> vector<16x512xf32>
    %103 = arith.addf %99, %102 : vector<16x512xf32>
    %104 = vector.extract_strided_slice %103 {offsets = [0, 0], sizes = [16, 128], strides = [1, 1]} : vector<16x512xf32> to vector<16x128xf32>
    %105 = arith.negf %104 : vector<16x128xf32>
    %106 = math.exp %105 : vector<16x128xf32>
    %cst_29 = arith.constant 1.000000e+00 : f32
    %107 = vector.broadcast %cst_29 : f32 to vector<16x128xf32>
    %108 = arith.addf %107, %106 : vector<16x128xf32>
    %109 = arith.divf %107, %108 : vector<16x128xf32>
    %110 = vector.extract_strided_slice %103 {offsets = [0, 128], sizes = [16, 128], strides = [1, 1]} : vector<16x512xf32> to vector<16x128xf32>
    %111 = arith.negf %110 : vector<16x128xf32>
    %112 = math.exp %111 : vector<16x128xf32>
    %cst_30 = arith.constant 1.000000e+00 : f32
    %113 = vector.broadcast %cst_30 : f32 to vector<16x128xf32>
    %114 = arith.addf %113, %112 : vector<16x128xf32>
    %115 = arith.divf %113, %114 : vector<16x128xf32>
    %116 = vector.extract_strided_slice %103 {offsets = [0, 256], sizes = [16, 128], strides = [1, 1]} : vector<16x512xf32> to vector<16x128xf32>
    %117 = math.tanh %116 : vector<16x128xf32>
    %118 = vector.extract_strided_slice %103 {offsets = [0, 384], sizes = [16, 128], strides = [1, 1]} : vector<16x512xf32> to vector<16x128xf32>
    %119 = arith.negf %118 : vector<16x128xf32>
    %120 = math.exp %119 : vector<16x128xf32>
    %cst_31 = arith.constant 1.000000e+00 : f32
    %121 = vector.broadcast %cst_31 : f32 to vector<16x128xf32>
    %122 = arith.addf %121, %120 : vector<16x128xf32>
    %123 = arith.divf %121, %122 : vector<16x128xf32>
    %124 = arith.mulf %115, %95 : vector<16x128xf32>
    %125 = arith.mulf %109, %117 : vector<16x128xf32>
    %126 = arith.addf %124, %125 : vector<16x128xf32>
    %127 = math.tanh %126 : vector<16x128xf32>
    %128 = arith.mulf %123, %127 : vector<16x128xf32>
    %c64 = arith.constant 64 : index
    %c0_32 = arith.constant 0 : index
    %129 = vector.load %arg1[%c64, %c0_32] : memref<128x512xbf16, #tpu.memory_space<vmem>>, vector<16x512xbf16>
    %130 = arith.extf %129 : vector<16x512xbf16> to vector<16x512xf32>
    %131 = arith.truncf %128 : vector<16x128xf32> to vector<16x128xbf16>
    %c0_33 = arith.constant 0 : index
    %c0_34 = arith.constant 0 : index
    %132 = vector.load %arg2[%c0_33, %c0_34] : memref<128x512xbf16, #tpu.memory_space<vmem>>, vector<128x512xbf16>
    %cst_35 = arith.constant dense<0.000000e+00> : vector<16x512xf32>
    %133 = tpu.matmul %131, %132, %cst_35 {dimension_numbers = #tpu.dot_dimension_numbers<[1], [0], [0], [1], [0, 0, 1, 1], [], []>} : vector<16x128xbf16>, vector<128x512xbf16>, vector<16x512xf32> -> vector<16x512xf32>
    %134 = arith.addf %130, %133 : vector<16x512xf32>
    %135 = vector.extract_strided_slice %134 {offsets = [0, 0], sizes = [16, 128], strides = [1, 1]} : vector<16x512xf32> to vector<16x128xf32>
    %136 = arith.negf %135 : vector<16x128xf32>
    %137 = math.exp %136 : vector<16x128xf32>
    %cst_36 = arith.constant 1.000000e+00 : f32
    %138 = vector.broadcast %cst_36 : f32 to vector<16x128xf32>
    %139 = arith.addf %138, %137 : vector<16x128xf32>
    %140 = arith.divf %138, %139 : vector<16x128xf32>
    %141 = vector.extract_strided_slice %134 {offsets = [0, 128], sizes = [16, 128], strides = [1, 1]} : vector<16x512xf32> to vector<16x128xf32>
    %142 = arith.negf %141 : vector<16x128xf32>
    %143 = math.exp %142 : vector<16x128xf32>
    %cst_37 = arith.constant 1.000000e+00 : f32
    %144 = vector.broadcast %cst_37 : f32 to vector<16x128xf32>
    %145 = arith.addf %144, %143 : vector<16x128xf32>
    %146 = arith.divf %144, %145 : vector<16x128xf32>
    %147 = vector.extract_strided_slice %134 {offsets = [0, 256], sizes = [16, 128], strides = [1, 1]} : vector<16x512xf32> to vector<16x128xf32>
    %148 = math.tanh %147 : vector<16x128xf32>
    %149 = vector.extract_strided_slice %134 {offsets = [0, 384], sizes = [16, 128], strides = [1, 1]} : vector<16x512xf32> to vector<16x128xf32>
    %150 = arith.negf %149 : vector<16x128xf32>
    %151 = math.exp %150 : vector<16x128xf32>
    %cst_38 = arith.constant 1.000000e+00 : f32
    %152 = vector.broadcast %cst_38 : f32 to vector<16x128xf32>
    %153 = arith.addf %152, %151 : vector<16x128xf32>
    %154 = arith.divf %152, %153 : vector<16x128xf32>
    %155 = arith.mulf %146, %126 : vector<16x128xf32>
    %156 = arith.mulf %140, %148 : vector<16x128xf32>
    %157 = arith.addf %155, %156 : vector<16x128xf32>
    %158 = math.tanh %157 : vector<16x128xf32>
    %159 = arith.mulf %154, %158 : vector<16x128xf32>
    %c80 = arith.constant 80 : index
    %c0_39 = arith.constant 0 : index
    %160 = vector.load %arg1[%c80, %c0_39] : memref<128x512xbf16, #tpu.memory_space<vmem>>, vector<16x512xbf16>
    %161 = arith.extf %160 : vector<16x512xbf16> to vector<16x512xf32>
    %162 = arith.truncf %159 : vector<16x128xf32> to vector<16x128xbf16>
    %c0_40 = arith.constant 0 : index
    %c0_41 = arith.constant 0 : index
    %163 = vector.load %arg2[%c0_40, %c0_41] : memref<128x512xbf16, #tpu.memory_space<vmem>>, vector<128x512xbf16>
    %cst_42 = arith.constant dense<0.000000e+00> : vector<16x512xf32>
    %164 = tpu.matmul %162, %163, %cst_42 {dimension_numbers = #tpu.dot_dimension_numbers<[1], [0], [0], [1], [0, 0, 1, 1], [], []>} : vector<16x128xbf16>, vector<128x512xbf16>, vector<16x512xf32> -> vector<16x512xf32>
    %165 = arith.addf %161, %164 : vector<16x512xf32>
    %166 = vector.extract_strided_slice %165 {offsets = [0, 0], sizes = [16, 128], strides = [1, 1]} : vector<16x512xf32> to vector<16x128xf32>
    %167 = arith.negf %166 : vector<16x128xf32>
    %168 = math.exp %167 : vector<16x128xf32>
    %cst_43 = arith.constant 1.000000e+00 : f32
    %169 = vector.broadcast %cst_43 : f32 to vector<16x128xf32>
    %170 = arith.addf %169, %168 : vector<16x128xf32>
    %171 = arith.divf %169, %170 : vector<16x128xf32>
    %172 = vector.extract_strided_slice %165 {offsets = [0, 128], sizes = [16, 128], strides = [1, 1]} : vector<16x512xf32> to vector<16x128xf32>
    %173 = arith.negf %172 : vector<16x128xf32>
    %174 = math.exp %173 : vector<16x128xf32>
    %cst_44 = arith.constant 1.000000e+00 : f32
    %175 = vector.broadcast %cst_44 : f32 to vector<16x128xf32>
    %176 = arith.addf %175, %174 : vector<16x128xf32>
    %177 = arith.divf %175, %176 : vector<16x128xf32>
    %178 = vector.extract_strided_slice %165 {offsets = [0, 256], sizes = [16, 128], strides = [1, 1]} : vector<16x512xf32> to vector<16x128xf32>
    %179 = math.tanh %178 : vector<16x128xf32>
    %180 = vector.extract_strided_slice %165 {offsets = [0, 384], sizes = [16, 128], strides = [1, 1]} : vector<16x512xf32> to vector<16x128xf32>
    %181 = arith.negf %180 : vector<16x128xf32>
    %182 = math.exp %181 : vector<16x128xf32>
    %cst_45 = arith.constant 1.000000e+00 : f32
    %183 = vector.broadcast %cst_45 : f32 to vector<16x128xf32>
    %184 = arith.addf %183, %182 : vector<16x128xf32>
    %185 = arith.divf %183, %184 : vector<16x128xf32>
    %186 = arith.mulf %177, %157 : vector<16x128xf32>
    %187 = arith.mulf %171, %179 : vector<16x128xf32>
    %188 = arith.addf %186, %187 : vector<16x128xf32>
    %189 = math.tanh %188 : vector<16x128xf32>
    %190 = arith.mulf %185, %189 : vector<16x128xf32>
    %c96 = arith.constant 96 : index
    %c0_46 = arith.constant 0 : index
    %191 = vector.load %arg1[%c96, %c0_46] : memref<128x512xbf16, #tpu.memory_space<vmem>>, vector<16x512xbf16>
    %192 = arith.extf %191 : vector<16x512xbf16> to vector<16x512xf32>
    %193 = arith.truncf %190 : vector<16x128xf32> to vector<16x128xbf16>
    %c0_47 = arith.constant 0 : index
    %c0_48 = arith.constant 0 : index
    %194 = vector.load %arg2[%c0_47, %c0_48] : memref<128x512xbf16, #tpu.memory_space<vmem>>, vector<128x512xbf16>
    %cst_49 = arith.constant dense<0.000000e+00> : vector<16x512xf32>
    %195 = tpu.matmul %193, %194, %cst_49 {dimension_numbers = #tpu.dot_dimension_numbers<[1], [0], [0], [1], [0, 0, 1, 1], [], []>} : vector<16x128xbf16>, vector<128x512xbf16>, vector<16x512xf32> -> vector<16x512xf32>
    %196 = arith.addf %192, %195 : vector<16x512xf32>
    %197 = vector.extract_strided_slice %196 {offsets = [0, 0], sizes = [16, 128], strides = [1, 1]} : vector<16x512xf32> to vector<16x128xf32>
    %198 = arith.negf %197 : vector<16x128xf32>
    %199 = math.exp %198 : vector<16x128xf32>
    %cst_50 = arith.constant 1.000000e+00 : f32
    %200 = vector.broadcast %cst_50 : f32 to vector<16x128xf32>
    %201 = arith.addf %200, %199 : vector<16x128xf32>
    %202 = arith.divf %200, %201 : vector<16x128xf32>
    %203 = vector.extract_strided_slice %196 {offsets = [0, 128], sizes = [16, 128], strides = [1, 1]} : vector<16x512xf32> to vector<16x128xf32>
    %204 = arith.negf %203 : vector<16x128xf32>
    %205 = math.exp %204 : vector<16x128xf32>
    %cst_51 = arith.constant 1.000000e+00 : f32
    %206 = vector.broadcast %cst_51 : f32 to vector<16x128xf32>
    %207 = arith.addf %206, %205 : vector<16x128xf32>
    %208 = arith.divf %206, %207 : vector<16x128xf32>
    %209 = vector.extract_strided_slice %196 {offsets = [0, 256], sizes = [16, 128], strides = [1, 1]} : vector<16x512xf32> to vector<16x128xf32>
    %210 = math.tanh %209 : vector<16x128xf32>
    %211 = vector.extract_strided_slice %196 {offsets = [0, 384], sizes = [16, 128], strides = [1, 1]} : vector<16x512xf32> to vector<16x128xf32>
    %212 = arith.negf %211 : vector<16x128xf32>
    %213 = math.exp %212 : vector<16x128xf32>
    %cst_52 = arith.constant 1.000000e+00 : f32
    %214 = vector.broadcast %cst_52 : f32 to vector<16x128xf32>
    %215 = arith.addf %214, %213 : vector<16x128xf32>
    %216 = arith.divf %214, %215 : vector<16x128xf32>
    %217 = arith.mulf %208, %188 : vector<16x128xf32>
    %218 = arith.mulf %202, %210 : vector<16x128xf32>
    %219 = arith.addf %217, %218 : vector<16x128xf32>
    %220 = math.tanh %219 : vector<16x128xf32>
    %221 = arith.mulf %216, %220 : vector<16x128xf32>
    %c112 = arith.constant 112 : index
    %c0_53 = arith.constant 0 : index
    %222 = vector.load %arg1[%c112, %c0_53] : memref<128x512xbf16, #tpu.memory_space<vmem>>, vector<16x512xbf16>
    %223 = arith.extf %222 : vector<16x512xbf16> to vector<16x512xf32>
    %224 = arith.truncf %221 : vector<16x128xf32> to vector<16x128xbf16>
    %c0_54 = arith.constant 0 : index
    %c0_55 = arith.constant 0 : index
    %225 = vector.load %arg2[%c0_54, %c0_55] : memref<128x512xbf16, #tpu.memory_space<vmem>>, vector<128x512xbf16>
    %cst_56 = arith.constant dense<0.000000e+00> : vector<16x512xf32>
    %226 = tpu.matmul %224, %225, %cst_56 {dimension_numbers = #tpu.dot_dimension_numbers<[1], [0], [0], [1], [0, 0, 1, 1], [], []>} : vector<16x128xbf16>, vector<128x512xbf16>, vector<16x512xf32> -> vector<16x512xf32>
    %227 = arith.addf %223, %226 : vector<16x512xf32>
    %228 = vector.extract_strided_slice %227 {offsets = [0, 0], sizes = [16, 128], strides = [1, 1]} : vector<16x512xf32> to vector<16x128xf32>
    %229 = arith.negf %228 : vector<16x128xf32>
    %230 = math.exp %229 : vector<16x128xf32>
    %cst_57 = arith.constant 1.000000e+00 : f32
    %231 = vector.broadcast %cst_57 : f32 to vector<16x128xf32>
    %232 = arith.addf %231, %230 : vector<16x128xf32>
    %233 = arith.divf %231, %232 : vector<16x128xf32>
    %234 = vector.extract_strided_slice %227 {offsets = [0, 128], sizes = [16, 128], strides = [1, 1]} : vector<16x512xf32> to vector<16x128xf32>
    %235 = arith.negf %234 : vector<16x128xf32>
    %236 = math.exp %235 : vector<16x128xf32>
    %cst_58 = arith.constant 1.000000e+00 : f32
    %237 = vector.broadcast %cst_58 : f32 to vector<16x128xf32>
    %238 = arith.addf %237, %236 : vector<16x128xf32>
    %239 = arith.divf %237, %238 : vector<16x128xf32>
    %240 = vector.extract_strided_slice %227 {offsets = [0, 256], sizes = [16, 128], strides = [1, 1]} : vector<16x512xf32> to vector<16x128xf32>
    %241 = math.tanh %240 : vector<16x128xf32>
    %242 = vector.extract_strided_slice %227 {offsets = [0, 384], sizes = [16, 128], strides = [1, 1]} : vector<16x512xf32> to vector<16x128xf32>
    %243 = arith.negf %242 : vector<16x128xf32>
    %244 = math.exp %243 : vector<16x128xf32>
    %cst_59 = arith.constant 1.000000e+00 : f32
    %245 = vector.broadcast %cst_59 : f32 to vector<16x128xf32>
    %246 = arith.addf %245, %244 : vector<16x128xf32>
    %247 = arith.divf %245, %246 : vector<16x128xf32>
    %248 = arith.mulf %239, %219 : vector<16x128xf32>
    %249 = arith.mulf %233, %241 : vector<16x128xf32>
    %250 = arith.addf %248, %249 : vector<16x128xf32>
    %251 = math.tanh %250 : vector<16x128xf32>
    %252 = arith.mulf %247, %251 : vector<16x128xf32>
    %c0_60 = arith.constant 0 : index
    %c0_61 = arith.constant 0 : index
    %253 = vector.load %arg6[%c0_60, %c0_61] : memref<16x128xf32, #tpu.memory_space<vmem>>, vector<16x128xf32>
    tpu.vector_store %arg6[%c0_60, %c0_61], %252 {strides = array<i32>} : memref<16x128xf32, #tpu.memory_space<vmem>>, vector<16x128xf32>,
    %c0_62 = arith.constant 0 : index
    %c0_63 = arith.constant 0 : index
    %254 = vector.load %arg7[%c0_62, %c0_63] : memref<16x128xf32, #tpu.memory_space<vmem>>, vector<16x128xf32>
    tpu.vector_store %arg7[%c0_62, %c0_63], %250 {strides = array<i32>} : memref<16x128xf32, #tpu.memory_space<vmem>>, vector<16x128xf32>,
    %c0_i32_64 = arith.constant 0 : i32
    %255 = arith.cmpi eq, %arg0, %c0_i32_64 : i32
    %256 = arith.extui %255 : i1 to i32
    %c0_i32_65 = arith.constant 0 : i32
    %257 = arith.cmpi ne, %256, %c0_i32_65 : i32
    scf.if %257 {
      %c0_66 = arith.constant 0 : index
      %c0_67 = arith.constant 0 : index
      %258 = vector.load %arg3[%c0_66, %c0_67] : memref<128x128xf32, #tpu.memory_space<vmem>>, vector<128x128xf32>
      %cst_68 = arith.constant dense<0.000000e+00> : vector<16x128xf32>
      %259 = tpu.matmul %252, %258, %cst_68 {dimension_numbers = #tpu.dot_dimension_numbers<[1], [0], [0], [1], [0, 0, 1, 1], [], []>} : vector<16x128xf32>, vector<128x128xf32>, vector<16x128xf32> -> vector<16x128xf32>
      %c0_69 = arith.constant 0 : index
      %c0_70 = arith.constant 0 : index
      %260 = vector.load %arg4[%c0_69, %c0_70] : memref<1x128xf32, #tpu.memory_space<vmem>>, vector<1x128xf32>
      %261 = vector.broadcast %260 : vector<1x128xf32> to vector<16x128xf32>
      %262 = arith.addf %259, %261 : vector<16x128xf32>
      %c0_71 = arith.constant 0 : index
      %c0_72 = arith.constant 0 : index
      %263 = vector.load %arg5[%c0_71, %c0_72] : memref<16x128xf32, #tpu.memory_space<vmem>>, vector<16x128xf32>
      tpu.vector_store %arg5[%c0_71, %c0_72], %262 {strides = array<i32>} : memref<16x128xf32, #tpu.memory_space<vmem>>, vector<16x128xf32>,
    } else {
    }
    return
  }
  func.func @transform_0(%arg0: i32) -> (i32, i32) {
    %c0_i32 = arith.constant 0 : i32
    %c0_i32_0 = arith.constant 0 : i32
    return %arg0, %c0_i32 : i32, i32
  }
  func.func @transform_1(%arg0: i32) -> (i32, i32) {
    %c0_i32 = arith.constant 0 : i32
    %c0_i32_0 = arith.constant 0 : i32
    %c0_i32_1 = arith.constant 0 : i32
    return %c0_i32, %c0_i32_0 : i32, i32
  }
  func.func @transform_2(%arg0: i32) -> (i32, i32) {
    %c0_i32 = arith.constant 0 : i32
    %c0_i32_0 = arith.constant 0 : i32
    %c0_i32_1 = arith.constant 0 : i32
    return %c0_i32, %c0_i32_0 : i32, i32
  }
  func.func @transform_3(%arg0: i32) -> (i32, i32) {
    %c0_i32 = arith.constant 0 : i32
    %c0_i32_0 = arith.constant 0 : i32
    %c0_i32_1 = arith.constant 0 : i32
    return %c0_i32, %c0_i32_0 : i32, i32
  }
  func.func @transform_4(%arg0: i32) -> (i32, i32) {
    %c0_i32 = arith.constant 0 : i32
    %c0_i32_0 = arith.constant 0 : i32
    %c0_i32_1 = arith.constant 0 : i32
    return %c0_i32, %c0_i32_0 : i32, i32
  }
}

</mosaic_0001>

<bundles_post_ra>
// kernel: tpu_custom_call.1
= control target key start
LH: loop header
LB: loop body
LE: loop exit
PB: predicated region body
PF: predicated region fallthrough
CT: control target
= control target key end

     0   :  { %9 = vsyncpa [#allocation5], 0  ;;  %s2710_s0 = inlined_call_operand.hbm [shape: bf16[128,512], index: 0, kind: input, shape index: {}]   ;;  %s2711_s1 = inlined_call_operand.hbm [shape: bf16[128,512], index: 1, kind: input, shape index: {}]   ;;  %s2712_s2 = inlined_call_operand.hbm [shape: f32[128,128], index: 2, kind: input, shape index: {}]   ;;  %s2713_s3 = inlined_call_operand.vmem [shape: f32[1,128], index: 3, kind: input, shape index: {}]   ;;  %s2714_s4 = inlined_call_operand.hbm [shape: f32[16,128], index: 4, kind: output, shape index: {}]  }
   0x1   :  { %10 = vsyncpa [#allocation8], 0 }
   0x2   :  { %11 = vsyncpa [#allocation6], 0  ;;  %s2198_s15 = smov [#allocation7]   ;;  %s2199_s17 = smov [#allocation4]  }
   0x3   :  { %s29_s16 = sshll.u32 %s2198_s15, 4  ;;  %s17_s18 = sshll.u32 %s2199_s17, 4  ;;  %s30_s16 = int_to_ptr.vmem [resolvable:$true] %s29_s16  ;;  %s18_s18 = int_to_ptr.vmem [resolvable:$true] %s17_s18 }
   0x4   :  { %s2120_s19 = scalar_lea.vmem %s30_s16, 4096  ;;  %p2125_p1 = scmp.lt.s32.totalorder %s30_s16, %s30_s16 }
   0x5   :  { %p2121_p0 = scmp.ne.s32.totalorder %s30_s16, %s2120_s19  ;;  %p2126_p2 = scmp.lt.s32.totalorder %s2120_s19, %s2120_s19 }
   0x7   :  { %p2127_p3 = por %p2126_p2, %p2125_p1 }
   0x9   :  { %p2128_p4 = pnand %p2127_p3, %p2121_p0 }
   0xb   :  { %2131 = shalt.err (!%p2128_p4)
}
   0xc   :  { %s2200_s20 = smov 256   ;;  %s2201_s21 = smov 16  }
   0xd   :  { %35 = dma.hbm_to_vmem [thread:$0]  %s2711_s1, 4096, %s30_s16, [#allocation8], %s2200_s20, %s2200_s20, %s2201_s21  }
   0xe   :  { %s2140_s24 = scalar_lea.vmem %s18_s18, 4096  ;;  %p2145_p6 = scmp.lt.s32.totalorder %s18_s18, %s18_s18 }
   0xf   :  { %p2141_p5 = scmp.ne.s32.totalorder %s18_s18, %s2140_s24  ;;  %p2146_p7 = scmp.lt.s32.totalorder %s2140_s24, %s2140_s24 }
  0x11   :  { %p2147_p8 = por %p2146_p7, %p2145_p6 }
  0x13   :  { %p2148_p9 = pnand %p2147_p8, %p2141_p5 }
  0x15   :  { %2151 = shalt.err (!%p2148_p9)
}
  0x16   :  { %23 = dma.hbm_to_vmem [thread:$0]  %s2710_s0, 4096, %s18_s18, [#allocation5], %s2200_s20, %s2200_s20, %s2201_s21  }
  0x17   :  { %s2202_s27 = smov [#allocation9]  }
  0x18   :  { %s41_s28 = sshll.u32 %s2202_s27, 4  ;;  %s42_s28 = int_to_ptr.vmem [resolvable:$true] %s41_s28 }
  0x19   :  { %s2160_s29 = scalar_lea.vmem %s42_s28, 2048  ;;  %p2165_p11 = scmp.lt.s32.totalorder %s42_s28, %s42_s28 }
  0x1a   :  { %p2161_p10 = scmp.ne.s32.totalorder %s42_s28, %s2160_s29  ;;  %p2166_p12 = scmp.lt.s32.totalorder %s2160_s29, %s2160_s29 }
  0x1c   :  { %p2167_p13 = por %p2166_p12, %p2165_p11 }
  0x1e   :  { %p2168_p0 = pnand %p2167_p13, %p2161_p10 }
  0x20   :  { %2171 = shalt.err (!%p2168_p0)
}
  0x21   :  { %s2203_s1 = smov 128   ;;  %s2204_s30 = smov 8  }
  0x22   :  { %47 = dma.hbm_to_vmem [thread:$0]  %s2712_s2, 2048, %s42_s28, [#allocation8], %s2203_s1, %s2203_s1, %s2204_s30  }
  0x23   :  { %2192 = dma.done.wait [#allocation5], 4096  }
  0x24   :  { %2193 = vsyncadd [#allocation5], 4294963200 }
  0x25   :  { %2194 = dma.done.wait [#allocation8], 6144  }
  0x26   :  { %2195 = vsyncadd [#allocation8], 4294961152  ;;  %v2205_v0 = vmov 0   ;;  %v2247_v1 = vld [vmem:[#allocation7 + $0xe4] ss:$16 sps:$4 sm:$0xff]   ;;  %v2206_v33 = vmov 0.0|0.0  }
  0x27   :  { %311 = vmatprep.mubr.bf16.mxu0 %v2205_v0  ;;  %354 = vmatprep.mubr.bf16.mxu1 %v2205_v0  ;;  %v2249_v2 = vld [vmem:[#allocation7 + $0xe0] ss:$16 sps:$4 sm:$0xff]   ;;  %v2252_v3 = vld [vmem:[#allocation7 + $0xc4] ss:$16 sps:$4 sm:$0xff]   ;;  %v2260_v6 = vld [vmem:[#allocation7 + $0xec] ss:$16 sps:$4 sm:$0xff]  }
  0x28   :  { %279 = vmatprep.subr.bf16.mxu0 %v2247_v1  ;;  %v2255_v4 = vld [vmem:[#allocation7 + $0xc0] ss:$16 sps:$4 sm:$0xff]   ;;  %v2258_v5 = vld [vmem:[#allocation7 + $0xa4] ss:$16 sps:$4 sm:$0xff]   ;;  %v2262_v7 = vld [vmem:[#allocation7 + $0xe8] ss:$16 sps:$4 sm:$0xff]   ;;  %322 = vmatprep.subr.bf16.mxu1 %v2260_v6 }
  0x29   :  { %280 = vmatpush1.bf16.msra.mxu0 %v2249_v2  ;;  %v2265_v8 = vld [vmem:[#allocation7 + $0xa0] ss:$16 sps:$4 sm:$0xff]   ;;  %v2269_v9 = vld [vmem:[#allocation7 + $0x84] ss:$16 sps:$4 sm:$0xff]   ;;  %323 = vmatpush1.bf16.msra.mxu1 %v2262_v7  ;;  %v2272_v10 = vld [vmem:[#allocation7 + $0xcc] ss:$16 sps:$4 sm:$0xff]  }
  0x2a   :  { %281 = vmatprep.subr.bf16.mxu0 %v2252_v3  ;;  %v2274_v11 = vld [vmem:[#allocation7 + $0xc8] ss:$16 sps:$4 sm:$0xff]   ;;  %324 = vmatprep.subr.bf16.mxu1 %v2272_v10  ;;  %v2278_v12 = vld [vmem:[#allocation7 + $0x80] ss:$16 sps:$4 sm:$0xff]   ;;  %v2280_v13 = vld [vmem:[#allocation7 + $0x64] ss:$16 sps:$4 sm:$0xff]  }
  0x2b   :  { %v2282_v14 = vld [vmem:[#allocation7 + $0xac] ss:$16 sps:$4 sm:$0xff]   ;;  %v2286_v15 = vld [vmem:[#allocation7 + $0xa8] ss:$16 sps:$4 sm:$0xff]   ;;  %v2292_v17 = vld [vmem:[#allocation7 + $0x60] ss:$16 sps:$4 sm:$0xff]  }
  0x2c   :  { %v2289_v16 = vld [vmem:[#allocation7 + $0x8c] ss:$16 sps:$4 sm:$0xff]   ;;  %v2295_v18 = vld [vmem:[#allocation7 + $0x44] ss:$16 sps:$4 sm:$0xff]   ;;  %v2298_v19 = vld [vmem:[#allocation7 + $0x88] ss:$16 sps:$4 sm:$0xff]  }
  0x2d   :  { %282 = vmatpush1.bf16.msra.mxu0 %v2255_v4  ;;  %325 = vmatpush1.bf16.msra.mxu1 %v2274_v11  ;;  %v2301_v20 = vld [vmem:[#allocation7 + $0x6c] ss:$16 sps:$4 sm:$0xff]   ;;  %v2304_v21 = vld [vmem:[#allocation7 + $0x40] ss:$16 sps:$4 sm:$0xff]   ;;  %v2306_v22 = vld [vmem:[#allocation7 + $0x24] ss:$16 sps:$4 sm:$0xff]  }
  0x2e   :  { %283 = vmatprep.subr.bf16.mxu0 %v2258_v5  ;;  %326 = vmatprep.subr.bf16.mxu1 %v2282_v14  ;;  %v2310_v23 = vld [vmem:[#allocation7 + $0x68] ss:$16 sps:$4 sm:$0xff]   ;;  %v2313_v24 = vld [vmem:[#allocation7 + $0x4c] ss:$16 sps:$4 sm:$0xff]   ;;  %v2316_v25 = vld [vmem:[#allocation7 + $0x20] ss:$16 sps:$4 sm:$0xff]  }
  0x2f   :  { %v2319_v26 = vld [vmem:[#allocation7 + $0x4] ss:$16 sps:$4 sm:$0xff]   ;;  %v2322_v27 = vld [vmem:[#allocation7 + $0x48] ss:$16 sps:$4 sm:$0xff]   ;;  %v2325_v28 = vld [vmem:[#allocation7 + $0x2c] ss:$16 sps:$4 sm:$0xff]  }
  0x30   :  { %v2328_v29 = vld [vmem:[#allocation7] ss:$16 sps:$4 sm:$0xff]   ;;  %v2332_v30 = vld [vmem:[#allocation7 + $0x28] ss:$16 sps:$4 sm:$0xff]   ;;  %v2335_v31 = vld [vmem:[#allocation7 + $0xc] ss:$16 sps:$4 sm:$0xff]  }
  0x31   :  { %284 = vmatpush1.bf16.msra.mxu0 %v2265_v8  ;;  %327 = vmatpush1.bf16.msra.mxu1 %v2286_v15  ;;  %v2339_v32 = vld [vmem:[#allocation7 + $0x8] ss:$16 sps:$4 sm:$0xff]   ;;  %v74_v34 = vld [vmem:[#allocation4] sm:$0xff]  ;;  %v76_v36 = vld [vmem:[#allocation4 + $0x10] sm:$0xff]  ;;  %s2207_s7 = smov [#allocation10]  }
  0x32   :  { %285 = vmatprep.subr.bf16.mxu0 %v2269_v9  ;;  %328 = vmatprep.subr.bf16.mxu1 %v2289_v16  ;;  %v78_v35 = vunpack.c.l.bf16 %v74_v34  ;;  %v79_v37 = vunpack.c.h.bf16 %v74_v34  ;;  %v82_v40 = vunpack.c.l.bf16 %v76_v36  ;;  %v83_v44 = vunpack.c.h.bf16 %v76_v36  ;;  %v75_v52 = vld [vmem:[#allocation4 + $0x8] sm:$0xff]  ;;  %v77_v55 = vld [vmem:[#allocation4 + $0x18] sm:$0xff]  ;;  %s1618_s8 = sshll.u32 %s2207_s7, 4  ;;  %s1619_s8 = int_to_ptr.vmem [resolvable:$true] %s1618_s8 }
  0x33   :  { %v81_v57 = vunpack.c.h.bf16 %v75_v52  ;;  %v80_v58 = vunpack.c.l.bf16 %v75_v52  ;;  %v85_v59 = vunpack.c.h.bf16 %v77_v55  ;;  %s2172_s9 = scalar_lea.vmem %s1619_s8, 256  ;;  %p2177_p2 = scmp.lt.s32.totalorder %s1619_s8, %s1619_s8 }
  0x34   :  { %p2173_p1 = scmp.ne.s32.totalorder %s1619_s8, %s2172_s9  ;;  %p2178_p3 = scmp.lt.s32.totalorder %s2172_s9, %s2172_s9 }
  0x35   :  { %286 = vmatpush1.bf16.msra.mxu0 %v2278_v12  ;;  %329 = vmatpush1.bf16.msra.mxu1 %v2298_v19 }
  0x36   :  { %287 = vmatprep.subr.bf16.mxu0 %v2280_v13  ;;  %330 = vmatprep.subr.bf16.mxu1 %v2301_v20  ;;  %p2179_p4 = por %p2178_p3, %p2177_p2 }
  0x38   :  { %p2180_p5 = pnand %p2179_p4, %p2173_p1 }
  0x39   :  { %288 = vmatpush1.bf16.msra.mxu0 %v2292_v17  ;;  %331 = vmatpush1.bf16.msra.mxu1 %v2310_v23 }
  0x3a   :  { %289 = vmatprep.subr.bf16.mxu0 %v2295_v18  ;;  %332 = vmatprep.subr.bf16.mxu1 %v2313_v24 }
  0x3d   :  { %290 = vmatpush1.bf16.msra.mxu0 %v2304_v21  ;;  %333 = vmatpush1.bf16.msra.mxu1 %v2322_v27 }
  0x3e   :  { %291 = vmatprep.subr.bf16.mxu0 %v2306_v22  ;;  %334 = vmatprep.subr.bf16.mxu1 %v2325_v28 }
  0x41   :  { %292 = vmatpush1.bf16.msra.mxu0 %v2316_v25  ;;  %335 = vmatpush1.bf16.msra.mxu1 %v2332_v30 }
  0x42   :  { %293 = vmatprep.subr.bf16.mxu0 %v2319_v26  ;;  %336 = vmatprep.subr.bf16.mxu1 %v2335_v31 }
  0x45   :  { %294 = vmatpush1.bf16.msra.mxu0 %v2328_v29  ;;  %337 = vmatpush1.bf16.msra.mxu1 %v2339_v32 }
  0x46   :  { %434 = vmatprep.subr.bf16.mxu0 %v2247_v1  ;;  %477 = vmatprep.subr.bf16.mxu1 %v2260_v6 }
  0x48   :  { %312 = vmatmul.mubr.bf16.vlgmr.msra.gmra.mxu0 %v2206_v33  ;;  %355 = vmatmul.mubr.bf16.vlgmr.msra.gmra.mxu1 %v2206_v33 }
  0x49   :  { %435 = vmatpush1.bf16.msra.mxu0 %v2249_v2  ;;  %466 = vmatprep.mubr.bf16.mxu0 %v2205_v0 }
  0x4a   :  { %436 = vmatprep.subr.bf16.mxu0 %v2252_v3  ;;  %478 = vmatpush1.bf16.msra.mxu1 %v2262_v7 }
  0x4b   :  { %479 = vmatprep.subr.bf16.mxu1 %v2272_v10  ;;  %509 = vmatprep.mubr.bf16.mxu1 %v2205_v0 }
  0x4d   :  { %437 = vmatpush1.bf16.msra.mxu0 %v2255_v4 }
  0x4e   :  { %438 = vmatprep.subr.bf16.mxu0 %v2258_v5  ;;  %480 = vmatpush1.bf16.msra.mxu1 %v2274_v11 }
  0x4f   :  { %481 = vmatprep.subr.bf16.mxu1 %v2282_v14 }
  0x51   :  { %439 = vmatpush1.bf16.msra.mxu0 %v2265_v8 }
  0x52   :  { %440 = vmatprep.subr.bf16.mxu0 %v2269_v9  ;;  %482 = vmatpush1.bf16.msra.mxu1 %v2286_v15 }
  0x53   :  { %483 = vmatprep.subr.bf16.mxu1 %v2289_v16 }
  0x55   :  { %441 = vmatpush1.bf16.msra.mxu0 %v2278_v12 }
  0x56   :  { %442 = vmatprep.subr.bf16.mxu0 %v2280_v13  ;;  %484 = vmatpush1.bf16.msra.mxu1 %v2298_v19 }
  0x57   :  { %485 = vmatprep.subr.bf16.mxu1 %v2301_v20 }
  0x59   :  { %443 = vmatpush1.bf16.msra.mxu0 %v2292_v17 }
  0x5a   :  { %444 = vmatprep.subr.bf16.mxu0 %v2295_v18  ;;  %486 = vmatpush1.bf16.msra.mxu1 %v2310_v23 }
  0x5b   :  { %487 = vmatprep.subr.bf16.mxu1 %v2313_v24 }
  0x5d   :  { %445 = vmatpush1.bf16.msra.mxu0 %v2304_v21 }
  0x5e   :  { %446 = vmatprep.subr.bf16.mxu0 %v2306_v22  ;;  %488 = vmatpush1.bf16.msra.mxu1 %v2322_v27 }
  0x5f   :  { %489 = vmatprep.subr.bf16.mxu1 %v2325_v28 }
  0x61   :  { %447 = vmatpush1.bf16.msra.mxu0 %v2316_v25 }
  0x62   :  { %448 = vmatprep.subr.bf16.mxu0 %v2319_v26  ;;  %490 = vmatpush1.bf16.msra.mxu1 %v2332_v30 }
  0x63   :  { %491 = vmatprep.subr.bf16.mxu1 %v2335_v31 }
  0x65   :  { %449 = vmatpush1.bf16.msra.mxu0 %v2328_v29 }
  0x66   :  { %589 = vmatprep.subr.bf16.mxu0 %v2247_v1  ;;  %492 = vmatpush1.bf16.msra.mxu1 %v2339_v32 }
  0x67   :  { %632 = vmatprep.subr.bf16.mxu1 %v2260_v6 }
 0x108   :  { %v313_v38 = vpop.f32.mrf.mxu0  ;;  %v356_v48 = vpop.f32.mrf.mxu1 }
 0x109   :  { %v365_v39 = vadd.f32 %v313_v38, %v78_v35  ;;  %v367_v62 = vadd.f32 %v356_v48, %v80_v58  ;;  %v84_v35 = vunpack.c.l.bf16 %v77_v55 }
 0x10a   :  { %v315_v41 = vpop.f32.mrf.mxu0  ;;  %v358_v53 = vpop.f32.mrf.mxu1 }
 0x10b   :  { %v1663_v42 = vmul.f32 -1.442695, %v365_v39  ;;  %v366_v43 = vadd.f32 %v315_v41, %v79_v37  ;;  %v368_v61 = vadd.f32 %v358_v53, %v81_v57 }
 0x10c   :  { %v317_v45 = vpop.f32.mrf.mxu0  ;;  %v360_v56 = vpop.f32.mrf.mxu1 }
 0x10d   :  { %1824 = vpow2.f32 %v1663_v42  ;;  %v1665_v46 = vmul.f32 -1.442695, %v366_v43  ;;  %v369_v47 = vadd.f32 %v317_v45, %v82_v40  ;;  %v1667_v34 = vmul.f32 -1.442695, %v368_v61 }
 0x10e   :  { %v319_v49 = vpop.f32.mrf.mxu0  ;;  %v362_v60 = vpop.f32.mrf.mxu1  ;;  %v371_v41 = vadd.f32 %v360_v56, %v84_v35 }
 0x10f   :  { %1826 = vpow2.f32 %v1665_v46  ;;  %v1664_v50 = vmul.f32 -1.442695, %v369_v47  ;;  %v370_v51 = vadd.f32 %v319_v49, %v83_v44  ;;  %v372_v63 = vadd.f32 %v362_v60, %v85_v59 }
 0x111   :  { %1828 = vpow2.f32 %v1664_v50  ;;  %v1666_v54 = vmul.f32 -1.442695, %v370_v51  ;;  %v1668_v38 = vmul.f32 -1.442695, %v372_v63 }
 0x113   :  { %1830 = vpow2.f32 %v1666_v54 }
 0x114   :  { %1832 = vtanh.f32 %v367_v62 }
 0x11a   :  { %v1825_v33 = vpop.eup %1824 }
 0x11b   :  { %v379_v36 = vadd.f32 1.0, %v1825_v33 }
 0x11c   :  { %v1827_v37 = vpop.eup %1826 }
 0x11d   :  { %1834 = vrcp.f32 %v379_v36  ;;  %v391_v39 = vadd.f32 1.0, %v1827_v37  ;;  %v421_v37 = vld [vmem:[#allocation4 + $0x20] sm:$0xff] }
 0x11e   :  { %v1829_v40 = vpop.eup %1828  ;;  %1836 = vpow2.f32 %v1667_v34 }
 0x11f   :  { %1838 = vrcp.f32 %v391_v39  ;;  %v380_v42 = vadd.f32 1.0, %v1829_v40  ;;  %v423_v39 = vld [vmem:[#allocation4 + $0x30] sm:$0xff]  ;;  %v426_v40 = vunpack.c.h.bf16 %v421_v37 }
 0x120   :  { %v1831_v43 = vpop.eup %1830  ;;  %1840 = vpow2.f32 %v1668_v38  ;;  %v425_v38 = vunpack.c.l.bf16 %v421_v37 }
 0x121   :  { %1842 = vrcp.f32 %v380_v42  ;;  %v392_v44 = vadd.f32 1.0, %v1831_v43  ;;  %v1833_v45 = vpop.eup %1832 }
 0x122   :  { %1844 = vtanh.f32 %v371_v41 }
 0x123   :  { %1846 = vrcp.f32 %v392_v44  ;;  %v429_v44 = vunpack.c.l.bf16 %v423_v39 }
 0x12a   :  { %v1835_v46 = vpop.eup %1834 }
 0x12b   :  { %v1837_v47 = vpop.eup %1836  ;;  %v413_v51 = vmul.f32 %v1835_v46, %v1833_v45 }
 0x12c   :  { %v1839_v48 = vpop.eup %1838  ;;  %v405_v53 = vadd.f32 1.0, %v1837_v47 }
 0x12d   :  { %v1841_v49 = vpop.eup %1840  ;;  %v411_v50 = vmul.f32 0.0, %v1839_v48  ;;  %v430_v48 = vunpack.c.h.bf16 %v423_v39 }
 0x12e   :  { %v1843_v52 = vpop.eup %1842  ;;  %v406_v57 = vadd.f32 1.0, %v1841_v49  ;;  %1848 = vrcp.f32 %v405_v53 }
 0x12f   :  { %v1845_v54 = vpop.eup %1844  ;;  %v2379_v55 = vadd.f32 %v413_v51, %v411_v50 }
 0x130   :  { %v1847_v56 = vpop.eup %1846  ;;  %v414_v59 = vmul.f32 %v1845_v54, %v1843_v52 }
 0x131   :  { %v412_v58 = vmul.f32 0.0, %v1847_v56  ;;  %1850 = vtanh.f32 %v2379_v55 }
 0x132   :  { %1852 = vrcp.f32 %v406_v57  ;;  %v422_v57 = vld [vmem:[#allocation4 + $0x28] sm:$0xff] }
 0x133   :  { %v2382_v60 = vadd.f32 %v414_v59, %v412_v58 }
 0x135   :  { %1854 = vtanh.f32 %v2382_v60 }
 0x13b   :  { %v1849_v61 = vpop.eup %1848 }
 0x13e   :  { %v1851_v62 = vpop.eup %1850 }
 0x13f   :  { %v1853_v63 = vpop.eup %1852  ;;  %v419_v34 = vmul.f32 %v1851_v62, %v1849_v61  ;;  %v428_v61 = vunpack.c.h.bf16 %v422_v57  ;;  %v424_v62 = vld [vmem:[#allocation4 + $0x38] sm:$0xff] }
 0x142   :  { %v1855_v33 = vpop.eup %1854 }
 0x143   :  { %v420_v35 = vmul.f32 %v1855_v33, %v1853_v63  ;;  %v427_v63 = vunpack.c.l.bf16 %v422_v57  ;;  %v432_v33 = vunpack.c.h.bf16 %v424_v62 }
 0x145   :  { %v433_v36 = vpack.c.bf16 %v420_v35, %v419_v34 }
 0x147   :  { %467 = vmatmul.mubr.bf16.vlgmr.msra.gmra.mxu0 %v433_v36  ;;  %510 = vmatmul.mubr.bf16.vlgmr.msra.gmra.mxu1 %v433_v36 }
 0x148   :  { %590 = vmatpush1.bf16.msra.mxu0 %v2249_v2  ;;  %633 = vmatpush1.bf16.msra.mxu1 %v2262_v7 }
 0x149   :  { %591 = vmatprep.subr.bf16.mxu0 %v2252_v3  ;;  %634 = vmatprep.subr.bf16.mxu1 %v2272_v10 }
 0x14a   :  { %621 = vmatprep.mubr.bf16.mxu0 %v2205_v0  ;;  %664 = vmatprep.mubr.bf16.mxu1 %v2205_v0 }
 0x14c   :  { %592 = vmatpush1.bf16.msra.mxu0 %v2255_v4  ;;  %635 = vmatpush1.bf16.msra.mxu1 %v2274_v11 }
 0x14d   :  { %593 = vmatprep.subr.bf16.mxu0 %v2258_v5  ;;  %636 = vmatprep.subr.bf16.mxu1 %v2282_v14 }
 0x150   :  { %594 = vmatpush1.bf16.msra.mxu0 %v2265_v8  ;;  %637 = vmatpush1.bf16.msra.mxu1 %v2286_v15 }
 0x151   :  { %595 = vmatprep.subr.bf16.mxu0 %v2269_v9  ;;  %638 = vmatprep.subr.bf16.mxu1 %v2289_v16 }
 0x154   :  { %596 = vmatpush1.bf16.msra.mxu0 %v2278_v12  ;;  %639 = vmatpush1.bf16.msra.mxu1 %v2298_v19 }
 0x155   :  { %597 = vmatprep.subr.bf16.mxu0 %v2280_v13  ;;  %640 = vmatprep.subr.bf16.mxu1 %v2301_v20 }
 0x158   :  { %598 = vmatpush1.bf16.msra.mxu0 %v2292_v17  ;;  %641 = vmatpush1.bf16.msra.mxu1 %v2310_v23 }
 0x159   :  { %599 = vmatprep.subr.bf16.mxu0 %v2295_v18  ;;  %642 = vmatprep.subr.bf16.mxu1 %v2313_v24 }
 0x15c   :  { %600 = vmatpush1.bf16.msra.mxu0 %v2304_v21  ;;  %643 = vmatpush1.bf16.msra.mxu1 %v2322_v27 }
 0x15d   :  { %601 = vmatprep.subr.bf16.mxu0 %v2306_v22  ;;  %644 = vmatprep.subr.bf16.mxu1 %v2325_v28 }
 0x160   :  { %602 = vmatpush1.bf16.msra.mxu0 %v2316_v25  ;;  %645 = vmatpush1.bf16.msra.mxu1 %v2332_v30 }
 0x161   :  { %603 = vmatprep.subr.bf16.mxu0 %v2319_v26  ;;  %646 = vmatprep.subr.bf16.mxu1 %v2335_v31 }
 0x164   :  { %604 = vmatpush1.bf16.msra.mxu0 %v2328_v29  ;;  %647 = vmatpush1.bf16.msra.mxu1 %v2339_v32 }
 0x165   :  { %744 = vmatprep.subr.bf16.mxu0 %v2247_v1  ;;  %787 = vmatprep.subr.bf16.mxu1 %v2260_v6 }
 0x207   :  { %v468_v41 = vpop.f32.mrf.mxu0  ;;  %v511_v43 = vpop.f32.mrf.mxu1 }
 0x208   :  { %v520_v42 = vadd.f32 %v468_v41, %v425_v38  ;;  %v522_v36 = vadd.f32 %v511_v43, %v427_v63 }
 0x209   :  { %v470_v45 = vpop.f32.mrf.mxu0  ;;  %v513_v51 = vpop.f32.mrf.mxu1 }
 0x20a   :  { %v1669_v46 = vmul.f32 -1.442695, %v520_v42  ;;  %v521_v47 = vadd.f32 %v470_v45, %v426_v40  ;;  %v523_v35 = vadd.f32 %v513_v51, %v428_v61  ;;  %v431_v40 = vunpack.c.l.bf16 %v424_v62 }
 0x20b   :  { %v472_v49 = vpop.f32.mrf.mxu0  ;;  %v515_v58 = vpop.f32.mrf.mxu1 }
 0x20c   :  { %1856 = vpow2.f32 %v1669_v46  ;;  %v1671_v50 = vmul.f32 -1.442695, %v521_v47  ;;  %v524_v52 = vadd.f32 %v472_v49, %v429_v44  ;;  %v1673_v39 = vmul.f32 -1.442695, %v523_v35 }
 0x20d   :  { %v474_v53 = vpop.f32.mrf.mxu0  ;;  %v517_v34 = vpop.f32.mrf.mxu1  ;;  %v526_v47 = vadd.f32 %v515_v58, %v431_v40 }
 0x20e   :  { %1858 = vpow2.f32 %v1671_v50  ;;  %v1670_v54 = vmul.f32 -1.442695, %v524_v52  ;;  %v525_v56 = vadd.f32 %v474_v53, %v430_v48  ;;  %v527_v37 = vadd.f32 %v517_v34, %v432_v33 }
 0x210   :  { %1860 = vpow2.f32 %v1670_v54  ;;  %v1672_v59 = vmul.f32 -1.442695, %v525_v56  ;;  %v1674_v44 = vmul.f32 -1.442695, %v527_v37 }
 0x212   :  { %1862 = vpow2.f32 %v1672_v59 }
 0x213   :  { %1864 = vtanh.f32 %v522_v36 }
 0x219   :  { %v1857_v38 = vpop.eup %1856 }
 0x21a   :  { %v534_v41 = vadd.f32 1.0, %v1857_v38 }
 0x21b   :  { %v1859_v42 = vpop.eup %1858 }
 0x21c   :  { %1866 = vrcp.f32 %v534_v41  ;;  %v546_v45 = vadd.f32 1.0, %v1859_v42 }
 0x21d   :  { %v1861_v46 = vpop.eup %1860  ;;  %1868 = vpow2.f32 %v1673_v39 }
 0x21e   :  { %1870 = vrcp.f32 %v546_v45  ;;  %v535_v48 = vadd.f32 1.0, %v1861_v46  ;;  %v578_v45 = vld [vmem:[#allocation4 + $0x50] sm:$0xff] }
 0x21f   :  { %v1863_v49 = vpop.eup %1862  ;;  %1872 = vpow2.f32 %v1674_v44 }
 0x220   :  { %1874 = vrcp.f32 %v535_v48  ;;  %v547_v50 = vadd.f32 1.0, %v1863_v49  ;;  %v1865_v43 = vpop.eup %1864 }
 0x221   :  { %1876 = vtanh.f32 %v526_v47 }
 0x222   :  { %1878 = vrcp.f32 %v547_v50  ;;  %v584_v50 = vunpack.c.l.bf16 %v578_v45 }
 0x229   :  { %v1867_v51 = vpop.eup %1866 }
 0x22a   :  { %v1869_v52 = vpop.eup %1868  ;;  %v568_v56 = vmul.f32 %v1867_v51, %v1865_v43 }
 0x22b   :  { %v1871_v53 = vpop.eup %1870  ;;  %v560_v61 = vadd.f32 1.0, %v1869_v52 }
 0x22c   :  { %v1873_v54 = vpop.eup %1872  ;;  %v566_v57 = vmul.f32 %v1871_v53, %v2379_v55  ;;  %v585_v53 = vunpack.c.h.bf16 %v578_v45 }
 0x22d   :  { %v1875_v59 = vpop.eup %1874  ;;  %v561_v33 = vadd.f32 1.0, %v1873_v54  ;;  %1880 = vrcp.f32 %v560_v61 }
 0x22e   :  { %v1877_v62 = vpop.eup %1876  ;;  %v2420_v58 = vadd.f32 %v568_v56, %v566_v57 }
 0x22f   :  { %v1879_v63 = vpop.eup %1878  ;;  %v569_v34 = vmul.f32 %v1877_v62, %v1875_v59 }
 0x230   :  { %v567_v35 = vmul.f32 %v1879_v63, %v2382_v60  ;;  %1882 = vtanh.f32 %v2420_v58  ;;  %v576_v60 = vld [vmem:[#allocation4 + $0x40] sm:$0xff] }
 0x231   :  { %1884 = vrcp.f32 %v561_v33  ;;  %v580_v44 = vunpack.c.l.bf16 %v576_v60  ;;  %v581_v46 = vunpack.c.h.bf16 %v576_v60  ;;  %v577_v33 = vld [vmem:[#allocation4 + $0x48] sm:$0xff] }
 0x232   :  { %v2423_v36 = vadd.f32 %v569_v34, %v567_v35 }
 0x234   :  { %1886 = vtanh.f32 %v2423_v36 }
 0x23a   :  { %v1881_v37 = vpop.eup %1880 }
 0x23d   :  { %v1883_v55 = vpop.eup %1882 }
 0x23e   :  { %v1885_v38 = vpop.eup %1884  ;;  %v574_v40 = vmul.f32 %v1883_v55, %v1881_v37  ;;  %v583_v37 = vunpack.c.h.bf16 %v577_v33  ;;  %v579_v55 = vld [vmem:[#allocation4 + $0x58] sm:$0xff] }
 0x241   :  { %v1887_v39 = vpop.eup %1886 }
 0x242   :  { %v575_v41 = vmul.f32 %v1887_v39, %v1885_v38  ;;  %v582_v38 = vunpack.c.l.bf16 %v577_v33  ;;  %v587_v39 = vunpack.c.h.bf16 %v579_v55 }
 0x244   :  { %v588_v42 = vpack.c.bf16 %v575_v41, %v574_v40 }
 0x246   :  { %622 = vmatmul.mubr.bf16.vlgmr.msra.gmra.mxu0 %v588_v42  ;;  %665 = vmatmul.mubr.bf16.vlgmr.msra.gmra.mxu1 %v588_v42 }
 0x247   :  { %745 = vmatpush1.bf16.msra.mxu0 %v2249_v2  ;;  %788 = vmatpush1.bf16.msra.mxu1 %v2262_v7 }
 0x248   :  { %746 = vmatprep.subr.bf16.mxu0 %v2252_v3  ;;  %789 = vmatprep.subr.bf16.mxu1 %v2272_v10 }
 0x249   :  { %776 = vmatprep.mubr.bf16.mxu0 %v2205_v0  ;;  %819 = vmatprep.mubr.bf16.mxu1 %v2205_v0 }
 0x24b   :  { %747 = vmatpush1.bf16.msra.mxu0 %v2255_v4  ;;  %790 = vmatpush1.bf16.msra.mxu1 %v2274_v11 }
 0x24c   :  { %748 = vmatprep.subr.bf16.mxu0 %v2258_v5  ;;  %791 = vmatprep.subr.bf16.mxu1 %v2282_v14 }
 0x24f   :  { %749 = vmatpush1.bf16.msra.mxu0 %v2265_v8  ;;  %792 = vmatpush1.bf16.msra.mxu1 %v2286_v15 }
 0x250   :  { %750 = vmatprep.subr.bf16.mxu0 %v2269_v9  ;;  %793 = vmatprep.subr.bf16.mxu1 %v2289_v16 }
 0x253   :  { %751 = vmatpush1.bf16.msra.mxu0 %v2278_v12  ;;  %794 = vmatpush1.bf16.msra.mxu1 %v2298_v19 }
 0x254   :  { %752 = vmatprep.subr.bf16.mxu0 %v2280_v13  ;;  %795 = vmatprep.subr.bf16.mxu1 %v2301_v20 }
 0x257   :  { %753 = vmatpush1.bf16.msra.mxu0 %v2292_v17  ;;  %796 = vmatpush1.bf16.msra.mxu1 %v2310_v23 }
 0x258   :  { %754 = vmatprep.subr.bf16.mxu0 %v2295_v18  ;;  %797 = vmatprep.subr.bf16.mxu1 %v2313_v24 }
 0x25b   :  { %755 = vmatpush1.bf16.msra.mxu0 %v2304_v21  ;;  %798 = vmatpush1.bf16.msra.mxu1 %v2322_v27 }
 0x25c   :  { %756 = vmatprep.subr.bf16.mxu0 %v2306_v22  ;;  %799 = vmatprep.subr.bf16.mxu1 %v2325_v28 }
 0x25f   :  { %757 = vmatpush1.bf16.msra.mxu0 %v2316_v25  ;;  %800 = vmatpush1.bf16.msra.mxu1 %v2332_v30 }
 0x260   :  { %758 = vmatprep.subr.bf16.mxu0 %v2319_v26  ;;  %801 = vmatprep.subr.bf16.mxu1 %v2335_v31 }
 0x263   :  { %759 = vmatpush1.bf16.msra.mxu0 %v2328_v29  ;;  %802 = vmatpush1.bf16.msra.mxu1 %v2339_v32 }
 0x264   :  { %899 = vmatprep.subr.bf16.mxu0 %v2247_v1  ;;  %942 = vmatprep.subr.bf16.mxu1 %v2260_v6 }
 0x306   :  { %v623_v47 = vpop.f32.mrf.mxu0  ;;  %v666_v49 = vpop.f32.mrf.mxu1 }
 0x307   :  { %v675_v48 = vadd.f32 %v623_v47, %v580_v44  ;;  %v677_v42 = vadd.f32 %v666_v49, %v582_v38 }
 0x308   :  { %v625_v43 = vpop.f32.mrf.mxu0  ;;  %v668_v57 = vpop.f32.mrf.mxu1 }
 0x309   :  { %v1675_v51 = vmul.f32 -1.442695, %v675_v48  ;;  %v676_v52 = vadd.f32 %v625_v43, %v581_v46  ;;  %v678_v41 = vadd.f32 %v668_v57, %v583_v37  ;;  %v586_v46 = vunpack.c.l.bf16 %v579_v55 }
 0x30a   :  { %v627_v54 = vpop.f32.mrf.mxu0  ;;  %v670_v34 = vpop.f32.mrf.mxu1 }
 0x30b   :  { %1888 = vpow2.f32 %v1675_v51  ;;  %v1677_v56 = vmul.f32 -1.442695, %v676_v52  ;;  %v679_v59 = vadd.f32 %v627_v54, %v584_v50  ;;  %v1679_v45 = vmul.f32 -1.442695, %v678_v41 }
 0x30c   :  { %v629_v61 = vpop.f32.mrf.mxu0  ;;  %v672_v40 = vpop.f32.mrf.mxu1  ;;  %v681_v52 = vadd.f32 %v670_v34, %v586_v46 }
 0x30d   :  { %1890 = vpow2.f32 %v1677_v56  ;;  %v1676_v62 = vmul.f32 -1.442695, %v679_v59  ;;  %v680_v63 = vadd.f32 %v629_v61, %v585_v53  ;;  %v682_v60 = vadd.f32 %v672_v40, %v587_v39 }
 0x30f   :  { %1892 = vpow2.f32 %v1676_v62  ;;  %v1678_v35 = vmul.f32 -1.442695, %v680_v63  ;;  %v1680_v50 = vmul.f32 -1.442695, %v682_v60 }
 0x311   :  { %1894 = vpow2.f32 %v1678_v35 }
 0x312   :  { %1896 = vtanh.f32 %v677_v42 }
 0x318   :  { %v1889_v44 = vpop.eup %1888 }
 0x319   :  { %v689_v47 = vadd.f32 1.0, %v1889_v44 }
 0x31a   :  { %v1891_v48 = vpop.eup %1890 }
 0x31b   :  { %1898 = vrcp.f32 %v689_v47  ;;  %v701_v43 = vadd.f32 1.0, %v1891_v48 }
 0x31c   :  { %v1893_v51 = vpop.eup %1892  ;;  %1900 = vpow2.f32 %v1679_v45 }
 0x31d   :  { %1902 = vrcp.f32 %v701_v43  ;;  %v690_v53 = vadd.f32 1.0, %v1893_v51 }
 0x31e   :  { %v1895_v54 = vpop.eup %1894  ;;  %1904 = vpow2.f32 %v1680_v50 }
 0x31f   :  { %1906 = vrcp.f32 %v690_v53  ;;  %v702_v56 = vadd.f32 1.0, %v1895_v54  ;;  %v1897_v49 = vpop.eup %1896 }
 0x320   :  { %1908 = vtanh.f32 %v681_v52 }
 0x321   :  { %1910 = vrcp.f32 %v702_v56 }
 0x328   :  { %v1899_v57 = vpop.eup %1898 }
 0x329   :  { %v1901_v59 = vpop.eup %1900  ;;  %v723_v63 = vmul.f32 %v1899_v57, %v1897_v49 }
 0x32a   :  { %v1903_v61 = vpop.eup %1902  ;;  %v715_v37 = vadd.f32 1.0, %v1901_v59 }
 0x32b   :  { %v1905_v62 = vpop.eup %1904  ;;  %v721_v33 = vmul.f32 %v1903_v61, %v2420_v58 }
 0x32c   :  { %v1907_v35 = vpop.eup %1906  ;;  %v716_v39 = vadd.f32 1.0, %v1905_v62  ;;  %1912 = vrcp.f32 %v715_v37 }
 0x32d   :  { %v1909_v55 = vpop.eup %1908  ;;  %v2462_v34 = vadd.f32 %v723_v63, %v721_v33 }
 0x32e   :  { %v1911_v38 = vpop.eup %1910  ;;  %v724_v40 = vmul.f32 %v1909_v55, %v1907_v35 }
 0x32f   :  { %v722_v41 = vmul.f32 %v1911_v38, %v2423_v36  ;;  %1914 = vtanh.f32 %v2462_v34 }
 0x330   :  { %1916 = vrcp.f32 %v716_v39 }
 0x331   :  { %v2465_v42 = vadd.f32 %v724_v40, %v722_v41 }
 0x333   :  { %1918 = vtanh.f32 %v2465_v42 }
 0x339   :  { %v1913_v60 = vpop.eup %1912 }
 0x33c   :  { %v1915_v58 = vpop.eup %1914 }
 0x33d   :  { %v1917_v44 = vpop.eup %1916  ;;  %v729_v46 = vmul.f32 %v1915_v58, %v1913_v60 }
 0x340   :  { %v1919_v45 = vpop.eup %1918 }
 0x341   :  { %v730_v47 = vmul.f32 %v1919_v45, %v1917_v44 }
 0x343   :  { %v743_v48 = vpack.c.bf16 %v730_v47, %v729_v46 }
 0x345   :  { %777 = vmatmul.mubr.bf16.vlgmr.msra.gmra.mxu0 %v743_v48  ;;  %820 = vmatmul.mubr.bf16.vlgmr.msra.gmra.mxu1 %v743_v48 }
 0x346   :  { %900 = vmatpush1.bf16.msra.mxu0 %v2249_v2  ;;  %943 = vmatpush1.bf16.msra.mxu1 %v2262_v7  ;;  %v731_v2 = vld [vmem:[#allocation4 + $0x60] sm:$0xff] }
 0x347   :  { %901 = vmatprep.subr.bf16.mxu0 %v2252_v3  ;;  %944 = vmatprep.subr.bf16.mxu1 %v2272_v10  ;;  %v735_v3 = vunpack.c.l.bf16 %v731_v2 }
 0x348   :  { %931 = vmatprep.mubr.bf16.mxu0 %v2205_v0  ;;  %974 = vmatprep.mubr.bf16.mxu1 %v2205_v0 }
 0x34a   :  { %902 = vmatpush1.bf16.msra.mxu0 %v2255_v4  ;;  %945 = vmatpush1.bf16.msra.mxu1 %v2274_v11  ;;  %v733_v4 = vld [vmem:[#allocation4 + $0x70] sm:$0xff] }
 0x34b   :  { %903 = vmatprep.subr.bf16.mxu0 %v2258_v5  ;;  %946 = vmatprep.subr.bf16.mxu1 %v2282_v14  ;;  %v736_v5 = vunpack.c.h.bf16 %v731_v2  ;;  %v739_v10 = vunpack.c.l.bf16 %v733_v4  ;;  %v740_v14 = vunpack.c.h.bf16 %v733_v4 }
 0x34e   :  { %904 = vmatpush1.bf16.msra.mxu0 %v2265_v8  ;;  %947 = vmatpush1.bf16.msra.mxu1 %v2286_v15 }
 0x34f   :  { %905 = vmatprep.subr.bf16.mxu0 %v2269_v9  ;;  %948 = vmatprep.subr.bf16.mxu1 %v2289_v16 }
 0x352   :  { %906 = vmatpush1.bf16.msra.mxu0 %v2278_v12  ;;  %949 = vmatpush1.bf16.msra.mxu1 %v2298_v19 }
 0x353   :  { %907 = vmatprep.subr.bf16.mxu0 %v2280_v13  ;;  %950 = vmatprep.subr.bf16.mxu1 %v2301_v20  ;;  %v732_v20 = vld [vmem:[#allocation4 + $0x68] sm:$0xff] }
 0x356   :  { %908 = vmatpush1.bf16.msra.mxu0 %v2292_v17  ;;  %951 = vmatpush1.bf16.msra.mxu1 %v2310_v23  ;;  %v738_v23 = vunpack.c.h.bf16 %v732_v20 }
 0x357   :  { %909 = vmatprep.subr.bf16.mxu0 %v2295_v18  ;;  %952 = vmatprep.subr.bf16.mxu1 %v2313_v24  ;;  %v734_v24 = vld [vmem:[#allocation4 + $0x78] sm:$0xff] }
 0x358   :  { %v741_v53 = vunpack.c.l.bf16 %v734_v24 }
 0x35a   :  { %910 = vmatpush1.bf16.msra.mxu0 %v2304_v21  ;;  %953 = vmatpush1.bf16.msra.mxu1 %v2322_v27 }
 0x35b   :  { %911 = vmatprep.subr.bf16.mxu0 %v2306_v22  ;;  %954 = vmatprep.subr.bf16.mxu1 %v2325_v28 }
 0x35e   :  { %912 = vmatpush1.bf16.msra.mxu0 %v2316_v25  ;;  %955 = vmatpush1.bf16.msra.mxu1 %v2332_v30  ;;  %v737_v25 = vunpack.c.l.bf16 %v732_v20  ;;  %v2549_v20 = vld [vmem:[#allocation7 + $0x80] ss:$16 sps:$4 sm:$0xff]  }
 0x35f   :  { %913 = vmatprep.subr.bf16.mxu0 %v2319_v26  ;;  %956 = vmatprep.subr.bf16.mxu1 %v2335_v31  ;;  %v742_v26 = vunpack.c.h.bf16 %v734_v24  ;;  %v2561_v24 = vld [vmem:[#allocation7 + $0x60] ss:$16 sps:$4 sm:$0xff]  }
 0x362   :  { %914 = vmatpush1.bf16.msra.mxu0 %v2328_v29  ;;  %957 = vmatpush1.bf16.msra.mxu1 %v2339_v32 }
 0x363   :  { %1054 = vmatprep.subr.bf16.mxu0 %v2247_v1  ;;  %1097 = vmatprep.subr.bf16.mxu1 %v2260_v6 }
 0x405   :  { %v778_v7 = vpop.f32.mrf.mxu0  ;;  %v821_v9 = vpop.f32.mrf.mxu1 }
 0x406   :  { %v830_v8 = vadd.f32 %v778_v7, %v735_v3  ;;  %v832_v50 = vadd.f32 %v821_v9, %v737_v25  ;;  %v2564_v25 = vld [vmem:[#allocation7 + $0x68] ss:$16 sps:$4 sm:$0xff]  }
 0x407   :  { %v780_v11 = vpop.f32.mrf.mxu0  ;;  %v823_v17 = vpop.f32.mrf.mxu1 }
 0x408   :  { %v1681_v12 = vmul.f32 -1.442695, %v830_v8  ;;  %v831_v13 = vadd.f32 %v780_v11, %v736_v5  ;;  %v833_v36 = vadd.f32 %v823_v17, %v738_v23  ;;  %v2511_v11 = vld [vmem:[#allocation7 + $0xe0] ss:$16 sps:$4 sm:$0xff]   ;;  %v2534_v17 = vld [vmem:[#allocation7 + $0xac] ss:$16 sps:$4 sm:$0xff]  }
 0x409   :  { %v782_v15 = vpop.f32.mrf.mxu0  ;;  %v825_v21 = vpop.f32.mrf.mxu1  ;;  %v2558_v23 = vld [vmem:[#allocation7 + $0x6c] ss:$16 sps:$4 sm:$0xff]  }
 0x40a   :  { %1920 = vpow2.f32 %v1681_v12  ;;  %v1683_v16 = vmul.f32 -1.442695, %v831_v13  ;;  %v834_v18 = vadd.f32 %v782_v15, %v739_v10  ;;  %v1685_v52 = vmul.f32 -1.442695, %v833_v36  ;;  %v2517_v12 = vld [vmem:[#allocation7 + $0xc4] ss:$16 sps:$4 sm:$0xff]  }
 0x40b   :  { %v784_v1 = vpop.f32.mrf.mxu0  ;;  %v827_v29 = vpop.f32.mrf.mxu1  ;;  %v836_v61 = vadd.f32 %v825_v21, %v741_v53  ;;  %v2520_v13 = vld [vmem:[#allocation7 + $0xcc] ss:$16 sps:$4 sm:$0xff]   ;;  %v2528_v15 = vld [vmem:[#allocation7 + $0xc8] ss:$16 sps:$4 sm:$0xff]   ;;  %v2573_v36 = vld [vmem:[#allocation7 + $0x40] ss:$16 sps:$4 sm:$0xff]  }
 0x40c   :  { %1922 = vpow2.f32 %v1683_v16  ;;  %v1682_v6 = vmul.f32 -1.442695, %v834_v18  ;;  %v835_v19 = vadd.f32 %v784_v1, %v740_v14  ;;  %v837_v43 = vadd.f32 %v827_v29, %v742_v26  ;;  %v2525_v14 = vld [vmem:[#allocation7 + $0xc0] ss:$16 sps:$4 sm:$0xff]   ;;  %v2531_v16 = vld [vmem:[#allocation7 + $0xa4] ss:$16 sps:$4 sm:$0xff]  }
 0x40d   :  { %v2537_v18 = vld [vmem:[#allocation7 + $0xa0] ss:$16 sps:$4 sm:$0xff]   ;;  %v2540_v1 = vld [vmem:[#allocation7 + $0xa8] ss:$16 sps:$4 sm:$0xff]   ;;  %v2567_v26 = vld [vmem:[#allocation7 + $0x44] ss:$16 sps:$4 sm:$0xff]  }
 0x40e   :  { %1924 = vpow2.f32 %v1682_v6  ;;  %v1684_v22 = vmul.f32 -1.442695, %v835_v19  ;;  %v1686_v49 = vmul.f32 -1.442695, %v837_v43  ;;  %v2543_v6 = vld [vmem:[#allocation7 + $0x84] ss:$16 sps:$4 sm:$0xff]  }
 0x40f   :  { %v2546_v19 = vld [vmem:[#allocation7 + $0x8c] ss:$16 sps:$4 sm:$0xff]   ;;  %v2552_v21 = vld [vmem:[#allocation7 + $0x88] ss:$16 sps:$4 sm:$0xff]   ;;  %v2581_v43 = vld [vmem:[#allocation7 + $0x20] ss:$16 sps:$4 sm:$0xff]  }
 0x410   :  { %1926 = vpow2.f32 %v1684_v22  ;;  %v2555_v22 = vld [vmem:[#allocation7 + $0x64] ss:$16 sps:$4 sm:$0xff]   ;;  %v2570_v29 = vld [vmem:[#allocation7 + $0x4c] ss:$16 sps:$4 sm:$0xff]  }
 0x411   :  { %1928 = vtanh.f32 %v832_v50  ;;  %v2577_v50 = vld [vmem:[#allocation7 + $0x24] ss:$16 sps:$4 sm:$0xff]  }
 0x417   :  { %v1921_v51 = vpop.eup %1920 }
 0x418   :  { %v844_v54 = vadd.f32 1.0, %v1921_v51  ;;  %v2585_v51 = vld [vmem:[#allocation7 + $0x4] ss:$16 sps:$4 sm:$0xff]  }
 0x419   :  { %v1923_v56 = vpop.eup %1922 }
 0x41a   :  { %1930 = vrcp.f32 %v844_v54  ;;  %v856_v57 = vadd.f32 1.0, %v1923_v56  ;;  %v888_v54 = vld [vmem:[#allocation4 + $0x90] sm:$0xff] }
 0x41b   :  { %v1925_v59 = vpop.eup %1924  ;;  %1932 = vpow2.f32 %v1685_v52  ;;  %v2589_v52 = vld [vmem:[#allocation7] ss:$16 sps:$4 sm:$0xff]  }
 0x41c   :  { %1934 = vrcp.f32 %v856_v57  ;;  %v845_v62 = vadd.f32 1.0, %v1925_v59  ;;  %v894_v59 = vunpack.c.l.bf16 %v888_v54 }
 0x41d   :  { %v1927_v63 = vpop.eup %1926  ;;  %1936 = vpow2.f32 %v1686_v49 }
 0x41e   :  { %1938 = vrcp.f32 %v845_v62  ;;  %v857_v33 = vadd.f32 1.0, %v1927_v63  ;;  %v1929_v35 = vpop.eup %1928 }
 0x41f   :  { %1940 = vtanh.f32 %v836_v61 }
 0x420   :  { %1942 = vrcp.f32 %v857_v33 }
 0x427   :  { %v1931_v37 = vpop.eup %1930 }
 0x428   :  { %v1933_v55 = vpop.eup %1932  ;;  %v878_v40 = vmul.f32 %v1931_v37, %v1929_v35 }
 0x429   :  { %v1935_v38 = vpop.eup %1934  ;;  %v870_v58 = vadd.f32 1.0, %v1933_v55 }
 0x42a   :  { %v1937_v39 = vpop.eup %1936  ;;  %v876_v41 = vmul.f32 %v1935_v38, %v2462_v34 }
 0x42b   :  { %v1939_v60 = vpop.eup %1938  ;;  %v871_v47 = vadd.f32 1.0, %v1937_v39  ;;  %1944 = vrcp.f32 %v870_v58 }
 0x42c   :  { %v1941_v44 = vpop.eup %1940  ;;  %v2504_v45 = vadd.f32 %v878_v40, %v876_v41  ;;  %v887_v41 = vld [vmem:[#allocation4 + $0x88] sm:$0xff] }
 0x42d   :  { %v1943_v46 = vpop.eup %1942  ;;  %v879_v48 = vmul.f32 %v1941_v44, %v1939_v60  ;;  %v893_v44 = vunpack.c.h.bf16 %v887_v41 }
 0x42e   :  { %v877_v2 = vmul.f32 %v1943_v46, %v2465_v42  ;;  %1946 = vtanh.f32 %v2504_v45  ;;  %v2514_v42 = vld [vmem:[#allocation7 + $0xe8] ss:$16 sps:$4 sm:$0xff]  }
 0x42f   :  { %1948 = vrcp.f32 %v871_v47  ;;  %v889_v46 = vld [vmem:[#allocation4 + $0x98] sm:$0xff]  ;;  %v892_v47 = vunpack.c.l.bf16 %v887_v41 }
 0x430   :  { %v2507_v3 = vadd.f32 %v879_v48, %v877_v2  ;;  %v897_v48 = vunpack.c.h.bf16 %v889_v46 }
 0x432   :  { %1950 = vtanh.f32 %v2507_v3 }
 0x438   :  { %v1945_v4 = vpop.eup %1944 }
 0x43b   :  { %v1947_v34 = vpop.eup %1946 }
 0x43c   :  { %v1949_v5 = vpop.eup %1948  ;;  %v884_v8 = vmul.f32 %v1947_v34, %v1945_v4 }
 0x43f   :  { %v1951_v7 = vpop.eup %1950 }
 0x440   :  { %v885_v9 = vmul.f32 %v1951_v7, %v1949_v5 }
 0x442   :  { %v898_v10 = vpack.c.bf16 %v885_v9, %v884_v8  ;;  %v896_v9 = vunpack.c.l.bf16 %v889_v46 }
 0x444   :  { %932 = vmatmul.mubr.bf16.vlgmr.msra.gmra.mxu0 %v898_v10  ;;  %975 = vmatmul.mubr.bf16.vlgmr.msra.gmra.mxu1 %v898_v10 }
 0x445   :  { %1055 = vmatpush1.bf16.msra.mxu0 %v2511_v11  ;;  %1098 = vmatpush1.bf16.msra.mxu1 %v2514_v42 }
 0x446   :  { %1056 = vmatprep.subr.bf16.mxu0 %v2517_v12  ;;  %1099 = vmatprep.subr.bf16.mxu1 %v2520_v13 }
 0x447   :  { %1086 = vmatprep.mubr.bf16.mxu0 %v2205_v0  ;;  %1129 = vmatprep.mubr.bf16.mxu1 %v2205_v0 }
 0x449   :  { %1057 = vmatpush1.bf16.msra.mxu0 %v2525_v14  ;;  %1100 = vmatpush1.bf16.msra.mxu1 %v2528_v15 }
 0x44a   :  { %1058 = vmatprep.subr.bf16.mxu0 %v2531_v16  ;;  %1101 = vmatprep.subr.bf16.mxu1 %v2534_v17 }
 0x44d   :  { %1059 = vmatpush1.bf16.msra.mxu0 %v2537_v18  ;;  %1102 = vmatpush1.bf16.msra.mxu1 %v2540_v1 }
 0x44e   :  { %1060 = vmatprep.subr.bf16.mxu0 %v2543_v6  ;;  %1103 = vmatprep.subr.bf16.mxu1 %v2546_v19 }
 0x451   :  { %1061 = vmatpush1.bf16.msra.mxu0 %v2549_v20  ;;  %1104 = vmatpush1.bf16.msra.mxu1 %v2552_v21 }
 0x452   :  { %1062 = vmatprep.subr.bf16.mxu0 %v2555_v22  ;;  %1105 = vmatprep.subr.bf16.mxu1 %v2558_v23 }
 0x455   :  { %1063 = vmatpush1.bf16.msra.mxu0 %v2561_v24  ;;  %1106 = vmatpush1.bf16.msra.mxu1 %v2564_v25 }
 0x456   :  { %1064 = vmatprep.subr.bf16.mxu0 %v2567_v26  ;;  %1107 = vmatprep.subr.bf16.mxu1 %v2570_v29 }
 0x459   :  { %1065 = vmatpush1.bf16.msra.mxu0 %v2573_v36  ;;  %1108 = vmatpush1.bf16.msra.mxu1 %v2322_v27  ;;  %v2593_v27 = vld [vmem:[#allocation7 + $0xe4] ss:$16 sps:$4 sm:$0xff]  }
 0x45a   :  { %1066 = vmatprep.subr.bf16.mxu0 %v2577_v50  ;;  %1109 = vmatprep.subr.bf16.mxu1 %v2325_v28  ;;  %v2596_v28 = vld [vmem:[#allocation7 + $0xec] ss:$16 sps:$4 sm:$0xff]  }
 0x45d   :  { %1067 = vmatpush1.bf16.msra.mxu0 %v2581_v43  ;;  %1110 = vmatpush1.bf16.msra.mxu1 %v2332_v30  ;;  %v886_v30 = vld [vmem:[#allocation4 + $0x80] sm:$0xff] }
 0x45e   :  { %1068 = vmatprep.subr.bf16.mxu0 %v2585_v51  ;;  %1111 = vmatprep.subr.bf16.mxu1 %v2335_v31  ;;  %v890_v53 = vunpack.c.l.bf16 %v886_v30  ;;  %v891_v56 = vunpack.c.h.bf16 %v886_v30 }
 0x461   :  { %1069 = vmatpush1.bf16.msra.mxu0 %v2589_v52  ;;  %1112 = vmatpush1.bf16.msra.mxu1 %v2339_v32  ;;  %v895_v32 = vunpack.c.h.bf16 %v888_v54 }
 0x462   :  { %1209 = vmatprep.subr.bf16.mxu0 %v2593_v27  ;;  %1252 = vmatprep.subr.bf16.mxu1 %v2596_v28 }
 0x504   :  { %v933_v49 = vpop.f32.mrf.mxu0  ;;  %v976_v57 = vpop.f32.mrf.mxu1 }
 0x505   :  { %v985_v31 = vadd.f32 %v933_v49, %v890_v53  ;;  %v987_v34 = vadd.f32 %v976_v57, %v892_v47 }
 0x506   :  { %v935_v61 = vpop.f32.mrf.mxu0  ;;  %v978_v37 = vpop.f32.mrf.mxu1 }
 0x507   :  { %v1687_v62 = vmul.f32 -1.442695, %v985_v31  ;;  %v986_v63 = vadd.f32 %v935_v61, %v891_v56  ;;  %v988_v4 = vadd.f32 %v978_v37, %v893_v44 }
 0x508   :  { %v937_v33 = vpop.f32.mrf.mxu0  ;;  %v980_v60 = vpop.f32.mrf.mxu1 }
 0x509   :  { %1952 = vpow2.f32 %v1687_v62  ;;  %v1689_v35 = vmul.f32 -1.442695, %v986_v63  ;;  %v989_v55 = vadd.f32 %v937_v33, %v894_v59  ;;  %v1691_v8 = vmul.f32 -1.442695, %v988_v4 }
 0x50a   :  { %v939_v38 = vpop.f32.mrf.mxu0  ;;  %v982_v2 = vpop.f32.mrf.mxu1  ;;  %v991_v49 = vadd.f32 %v980_v60, %v896_v9  ;;  %v2642_v9 = vld [vmem:[#allocation7 + $0xc] ss:$16 sps:$4 sm:$0xff]  }
 0x50b   :  { %1954 = vpow2.f32 %v1689_v35  ;;  %v1688_v39 = vmul.f32 -1.442695, %v989_v55  ;;  %v990_v40 = vadd.f32 %v939_v38, %v895_v32  ;;  %v992_v5 = vadd.f32 %v982_v2, %v897_v48 }
 0x50d   :  { %1956 = vpow2.f32 %v1688_v39  ;;  %v1690_v58 = vmul.f32 -1.442695, %v990_v40  ;;  %v1692_v53 = vmul.f32 -1.442695, %v992_v5 }
 0x50f   :  { %1958 = vpow2.f32 %v1690_v58 }
 0x510   :  { %1960 = vtanh.f32 %v987_v34 }
 0x516   :  { %v1953_v7 = vpop.eup %1952 }
 0x517   :  { %v999_v10 = vadd.f32 1.0, %v1953_v7  ;;  %v2634_v7 = vld [vmem:[#allocation7 + $0x2c] ss:$16 sps:$4 sm:$0xff]  }
 0x518   :  { %v1955_v30 = vpop.eup %1954 }
 0x519   :  { %1962 = vrcp.f32 %v999_v10  ;;  %v1011_v54 = vadd.f32 1.0, %v1955_v30  ;;  %v2646_v10 = vld [vmem:[#allocation7 + $0x8] ss:$16 sps:$4 sm:$0xff]   ;;  %v1041_v30 = vld [vmem:[#allocation4 + $0xa0] sm:$0xff] }
 0x51a   :  { %v1957_v56 = vpop.eup %1956  ;;  %1964 = vpow2.f32 %v1691_v8  ;;  %v2638_v8 = vld [vmem:[#allocation7 + $0x28] ss:$16 sps:$4 sm:$0xff]  }
 0x51b   :  { %1966 = vrcp.f32 %v1011_v54  ;;  %v1000_v31 = vadd.f32 1.0, %v1957_v56  ;;  %v1043_v54 = vld [vmem:[#allocation4 + $0xb0] sm:$0xff]  ;;  %v1046_v56 = vunpack.c.h.bf16 %v1041_v30 }
 0x51c   :  { %v1959_v59 = vpop.eup %1958  ;;  %1968 = vpow2.f32 %v1692_v53  ;;  %v1045_v53 = vunpack.c.l.bf16 %v1041_v30 }
 0x51d   :  { %1970 = vrcp.f32 %v1000_v31  ;;  %v1012_v61 = vadd.f32 1.0, %v1959_v59  ;;  %v1961_v57 = vpop.eup %1960 }
 0x51e   :  { %1972 = vtanh.f32 %v991_v49 }
 0x51f   :  { %1974 = vrcp.f32 %v1012_v61  ;;  %v1049_v61 = vunpack.c.l.bf16 %v1043_v54 }
 0x526   :  { %v1963_v62 = vpop.eup %1962 }
 0x527   :  { %v1965_v63 = vpop.eup %1964  ;;  %v1033_v35 = vmul.f32 %v1963_v62, %v1961_v57 }
 0x528   :  { %v1967_v32 = vpop.eup %1966  ;;  %v1025_v38 = vadd.f32 1.0, %v1965_v63 }
 0x529   :  { %v1969_v33 = vpop.eup %1968  ;;  %v1031_v37 = vmul.f32 %v1967_v32, %v2504_v45  ;;  %v1050_v32 = vunpack.c.h.bf16 %v1043_v54 }
 0x52a   :  { %v1971_v55 = vpop.eup %1970  ;;  %v1026_v60 = vadd.f32 1.0, %v1969_v33  ;;  %1976 = vrcp.f32 %v1025_v38 }
 0x52b   :  { %v1973_v39 = vpop.eup %1972  ;;  %v2600_v40 = vadd.f32 %v1033_v35, %v1031_v37 }
 0x52c   :  { %v1975_v41 = vpop.eup %1974  ;;  %v1034_v58 = vmul.f32 %v1973_v39, %v1971_v55  ;;  %v1042_v39 = vld [vmem:[#allocation4 + $0xa8] sm:$0xff] }
 0x52d   :  { %v1032_v44 = vmul.f32 %v1975_v41, %v2507_v3  ;;  %1978 = vtanh.f32 %v2600_v40  ;;  %v2630_v3 = vld [vmem:[#allocation7 + $0x48] ss:$16 sps:$4 sm:$0xff]  }
 0x52e   :  { %1980 = vrcp.f32 %v1026_v60 }
 0x52f   :  { %v2603_v46 = vadd.f32 %v1034_v58, %v1032_v44  ;;  %v1048_v58 = vunpack.c.h.bf16 %v1042_v39  ;;  %v1044_v44 = vld [vmem:[#allocation4 + $0xb8] sm:$0xff] }
 0x531   :  { %1982 = vtanh.f32 %v2603_v46 }
 0x537   :  { %v1977_v47 = vpop.eup %1976 }
 0x53a   :  { %v1979_v45 = vpop.eup %1978 }
 0x53b   :  { %v1981_v48 = vpop.eup %1980  ;;  %v1039_v4 = vmul.f32 %v1979_v45, %v1977_v47  ;;  %v1047_v47 = vunpack.c.l.bf16 %v1042_v39  ;;  %v1052_v45 = vunpack.c.h.bf16 %v1044_v44 }
 0x53e   :  { %v1983_v2 = vpop.eup %1982 }
 0x53f   :  { %v1040_v34 = vmul.f32 %v1983_v2, %v1981_v48 }
 0x541   :  { %v1053_v5 = vpack.c.bf16 %v1040_v34, %v1039_v4 }
 0x543   :  { %1087 = vmatmul.mubr.bf16.vlgmr.msra.gmra.mxu0 %v1053_v5  ;;  %1130 = vmatmul.mubr.bf16.vlgmr.msra.gmra.mxu1 %v1053_v5 }
 0x544   :  { %1210 = vmatpush1.bf16.msra.mxu0 %v2511_v11  ;;  %1253 = vmatpush1.bf16.msra.mxu1 %v2514_v42 }
 0x545   :  { %1211 = vmatprep.subr.bf16.mxu0 %v2517_v12  ;;  %1254 = vmatprep.subr.bf16.mxu1 %v2520_v13 }
 0x546   :  { %1241 = vmatprep.mubr.bf16.mxu0 %v2205_v0  ;;  %1284 = vmatprep.mubr.bf16.mxu1 %v2205_v0 }
 0x548   :  { %1212 = vmatpush1.bf16.msra.mxu0 %v2525_v14  ;;  %1255 = vmatpush1.bf16.msra.mxu1 %v2528_v15 }
 0x549   :  { %1213 = vmatprep.subr.bf16.mxu0 %v2531_v16  ;;  %1256 = vmatprep.subr.bf16.mxu1 %v2534_v17 }
 0x54c   :  { %1214 = vmatpush1.bf16.msra.mxu0 %v2537_v18  ;;  %1257 = vmatpush1.bf16.msra.mxu1 %v2540_v1 }
 0x54d   :  { %1215 = vmatprep.subr.bf16.mxu0 %v2543_v6  ;;  %1258 = vmatprep.subr.bf16.mxu1 %v2546_v19 }
 0x550   :  { %1216 = vmatpush1.bf16.msra.mxu0 %v2549_v20  ;;  %1259 = vmatpush1.bf16.msra.mxu1 %v2552_v21 }
 0x551   :  { %1217 = vmatprep.subr.bf16.mxu0 %v2555_v22  ;;  %1260 = vmatprep.subr.bf16.mxu1 %v2558_v23 }
 0x554   :  { %1218 = vmatpush1.bf16.msra.mxu0 %v2561_v24  ;;  %1261 = vmatpush1.bf16.msra.mxu1 %v2564_v25 }
 0x555   :  { %1219 = vmatprep.subr.bf16.mxu0 %v2567_v26  ;;  %1262 = vmatprep.subr.bf16.mxu1 %v2570_v29 }
 0x558   :  { %1220 = vmatpush1.bf16.msra.mxu0 %v2573_v36  ;;  %1263 = vmatpush1.bf16.msra.mxu1 %v2630_v3 }
 0x559   :  { %1221 = vmatprep.subr.bf16.mxu0 %v2577_v50  ;;  %1264 = vmatprep.subr.bf16.mxu1 %v2634_v7 }
 0x55c   :  { %1222 = vmatpush1.bf16.msra.mxu0 %v2581_v43  ;;  %1265 = vmatpush1.bf16.msra.mxu1 %v2638_v8 }
 0x55d   :  { %1223 = vmatprep.subr.bf16.mxu0 %v2585_v51  ;;  %1266 = vmatprep.subr.bf16.mxu1 %v2642_v9 }
 0x560   :  { %1224 = vmatpush1.bf16.msra.mxu0 %v2589_v52  ;;  %1267 = vmatpush1.bf16.msra.mxu1 %v2646_v10 }
 0x561   :  { %1364 = vmatprep.subr.bf16.mxu0 %v2593_v27  ;;  %1407 = vmatprep.subr.bf16.mxu1 %v2596_v28 }
 0x603   :  { %v1088_v49 = vpop.f32.mrf.mxu0  ;;  %v1131_v59 = vpop.f32.mrf.mxu1 }
 0x604   :  { %v1140_v31 = vadd.f32 %v1088_v49, %v1045_v53  ;;  %v1142_v4 = vadd.f32 %v1131_v59, %v1047_v47  ;;  %v1051_v53 = vunpack.c.l.bf16 %v1044_v44 }
 0x605   :  { %v1090_v57 = vpop.f32.mrf.mxu0  ;;  %v1133_v37 = vpop.f32.mrf.mxu1 }
 0x606   :  { %v1693_v62 = vmul.f32 -1.442695, %v1140_v31  ;;  %v1141_v63 = vadd.f32 %v1090_v57, %v1046_v56  ;;  %v1143_v2 = vadd.f32 %v1133_v37, %v1048_v58 }
 0x607   :  { %v1092_v33 = vpop.f32.mrf.mxu0  ;;  %v1135_v41 = vpop.f32.mrf.mxu1 }
 0x608   :  { %1984 = vpow2.f32 %v1693_v62  ;;  %v1695_v35 = vmul.f32 -1.442695, %v1141_v63  ;;  %v1144_v55 = vadd.f32 %v1092_v33, %v1049_v61  ;;  %v1697_v30 = vmul.f32 -1.442695, %v1143_v2 }
 0x609   :  { %v1094_v27 = vpop.f32.mrf.mxu0  ;;  %v1137_v48 = vpop.f32.mrf.mxu1  ;;  %v1146_v57 = vadd.f32 %v1135_v41, %v1051_v53 }
 0x60a   :  { %1986 = vpow2.f32 %v1695_v35  ;;  %v1694_v28 = vmul.f32 -1.442695, %v1144_v55  ;;  %v1145_v38 = vadd.f32 %v1094_v27, %v1050_v32  ;;  %v1147_v34 = vadd.f32 %v1137_v48, %v1052_v45 }
 0x60c   :  { %1988 = vpow2.f32 %v1694_v28  ;;  %v1696_v60 = vmul.f32 -1.442695, %v1145_v38  ;;  %v1698_v49 = vmul.f32 -1.442695, %v1147_v34 }
 0x60e   :  { %1990 = vpow2.f32 %v1696_v60 }
 0x60f   :  { %1992 = vtanh.f32 %v1142_v4 }
 0x615   :  { %v1985_v5 = vpop.eup %1984 }
 0x616   :  { %v1154_v54 = vadd.f32 1.0, %v1985_v5 }
 0x617   :  { %v1987_v56 = vpop.eup %1986 }
 0x618   :  { %1994 = vrcp.f32 %v1154_v54  ;;  %v1166_v31 = vadd.f32 1.0, %v1987_v56 }
 0x619   :  { %v1989_v61 = vpop.eup %1988  ;;  %1996 = vpow2.f32 %v1697_v30 }
 0x61a   :  { %1998 = vrcp.f32 %v1166_v31  ;;  %v1155_v62 = vadd.f32 1.0, %v1989_v61 }
 0x61b   :  { %v1991_v63 = vpop.eup %1990  ;;  %2000 = vpow2.f32 %v1698_v49 }
 0x61c   :  { %2002 = vrcp.f32 %v1155_v62  ;;  %v1167_v32 = vadd.f32 1.0, %v1991_v63  ;;  %v1993_v59 = vpop.eup %1992 }
 0x61d   :  { %2004 = vtanh.f32 %v1146_v57 }
 0x61e   :  { %2006 = vrcp.f32 %v1167_v32 }
 0x625   :  { %v1995_v33 = vpop.eup %1994 }
 0x626   :  { %v1997_v35 = vpop.eup %1996  ;;  %v1188_v27 = vmul.f32 %v1995_v33, %v1993_v59 }
 0x627   :  { %v1999_v37 = vpop.eup %1998  ;;  %v1180_v39 = vadd.f32 1.0, %v1997_v35 }
 0x628   :  { %v2001_v55 = vpop.eup %2000  ;;  %v1186_v28 = vmul.f32 %v1999_v37, %v2600_v40 }
 0x629   :  { %v2003_v38 = vpop.eup %2002  ;;  %v1181_v44 = vadd.f32 1.0, %v2001_v55  ;;  %2008 = vrcp.f32 %v1180_v39 }
 0x62a   :  { %v2005_v60 = vpop.eup %2004  ;;  %v2652_v41 = vadd.f32 %v1188_v27, %v1186_v28 }
 0x62b   :  { %v2007_v58 = vpop.eup %2006  ;;  %v1189_v47 = vmul.f32 %v2005_v60, %v2003_v38 }
 0x62c   :  { %v1187_v45 = vmul.f32 %v2007_v58, %v2603_v46  ;;  %2010 = vtanh.f32 %v2652_v41 }
 0x62d   :  { %2012 = vrcp.f32 %v1181_v44 }
 0x62e   :  { %v2655_v48 = vadd.f32 %v1189_v47, %v1187_v45 }
 0x630   :  { %2014 = vtanh.f32 %v2655_v48 }
 0x636   :  { %v2009_v2 = vpop.eup %2008 }
 0x639   :  { %v2011_v40 = vpop.eup %2010 }
 0x63a   :  { %v2013_v4 = vpop.eup %2012  ;;  %v1194_v5 = vmul.f32 %v2011_v40, %v2009_v2 }
 0x63d   :  { %v2015_v34 = vpop.eup %2014 }
 0x63e   :  { %v1195_v30 = vmul.f32 %v2015_v34, %v2013_v4 }
 0x640   :  { %v1208_v53 = vpack.c.bf16 %v1195_v30, %v1194_v5 }
 0x642   :  { %1242 = vmatmul.mubr.bf16.vlgmr.msra.gmra.mxu0 %v1208_v53  ;;  %1285 = vmatmul.mubr.bf16.vlgmr.msra.gmra.mxu1 %v1208_v53 }
 0x643   :  { %1365 = vmatpush1.bf16.msra.mxu0 %v2511_v11  ;;  %1408 = vmatpush1.bf16.msra.mxu1 %v2514_v42  ;;  %v1198_v42 = vld [vmem:[#allocation4 + $0xd0] sm:$0xff] }
 0x644   :  { %1366 = vmatprep.subr.bf16.mxu0 %v2517_v12  ;;  %1409 = vmatprep.subr.bf16.mxu1 %v2520_v13 }
 0x645   :  { %1396 = vmatprep.mubr.bf16.mxu0 %v2205_v0  ;;  %1439 = vmatprep.mubr.bf16.mxu1 %v2205_v0  ;;  %v1196_v0 = vld [vmem:[#allocation4 + $0xc0] sm:$0xff] }
 0x646   :  { %v1200_v11 = vunpack.c.l.bf16 %v1196_v0  ;;  %v1201_v12 = vunpack.c.h.bf16 %v1196_v0 }
 0x647   :  { %1367 = vmatpush1.bf16.msra.mxu0 %v2525_v14  ;;  %1410 = vmatpush1.bf16.msra.mxu1 %v2528_v15 }
 0x648   :  { %1368 = vmatprep.subr.bf16.mxu0 %v2531_v16  ;;  %1411 = vmatprep.subr.bf16.mxu1 %v2534_v17  ;;  %v1204_v16 = vunpack.c.l.bf16 %v1198_v42 }
 0x64b   :  { %1369 = vmatpush1.bf16.msra.mxu0 %v2537_v18  ;;  %1412 = vmatpush1.bf16.msra.mxu1 %v2540_v1 }
 0x64c   :  { %1370 = vmatprep.subr.bf16.mxu0 %v2543_v6  ;;  %1413 = vmatprep.subr.bf16.mxu1 %v2546_v19  ;;  %v1205_v6 = vunpack.c.h.bf16 %v1198_v42  ;;  %v1528_v42 = vld [vmem:[#allocation9 + $0x78] sm:$0xff] }
 0x64f   :  { %1371 = vmatpush1.bf16.msra.mxu0 %v2549_v20  ;;  %1414 = vmatpush1.bf16.msra.mxu1 %v2552_v21 }
 0x650   :  { %1372 = vmatprep.subr.bf16.mxu0 %v2555_v22  ;;  %1415 = vmatprep.subr.bf16.mxu1 %v2558_v23 }
 0x653   :  { %1373 = vmatpush1.bf16.msra.mxu0 %v2561_v24  ;;  %1416 = vmatpush1.bf16.msra.mxu1 %v2564_v25 }
 0x654   :  { %1374 = vmatprep.subr.bf16.mxu0 %v2567_v26  ;;  %1417 = vmatprep.subr.bf16.mxu1 %v2570_v29  ;;  %v1197_v26 = vld [vmem:[#allocation4 + $0xc8] sm:$0xff] }
 0x657   :  { %1375 = vmatpush1.bf16.msra.mxu0 %v2573_v36  ;;  %1418 = vmatpush1.bf16.msra.mxu1 %v2630_v3 }
 0x658   :  { %1376 = vmatprep.subr.bf16.mxu0 %v2577_v50  ;;  %1419 = vmatprep.subr.bf16.mxu1 %v2634_v7  ;;  %v1203_v50 = vunpack.c.h.bf16 %v1197_v26 }
 0x65b   :  { %1377 = vmatpush1.bf16.msra.mxu0 %v2581_v43  ;;  %1420 = vmatpush1.bf16.msra.mxu1 %v2638_v8  ;;  %v1199_v43 = vld [vmem:[#allocation4 + $0xd8] sm:$0xff] }
 0x65c   :  { %1378 = vmatprep.subr.bf16.mxu0 %v2585_v51  ;;  %1421 = vmatprep.subr.bf16.mxu1 %v2642_v9  ;;  %v1202_v51 = vunpack.c.l.bf16 %v1197_v26  ;;  %v1206_v54 = vunpack.c.l.bf16 %v1199_v43  ;;  %v1353_v26 = vld [vmem:[#allocation4 + $0xf0] sm:$0xff] }
 0x65f   :  { %1379 = vmatpush1.bf16.msra.mxu0 %v2589_v52  ;;  %1422 = vmatpush1.bf16.msra.mxu1 %v2646_v10  ;;  %v1207_v52 = vunpack.c.h.bf16 %v1199_v43 }
 0x660   :  { %1730 = vmatprep.subr.mxu0 %v1528_v42 }
 0x702   :  { %v1243_v13 = vpop.f32.mrf.mxu0  ;;  %v1286_v15 = vpop.f32.mrf.mxu1 }
 0x703   :  { %v1295_v14 = vadd.f32 %v1243_v13, %v1200_v11  ;;  %v1297_v7 = vadd.f32 %v1286_v15, %v1202_v51  ;;  %v1525_v13 = vld [vmem:[#allocation9 + $0x60] sm:$0xff]  ;;  %v1523_v15 = vld [vmem:[#allocation9 + $0x50] sm:$0xff]  ;;  %v1359_v51 = vunpack.c.l.bf16 %v1353_v26 }
 0x704   :  { %v1245_v17 = vpop.f32.mrf.mxu0  ;;  %v1288_v21 = vpop.f32.mrf.mxu1 }
 0x705   :  { %v1699_v18 = vmul.f32 -1.442695, %v1295_v14  ;;  %v1296_v1 = vadd.f32 %v1245_v17, %v1201_v12  ;;  %v1298_v3 = vadd.f32 %v1288_v21, %v1203_v50  ;;  %v1526_v12 = vld [vmem:[#allocation9 + $0x68] sm:$0xff]  ;;  %v1524_v14 = vld [vmem:[#allocation9 + $0x58] sm:$0xff]  ;;  %v1521_v17 = vld [vmem:[#allocation9 + $0x40] sm:$0xff] }
 0x706   :  { %v1247_v19 = vpop.f32.mrf.mxu0  ;;  %v1290_v29 = vpop.f32.mrf.mxu1  ;;  %v1515_v21 = vld [vmem:[#allocation9 + $0x10] sm:$0xff] }
 0x707   :  { %2016 = vpow2.f32 %v1699_v18  ;;  %v1701_v20 = vmul.f32 -1.442695, %v1296_v1  ;;  %v1299_v22 = vadd.f32 %v1247_v19, %v1204_v16  ;;  %v1703_v10 = vmul.f32 -1.442695, %v1298_v3  ;;  %v1522_v16 = vld [vmem:[#allocation9 + $0x48] sm:$0xff]  ;;  %v1520_v18 = vld [vmem:[#allocation9 + $0x38] sm:$0xff] }
 0x708   :  { %v1249_v23 = vpop.f32.mrf.mxu0  ;;  %v1292_v46 = vpop.f32.mrf.mxu1  ;;  %v1301_v62 = vadd.f32 %v1290_v29, %v1206_v54  ;;  %v1519_v1 = vld [vmem:[#allocation9 + $0x30] sm:$0xff]  ;;  %v1517_v19 = vld [vmem:[#allocation9 + $0x20] sm:$0xff] }
 0x709   :  { %2018 = vpow2.f32 %v1701_v20  ;;  %v1700_v24 = vmul.f32 -1.442695, %v1299_v22  ;;  %v1300_v25 = vadd.f32 %v1249_v23, %v1205_v6  ;;  %v1302_v8 = vadd.f32 %v1292_v46, %v1207_v52  ;;  %v1518_v6 = vld [vmem:[#allocation9 + $0x28] sm:$0xff]  ;;  %v1516_v20 = vld [vmem:[#allocation9 + $0x18] sm:$0xff]  ;;  %v1513_v23 = vld [vmem:[#allocation9] sm:$0xff] }
 0x70a   :  { %v1514_v22 = vld [vmem:[#allocation9 + $0x8] sm:$0xff] }
 0x70b   :  { %2020 = vpow2.f32 %v1700_v24  ;;  %v1702_v36 = vmul.f32 -1.442695, %v1300_v25  ;;  %v1704_v31 = vmul.f32 -1.442695, %v1302_v8  ;;  %v1351_v24 = vld [vmem:[#allocation4 + $0xe0] sm:$0xff] }
 0x70c   :  { %v1355_v25 = vunpack.c.l.bf16 %v1351_v24  ;;  %v1356_v29 = vunpack.c.h.bf16 %v1351_v24 }
 0x70d   :  { %2022 = vpow2.f32 %v1702_v36 }
 0x70e   :  { %2024 = vtanh.f32 %v1297_v7  ;;  %v1360_v7 = vunpack.c.h.bf16 %v1353_v26 }
 0x714   :  { %v2017_v9 = vpop.eup %2016 }
 0x715   :  { %v1309_v56 = vadd.f32 1.0, %v2017_v9 }
 0x716   :  { %v2019_v49 = vpop.eup %2018 }
 0x717   :  { %2026 = vrcp.f32 %v1309_v56  ;;  %v1321_v61 = vadd.f32 1.0, %v2019_v49  ;;  %v1352_v49 = vld [vmem:[#allocation4 + $0xe8] sm:$0xff] }
 0x718   :  { %v2021_v57 = vpop.eup %2020  ;;  %2028 = vpow2.f32 %v1703_v10 }
 0x719   :  { %2030 = vrcp.f32 %v1321_v61  ;;  %v1310_v63 = vadd.f32 1.0, %v2021_v57  ;;  %v1358_v57 = vunpack.c.h.bf16 %v1352_v49 }
 0x71a   :  { %v2023_v32 = vpop.eup %2022  ;;  %2032 = vpow2.f32 %v1704_v31 }
 0x71b   :  { %2034 = vrcp.f32 %v1310_v63  ;;  %v1322_v59 = vadd.f32 1.0, %v2023_v32  ;;  %v2025_v33 = vpop.eup %2024  ;;  %v1354_v32 = vld [vmem:[#allocation4 + $0xf8] sm:$0xff] }
 0x71c   :  { %2036 = vtanh.f32 %v1301_v62 }
 0x71d   :  { %2038 = vrcp.f32 %v1322_v59 }
 0x724   :  { %v2027_v35 = vpop.eup %2026 }
 0x725   :  { %v2029_v37 = vpop.eup %2028  ;;  %v1343_v28 = vmul.f32 %v2027_v35, %v2025_v33  ;;  %v1362_v33 = vunpack.c.h.bf16 %v1354_v32 }
 0x726   :  { %v2031_v55 = vpop.eup %2030  ;;  %v1335_v60 = vadd.f32 1.0, %v2029_v37  ;;  %v1357_v37 = vunpack.c.l.bf16 %v1352_v49 }
 0x727   :  { %v2033_v27 = vpop.eup %2032  ;;  %v1341_v38 = vmul.f32 %v2031_v55, %v2652_v41 }
 0x728   :  { %v2035_v39 = vpop.eup %2034  ;;  %v1336_v45 = vadd.f32 1.0, %v2033_v27  ;;  %2040 = vrcp.f32 %v1335_v60 }
 0x729   :  { %v2037_v58 = vpop.eup %2036  ;;  %v2692_v44 = vadd.f32 %v1343_v28, %v1341_v38 }
 0x72a   :  { %v2039_v47 = vpop.eup %2038  ;;  %v1344_v2 = vmul.f32 %v2037_v58, %v2035_v39  ;;  %v1361_v39 = vunpack.c.l.bf16 %v1354_v32 }
 0x72b   :  { %v1342_v40 = vmul.f32 %v2039_v47, %v2655_v48  ;;  %2042 = vtanh.f32 %v2692_v44  ;;  %v1527_v48 = vld [vmem:[#allocation9 + $0x70] sm:$0xff] }
 0x72c   :  { %2044 = vrcp.f32 %v1336_v45 }
 0x72d   :  { %v2695_v4 = vadd.f32 %v1344_v2, %v1342_v40 }
 0x72f   :  { %2046 = vtanh.f32 %v2695_v4 }
 0x735   :  { %v2041_v34 = vpop.eup %2040 }
 0x738   :  { %v2043_v41 = vpop.eup %2042 }
 0x739   :  { %v2045_v5 = vpop.eup %2044  ;;  %v1349_v53 = vmul.f32 %v2043_v41, %v2041_v34 }
 0x73c   :  { %v2047_v30 = vpop.eup %2046 }
 0x73d   :  { %v1350_v0 = vmul.f32 %v2047_v30, %v2045_v5 }
 0x73f   :  { %v1363_v11 = vpack.c.bf16 %v1350_v0, %v1349_v53 }
 0x741   :  { %1397 = vmatmul.mubr.bf16.vlgmr.msra.gmra.mxu0 %v1363_v11  ;;  %1440 = vmatmul.mubr.bf16.vlgmr.msra.gmra.mxu1 %v1363_v11 }
 0x742   :  { %1731 = vmatpush3.msra.mxu0 %v1528_v42 }
 0x743   :  { %1732 = vmatprep.subr.mxu0 %v1527_v48 }
 0x744   :  { %1733 = vmatpush3.msra.mxu0 %v1527_v48 }
 0x745   :  { %1734 = vmatprep.subr.mxu0 %v1526_v12 }
 0x746   :  { %1735 = vmatpush3.msra.mxu0 %v1526_v12 }
 0x747   :  { %1736 = vmatprep.subr.mxu0 %v1525_v13 }
 0x748   :  { %1737 = vmatpush3.msra.mxu0 %v1525_v13 }
 0x749   :  { %1738 = vmatprep.subr.mxu0 %v1524_v14 }
 0x74a   :  { %1739 = vmatpush3.msra.mxu0 %v1524_v14 }
 0x74b   :  { %1740 = vmatprep.subr.mxu0 %v1523_v15 }
 0x74c   :  { %1741 = vmatpush3.msra.mxu0 %v1523_v15 }
 0x74d   :  { %1742 = vmatprep.subr.mxu0 %v1522_v16 }
 0x74e   :  { %1743 = vmatpush3.msra.mxu0 %v1522_v16 }
 0x74f   :  { %1744 = vmatprep.subr.mxu0 %v1521_v17 }
 0x750   :  { %1745 = vmatpush3.msra.mxu0 %v1521_v17 }
 0x751   :  { %1746 = vmatprep.subr.mxu0 %v1520_v18 }
 0x752   :  { %1747 = vmatpush3.msra.mxu0 %v1520_v18 }
 0x753   :  { %1748 = vmatprep.subr.mxu0 %v1519_v1 }
 0x754   :  { %1749 = vmatpush3.msra.mxu0 %v1519_v1 }
 0x755   :  { %1750 = vmatprep.subr.mxu0 %v1518_v6 }
 0x756   :  { %1751 = vmatpush3.msra.mxu0 %v1518_v6 }
 0x757   :  { %1752 = vmatprep.subr.mxu0 %v1517_v19 }
 0x758   :  { %1753 = vmatpush3.msra.mxu0 %v1517_v19 }
 0x759   :  { %1754 = vmatprep.subr.mxu0 %v1516_v20 }
 0x75a   :  { %1755 = vmatpush3.msra.mxu0 %v1516_v20 }
 0x75b   :  { %1756 = vmatprep.subr.mxu0 %v1515_v21 }
 0x75c   :  { %1757 = vmatpush3.msra.mxu0 %v1515_v21 }
 0x75d   :  { %1758 = vmatprep.subr.mxu0 %v1514_v22 }
 0x75e   :  { %1759 = vmatpush3.msra.mxu0 %v1514_v22 }
 0x75f   :  { %1760 = vmatprep.subr.mxu0 %v1513_v23 }
 0x760   :  { %1761 = vmatpush3.msra.mxu0 %v1513_v23 }
 0x801   :  { %v1398_v36 = vpop.f32.mrf.mxu0  ;;  %v1441_v43 = vpop.f32.mrf.mxu1 }
 0x802   :  { %v1450_v50 = vadd.f32 %v1398_v36, %v1355_v25  ;;  %v1452_v38 = vadd.f32 %v1441_v43, %v1357_v37  ;;  %v1711_v25 = vld [vmem:[%s2713_s3] ss:$0 sm:$0xff] }
 0x803   :  { %v1400_v52 = vpop.f32.mrf.mxu0  ;;  %v1443_v10 = vpop.f32.mrf.mxu1 }
 0x804   :  { %v1705_v46 = vmul.f32 -1.442695, %v1450_v50  ;;  %v1451_v3 = vadd.f32 %v1400_v52, %v1356_v29  ;;  %v1453_v59 = vadd.f32 %v1443_v10, %v1358_v57 }
 0x805   :  { %v1402_v8 = vpop.f32.mrf.mxu0  ;;  %v1445_v62 = vpop.f32.mrf.mxu1 }
 0x806   :  { %2048 = vpow2.f32 %v1705_v46  ;;  %v1707_v9 = vmul.f32 -1.442695, %v1451_v3  ;;  %v1454_v54 = vadd.f32 %v1402_v8, %v1359_v51  ;;  %v1709_v55 = vmul.f32 -1.442695, %v1453_v59 }
 0x807   :  { %v1404_v56 = vpop.f32.mrf.mxu0  ;;  %v1447_v35 = vpop.f32.mrf.mxu1  ;;  %v1456_v40 = vadd.f32 %v1445_v62, %v1361_v39 }
 0x808   :  { %2050 = vpow2.f32 %v1707_v9  ;;  %v1706_v31 = vmul.f32 -1.442695, %v1454_v54  ;;  %v1455_v61 = vadd.f32 %v1404_v56, %v1360_v7  ;;  %v1457_v27 = vadd.f32 %v1447_v35, %v1362_v33 }
 0x80a   :  { %2052 = vpow2.f32 %v1706_v31  ;;  %v1708_v63 = vmul.f32 -1.442695, %v1455_v61  ;;  %v1710_v47 = vmul.f32 -1.442695, %v1457_v27 }
 0x80c   :  { %2054 = vpow2.f32 %v1708_v63 }
 0x80d   :  { %2056 = vpow2.f32 %v1709_v55 }
 0x813   :  { %v2049_v28 = vpop.eup %2048 }
 0x814   :  { %v1464_v60 = vadd.f32 1.0, %v2049_v28 }
 0x815   :  { %v2051_v58 = vpop.eup %2050 }
 0x816   :  { %2058 = vrcp.f32 %v1464_v60  ;;  %v1476_v45 = vadd.f32 1.0, %v2051_v58 }
 0x817   :  { %v2053_v2 = vpop.eup %2052  ;;  %2060 = vtanh.f32 %v1452_v38 }
 0x818   :  { %2062 = vrcp.f32 %v1476_v45  ;;  %v1465_v34 = vadd.f32 1.0, %v2053_v2 }
 0x819   :  { %v2055_v41 = vpop.eup %2054  ;;  %2064 = vpow2.f32 %v1710_v47 }
 0x81a   :  { %2066 = vrcp.f32 %v1465_v34  ;;  %v1477_v5 = vadd.f32 1.0, %v2055_v41  ;;  %v2057_v30 = vpop.eup %2056 }
 0x81b   :  { %2068 = vtanh.f32 %v1456_v40  ;;  %v1490_v42 = vadd.f32 1.0, %v2057_v30 }
 0x81c   :  { %2070 = vrcp.f32 %v1477_v5 }
 0x81d   :  { %2072 = vrcp.f32 %v1490_v42 }
 0x823   :  { %v2059_v53 = vpop.eup %2058 }
 0x824   :  { %v2061_v0 = vpop.eup %2060 }
 0x825   :  { %v2063_v11 = vpop.eup %2062  ;;  %v1498_v12 = vmul.f32 %v2061_v0, %v2059_v53 }
 0x826   :  { %v2065_v48 = vpop.eup %2064  ;;  %v1496_v13 = vmul.f32 %v2063_v11, %v2692_v44 }
 0x827   :  { %v2067_v14 = vpop.eup %2066  ;;  %v1491_v18 = vadd.f32 1.0, %v2065_v48 }
 0x828   :  { %v2069_v15 = vpop.eup %2068  ;;  %v1500_v16 = vadd.f32 %v1498_v12, %v1496_v13 }
 0x829   :  { %v2071_v17 = vpop.eup %2070  ;;  %v1499_v1 = vmul.f32 %v2069_v15, %v2067_v14 }
 0x82a   :  { %v1497_v6 = vmul.f32 %v2071_v17, %v2695_v4  ;;  %2074 = vtanh.f32 %v1500_v16  ;;  %v2073_v20 = vpop.eup %2072 }
 0x82b   :  { %2076 = vrcp.f32 %v1491_v18 }
 0x82c   :  { %v1501_v19 = vadd.f32 %v1499_v1, %v1497_v6 }
 0x82e   :  { %2078 = vtanh.f32 %v1501_v19 }
 0x837   :  { %v2075_v21 = vpop.eup %2074 }
 0x838   :  { %v1504_v22 = vmul.f32 %v2075_v21, %v2073_v20  ;;  %v2077_v23 = vpop.eup %2076 }
 0x83a   :  { %1762 = vmatprep.mubr.f32.mxu0 %v1504_v22 }
 0x83b   :  { %v2079_v24 = vpop.eup %2078 }
 0x83c   :  { %v1505_v44 = vmul.f32 %v2079_v24, %v2077_v23 }
 0x83e   :  { %1763 = vmatmul.mubr.f32.vlgmr.msra.gmra.mxu0 %v1505_v44 }
 0x8fe   :  { %v1764_v26 = vpop.f32.mrf.mxu0 }
 0x8ff   :  { %v1608_v4 = vadd.f32 %v1764_v26, %v1711_v25 }
 0x900   :  { %v1602_v29 = vpop.f32.mrf.mxu0 }
 0x901   :  { %v1603_v36 = vadd.f32 %v1711_v25, %v1602_v29  ;;  %1612 = vst [vmem:[#allocation10 + $0x8] sm:$0xff] %v1608_v4 }
 0x903   :  { %1611 = vst [vmem:[#allocation10] sm:$0xff] %v1603_v36 }
 0x904   :  { %2183 = shalt.err (!%p2180_p5)
}
 0x905   :  { %1624 = dma.vmem_to_hbm [thread:$0]  %s1619_s8, 256, %s2714_s4, [#allocation6], %s2203_s1, %s2203_s1, %s2204_s30  }
 0x906   :  { %2196 = dma.done.wait [#allocation6], 256  }
 0x907   :  { %2197 = vsyncadd [#allocation6], 4294967040 }
 0x908   :  { %1628 = vsyncpa [#allocation5], 1 }
 0x909   :  { %1629 = vsyncpa [#allocation8], 1 }
 0x90a   :  { %1630 = vsyncpa [#allocation6], 1 }

// kernel: tpu_custom_call.1
= control target key start
LH: loop header
LB: loop body
LE: loop exit
PB: predicated region body
PF: predicated region fallthrough
CT: control target
= control target key end

     0   :  { %9 = vsyncpa [#allocation5], 0  ;;  %s2710_s0 = inlined_call_operand.hbm [shape: bf16[128,512], index: 0, kind: input, shape index: {}]   ;;  %s2711_s1 = inlined_call_operand.hbm [shape: bf16[128,512], index: 1, kind: input, shape index: {}]   ;;  %s2712_s2 = inlined_call_operand.hbm [shape: f32[128,128], index: 2, kind: input, shape index: {}]   ;;  %s2713_s3 = inlined_call_operand.vmem [shape: f32[1,128], index: 3, kind: input, shape index: {}]   ;;  %s2714_s4 = inlined_call_operand.hbm [shape: f32[16,128], index: 4, kind: output, shape index: {}]  }
   0x1   :  { %10 = vsyncpa [#allocation8], 0 }
   0x2   :  { %11 = vsyncpa [#allocation6], 0  ;;  %s2198_s15 = smov [#allocation7]   ;;  %s2199_s17 = smov [#allocation4]  }
   0x3   :  { %s29_s16 = sshll.u32 %s2198_s15, 4  ;;  %s17_s18 = sshll.u32 %s2199_s17, 4  ;;  %s30_s16 = int_to_ptr.vmem [resolvable:$true] %s29_s16  ;;  %s18_s18 = int_to_ptr.vmem [resolvable:$true] %s17_s18 }
   0x4   :  { %s2120_s19 = scalar_lea.vmem %s30_s16, 4096  ;;  %p2125_p1 = scmp.lt.s32.totalorder %s30_s16, %s30_s16 }
   0x5   :  { %p2121_p0 = scmp.ne.s32.totalorder %s30_s16, %s2120_s19  ;;  %p2126_p2 = scmp.lt.s32.totalorder %s2120_s19, %s2120_s19 }
   0x7   :  { %p2127_p3 = por %p2126_p2, %p2125_p1 }
   0x9   :  { %p2128_p4 = pnand %p2127_p3, %p2121_p0 }
   0xb   :  { %2131 = shalt.err (!%p2128_p4)
}
   0xc   :  { %s2200_s20 = smov 256   ;;  %s2201_s21 = smov 16  }
   0xd   :  { %35 = dma.hbm_to_vmem [thread:$0]  %s2711_s1, 4096, %s30_s16, [#allocation8], %s2200_s20, %s2200_s20, %s2201_s21  }
   0xe   :  { %s2140_s24 = scalar_lea.vmem %s18_s18, 4096  ;;  %p2145_p6 = scmp.lt.s32.totalorder %s18_s18, %s18_s18 }
   0xf   :  { %p2141_p5 = scmp.ne.s32.totalorder %s18_s18, %s2140_s24  ;;  %p2146_p7 = scmp.lt.s32.totalorder %s2140_s24, %s2140_s24 }
  0x11   :  { %p2147_p8 = por %p2146_p7, %p2145_p6 }
  0x13   :  { %p2148_p9 = pnand %p2147_p8, %p2141_p5 }
  0x15   :  { %2151 = shalt.err (!%p2148_p9)
}
  0x16   :  { %23 = dma.hbm_to_vmem [thread:$0]  %s2710_s0, 4096, %s18_s18, [#allocation5], %s2200_s20, %s2200_s20, %s2201_s21  }
  0x17   :  { %s2202_s27 = smov [#allocation9]  }
  0x18   :  { %s41_s28 = sshll.u32 %s2202_s27, 4  ;;  %s42_s28 = int_to_ptr.vmem [resolvable:$true] %s41_s28 }
  0x19   :  { %s2160_s29 = scalar_lea.vmem %s42_s28, 2048  ;;  %p2165_p11 = scmp.lt.s32.totalorder %s42_s28, %s42_s28 }
  0x1a   :  { %p2161_p10 = scmp.ne.s32.totalorder %s42_s28, %s2160_s29  ;;  %p2166_p12 = scmp.lt.s32.totalorder %s2160_s29, %s2160_s29 }
  0x1c   :  { %p2167_p13 = por %p2166_p12, %p2165_p11 }
  0x1e   :  { %p2168_p0 = pnand %p2167_p13, %p2161_p10 }
  0x20   :  { %2171 = shalt.err (!%p2168_p0)
}
  0x21   :  { %s2203_s1 = smov 128   ;;  %s2204_s30 = smov 8  }
  0x22   :  { %47 = dma.hbm_to_vmem [thread:$0]  %s2712_s2, 2048, %s42_s28, [#allocation8], %s2203_s1, %s2203_s1, %s2204_s30  }
  0x23   :  { %2192 = dma.done.wait [#allocation5], 4096  }
  0x24   :  { %2193 = vsyncadd [#allocation5], 4294963200 }
  0x25   :  { %2194 = dma.done.wait [#allocation8], 6144  }
  0x26   :  { %2195 = vsyncadd [#allocation8], 4294961152  ;;  %v2205_v0 = vmov 0   ;;  %v2247_v1 = vld [vmem:[#allocation7 + $0xe4] ss:$16 sps:$4 sm:$0xff]   ;;  %v2206_v33 = vmov 0.0|0.0  }
  0x27   :  { %311 = vmatprep.mubr.bf16.mxu0 %v2205_v0  ;;  %354 = vmatprep.mubr.bf16.mxu1 %v2205_v0  ;;  %v2249_v2 = vld [vmem:[#allocation7 + $0xe0] ss:$16 sps:$4 sm:$0xff]   ;;  %v2252_v3 = vld [vmem:[#allocation7 + $0xc4] ss:$16 sps:$4 sm:$0xff]   ;;  %v2260_v6 = vld [vmem:[#allocation7 + $0xec] ss:$16 sps:$4 sm:$0xff]  }
  0x28   :  { %279 = vmatprep.subr.bf16.mxu0 %v2247_v1  ;;  %v2255_v4 = vld [vmem:[#allocation7 + $0xc0] ss:$16 sps:$4 sm:$0xff]   ;;  %v2258_v5 = vld [vmem:[#allocation7 + $0xa4] ss:$16 sps:$4 sm:$0xff]   ;;  %v2262_v7 = vld [vmem:[#allocation7 + $0xe8] ss:$16 sps:$4 sm:$0xff]   ;;  %322 = vmatprep.subr.bf16.mxu1 %v2260_v6 }
  0x29   :  { %280 = vmatpush1.bf16.msra.mxu0 %v2249_v2  ;;  %v2265_v8 = vld [vmem:[#allocation7 + $0xa0] ss:$16 sps:$4 sm:$0xff]   ;;  %v2269_v9 = vld [vmem:[#allocation7 + $0x84] ss:$16 sps:$4 sm:$0xff]   ;;  %323 = vmatpush1.bf16.msra.mxu1 %v2262_v7  ;;  %v2272_v10 = vld [vmem:[#allocation7 + $0xcc] ss:$16 sps:$4 sm:$0xff]  }
  0x2a   :  { %281 = vmatprep.subr.bf16.mxu0 %v2252_v3  ;;  %v2274_v11 = vld [vmem:[#allocation7 + $0xc8] ss:$16 sps:$4 sm:$0xff]   ;;  %324 = vmatprep.subr.bf16.mxu1 %v2272_v10  ;;  %v2278_v12 = vld [vmem:[#allocation7 + $0x80] ss:$16 sps:$4 sm:$0xff]   ;;  %v2280_v13 = vld [vmem:[#allocation7 + $0x64] ss:$16 sps:$4 sm:$0xff]  }
  0x2b   :  { %v2282_v14 = vld [vmem:[#allocation7 + $0xac] ss:$16 sps:$4 sm:$0xff]   ;;  %v2286_v15 = vld [vmem:[#allocation7 + $0xa8] ss:$16 sps:$4 sm:$0xff]   ;;  %v2292_v17 = vld [vmem:[#allocation7 + $0x60] ss:$16 sps:$4 sm:$0xff]  }
  0x2c   :  { %v2289_v16 = vld [vmem:[#allocation7 + $0x8c] ss:$16 sps:$4 sm:$0xff]   ;;  %v2295_v18 = vld [vmem:[#allocation7 + $0x44] ss:$16 sps:$4 sm:$0xff]   ;;  %v2298_v19 = vld [vmem:[#allocation7 + $0x88] ss:$16 sps:$4 sm:$0xff]  }
  0x2d   :  { %282 = vmatpush1.bf16.msra.mxu0 %v2255_v4  ;;  %325 = vmatpush1.bf16.msra.mxu1 %v2274_v11  ;;  %v2301_v20 = vld [vmem:[#allocation7 + $0x6c] ss:$16 sps:$4 sm:$0xff]   ;;  %v2304_v21 = vld [vmem:[#allocation7 + $0x40] ss:$16 sps:$4 sm:$0xff]   ;;  %v2306_v22 = vld [vmem:[#allocation7 + $0x24] ss:$16 sps:$4 sm:$0xff]  }
  0x2e   :  { %283 = vmatprep.subr.bf16.mxu0 %v2258_v5  ;;  %326 = vmatprep.subr.bf16.mxu1 %v2282_v14  ;;  %v2310_v23 = vld [vmem:[#allocation7 + $0x68] ss:$16 sps:$4 sm:$0xff]   ;;  %v2313_v24 = vld [vmem:[#allocation7 + $0x4c] ss:$16 sps:$4 sm:$0xff]   ;;  %v2316_v25 = vld [vmem:[#allocation7 + $0x20] ss:$16 sps:$4 sm:$0xff]  }
  0x2f   :  { %v2319_v26 = vld [vmem:[#allocation7 + $0x4] ss:$16 sps:$4 sm:$0xff]   ;;  %v2322_v27 = vld [vmem:[#allocation7 + $0x48] ss:$16 sps:$4 sm:$0xff]   ;;  %v2325_v28 = vld [vmem:[#allocation7 + $0x2c] ss:$16 sps:$4 sm:$0xff]  }
  0x30   :  { %v2328_v29 = vld [vmem:[#allocation7] ss:$16 sps:$4 sm:$0xff]   ;;  %v2332_v30 = vld [vmem:[#allocation7 + $0x28] ss:$16 sps:$4 sm:$0xff]   ;;  %v2335_v31 = vld [vmem:[#allocation7 + $0xc] ss:$16 sps:$4 sm:$0xff]  }
  0x31   :  { %284 = vmatpush1.bf16.msra.mxu0 %v2265_v8  ;;  %327 = vmatpush1.bf16.msra.mxu1 %v2286_v15  ;;  %v2339_v32 = vld [vmem:[#allocation7 + $0x8] ss:$16 sps:$4 sm:$0xff]   ;;  %v74_v34 = vld [vmem:[#allocation4] sm:$0xff]  ;;  %v76_v36 = vld [vmem:[#allocation4 + $0x10] sm:$0xff]  ;;  %s2207_s7 = smov [#allocation10]  }
  0x32   :  { %285 = vmatprep.subr.bf16.mxu0 %v2269_v9  ;;  %328 = vmatprep.subr.bf16.mxu1 %v2289_v16  ;;  %v78_v35 = vunpack.c.l.bf16 %v74_v34  ;;  %v79_v37 = vunpack.c.h.bf16 %v74_v34  ;;  %v82_v40 = vunpack.c.l.bf16 %v76_v36  ;;  %v83_v44 = vunpack.c.h.bf16 %v76_v36  ;;  %v75_v52 = vld [vmem:[#allocation4 + $0x8] sm:$0xff]  ;;  %v77_v55 = vld [vmem:[#allocation4 + $0x18] sm:$0xff]  ;;  %s1618_s8 = sshll.u32 %s2207_s7, 4  ;;  %s1619_s8 = int_to_ptr.vmem [resolvable:$true] %s1618_s8 }
  0x33   :  { %v81_v57 = vunpack.c.h.bf16 %v75_v52  ;;  %v80_v58 = vunpack.c.l.bf16 %v75_v52  ;;  %v85_v59 = vunpack.c.h.bf16 %v77_v55  ;;  %s2172_s9 = scalar_lea.vmem %s1619_s8, 256  ;;  %p2177_p2 = scmp.lt.s32.totalorder %s1619_s8, %s1619_s8 }
  0x34   :  { %p2173_p1 = scmp.ne.s32.totalorder %s1619_s8, %s2172_s9  ;;  %p2178_p3 = scmp.lt.s32.totalorder %s2172_s9, %s2172_s9 }
  0x35   :  { %286 = vmatpush1.bf16.msra.mxu0 %v2278_v12  ;;  %329 = vmatpush1.bf16.msra.mxu1 %v2298_v19 }
  0x36   :  { %287 = vmatprep.subr.bf16.mxu0 %v2280_v13  ;;  %330 = vmatprep.subr.bf16.mxu1 %v2301_v20  ;;  %p2179_p4 = por %p2178_p3, %p2177_p2 }
  0x38   :  { %p2180_p5 = pnand %p2179_p4, %p2173_p1 }
  0x39   :  { %288 = vmatpush1.bf16.msra.mxu0 %v2292_v17  ;;  %331 = vmatpush1.bf16.msra.mxu1 %v2310_v23 }
  0x3a   :  { %289 = vmatprep.subr.bf16.mxu0 %v2295_v18  ;;  %332 = vmatprep.subr.bf16.mxu1 %v2313_v24 }
  0x3d   :  { %290 = vmatpush1.bf16.msra.mxu0 %v2304_v21  ;;  %333 = vmatpush1.bf16.msra.mxu1 %v2322_v27 }
  0x3e   :  { %291 = vmatprep.subr.bf16.mxu0 %v2306_v22  ;;  %334 = vmatprep.subr.bf16.mxu1 %v2325_v28 }
  0x41   :  { %292 = vmatpush1.bf16.msra.mxu0 %v2316_v25  ;;  %335 = vmatpush1.bf16.msra.mxu1 %v2332_v30 }
  0x42   :  { %293 = vmatprep.subr.bf16.mxu0 %v2319_v26  ;;  %336 = vmatprep.subr.bf16.mxu1 %v2335_v31 }
  0x45   :  { %294 = vmatpush1.bf16.msra.mxu0 %v2328_v29  ;;  %337 = vmatpush1.bf16.msra.mxu1 %v2339_v32 }
  0x46   :  { %434 = vmatprep.subr.bf16.mxu0 %v2247_v1  ;;  %477 = vmatprep.subr.bf16.mxu1 %v2260_v6 }
  0x48   :  { %312 = vmatmul.mubr.bf16.vlgmr.msra.gmra.mxu0 %v2206_v33  ;;  %355 = vmatmul.mubr.bf16.vlgmr.msra.gmra.mxu1 %v2206_v33 }
  0x49   :  { %435 = vmatpush1.bf16.msra.mxu0 %v2249_v2  ;;  %466 = vmatprep.mubr.bf16.mxu0 %v2205_v0 }
  0x4a   :  { %436 = vmatprep.subr.bf16.mxu0 %v2252_v3  ;;  %478 = vmatpush1.bf16.msra.mxu1 %v2262_v7 }
  0x4b   :  { %479 = vmatprep.subr.bf16.mxu1 %v2272_v10  ;;  %509 = vmatprep.mubr.bf16.mxu1 %v2205_v0 }
  0x4d   :  { %437 = vmatpush1.bf16.msra.mxu0 %v2255_v4 }
  0x4e   :  { %438 = vmatprep.subr.bf16.mxu0 %v2258_v5  ;;  %480 = vmatpush1.bf16.msra.mxu1 %v2274_v11 }
  0x4f   :  { %481 = vmatprep.subr.bf16.mxu1 %v2282_v14 }
  0x51   :  { %439 = vmatpush1.bf16.msra.mxu0 %v2265_v8 }
  0x52   :  { %440 = vmatprep.subr.bf16.mxu0 %v2269_v9  ;;  %482 = vmatpush1.bf16.msra.mxu1 %v2286_v15 }
  0x53   :  { %483 = vmatprep.subr.bf16.mxu1 %v2289_v16 }
  0x55   :  { %441 = vmatpush1.bf16.msra.mxu0 %v2278_v12 }
  0x56   :  { %442 = vmatprep.subr.bf16.mxu0 %v2280_v13  ;;  %484 = vmatpush1.bf16.msra.mxu1 %v2298_v19 }
  0x57   :  { %485 = vmatprep.subr.bf16.mxu1 %v2301_v20 }
  0x59   :  { %443 = vmatpush1.bf16.msra.mxu0 %v2292_v17 }
  0x5a   :  { %444 = vmatprep.subr.bf16.mxu0 %v2295_v18  ;;  %486 = vmatpush1.bf16.msra.mxu1 %v2310_v23 }
  0x5b   :  { %487 = vmatprep.subr.bf16.mxu1 %v2313_v24 }
  0x5d   :  { %445 = vmatpush1.bf16.msra.mxu0 %v2304_v21 }
  0x5e   :  { %446 = vmatprep.subr.bf16.mxu0 %v2306_v22  ;;  %488 = vmatpush1.bf16.msra.mxu1 %v2322_v27 }
  0x5f   :  { %489 = vmatprep.subr.bf16.mxu1 %v2325_v28 }
  0x61   :  { %447 = vmatpush1.bf16.msra.mxu0 %v2316_v25 }
  0x62   :  { %448 = vmatprep.subr.bf16.mxu0 %v2319_v26  ;;  %490 = vmatpush1.bf16.msra.mxu1 %v2332_v30 }
  0x63   :  { %491 = vmatprep.subr.bf16.mxu1 %v2335_v31 }
  0x65   :  { %449 = vmatpush1.bf16.msra.mxu0 %v2328_v29 }
  0x66   :  { %589 = vmatprep.subr.bf16.mxu0 %v2247_v1  ;;  %492 = vmatpush1.bf16.msra.mxu1 %v2339_v32 }
  0x67   :  { %632 = vmatprep.subr.bf16.mxu1 %v2260_v6 }
 0x108   :  { %v313_v38 = vpop.f32.mrf.mxu0  ;;  %v356_v48 = vpop.f32.mrf.mxu1 }
 0x109   :  { %v365_v39 = vadd.f32 %v313_v38, %v78_v35  ;;  %v367_v62 = vadd.f32 %v356_v48, %v80_v58  ;;  %v84_v35 = vunpack.c.l.bf16 %v77_v55 }
 0x10a   :  { %v315_v41 = vpop.f32.mrf.mxu0  ;;  %v358_v53 = vpop.f32.mrf.mxu1 }
 0x10b   :  { %v1663_v42 = vmul.f32 -1.442695, %v365_v39  ;;  %v366_v43 = vadd.f32 %v315_v41, %v79_v37  ;;  %v368_v61 = vadd.f32 %v358_v53, %v81_v57 }
 0x10c   :  { %v317_v45 = vpop.f32.mrf.mxu0  ;;  %v360_v56 = vpop.f32.mrf.mxu1 }
 0x10d   :  { %1824 = vpow2.f32 %v1663_v42  ;;  %v1665_v46 = vmul.f32 -1.442695, %v366_v43  ;;  %v369_v47 = vadd.f32 %v317_v45, %v82_v40  ;;  %v1667_v34 = vmul.f32 -1.442695, %v368_v61 }
 0x10e   :  { %v319_v49 = vpop.f32.mrf.mxu0  ;;  %v362_v60 = vpop.f32.mrf.mxu1  ;;  %v371_v41 = vadd.f32 %v360_v56, %v84_v35 }
 0x10f   :  { %1826 = vpow2.f32 %v1665_v46  ;;  %v1664_v50 = vmul.f32 -1.442695, %v369_v47  ;;  %v370_v51 = vadd.f32 %v319_v49, %v83_v44  ;;  %v372_v63 = vadd.f32 %v362_v60, %v85_v59 }
 0x111   :  { %1828 = vpow2.f32 %v1664_v50  ;;  %v1666_v54 = vmul.f32 -1.442695, %v370_v51  ;;  %v1668_v38 = vmul.f32 -1.442695, %v372_v63 }
 0x113   :  { %1830 = vpow2.f32 %v1666_v54 }
 0x114   :  { %1832 = vtanh.f32 %v367_v62 }
 0x11a   :  { %v1825_v33 = vpop.eup %1824 }
 0x11b   :  { %v379_v36 = vadd.f32 1.0, %v1825_v33 }
 0x11c   :  { %v1827_v37 = vpop.eup %1826 }
 0x11d   :  { %1834 = vrcp.f32 %v379_v36  ;;  %v391_v39 = vadd.f32 1.0, %v1827_v37  ;;  %v421_v37 = vld [vmem:[#allocation4 + $0x20] sm:$0xff] }
 0x11e   :  { %v1829_v40 = vpop.eup %1828  ;;  %1836 = vpow2.f32 %v1667_v34 }
 0x11f   :  { %1838 = vrcp.f32 %v391_v39  ;;  %v380_v42 = vadd.f32 1.0, %v1829_v40  ;;  %v423_v39 = vld [vmem:[#allocation4 + $0x30] sm:$0xff]  ;;  %v426_v40 = vunpack.c.h.bf16 %v421_v37 }
 0x120   :  { %v1831_v43 = vpop.eup %1830  ;;  %1840 = vpow2.f32 %v1668_v38  ;;  %v425_v38 = vunpack.c.l.bf16 %v421_v37 }
 0x121   :  { %1842 = vrcp.f32 %v380_v42  ;;  %v392_v44 = vadd.f32 1.0, %v1831_v43  ;;  %v1833_v45 = vpop.eup %1832 }
 0x122   :  { %1844 = vtanh.f32 %v371_v41 }
 0x123   :  { %1846 = vrcp.f32 %v392_v44  ;;  %v429_v44 = vunpack.c.l.bf16 %v423_v39 }
 0x12a   :  { %v1835_v46 = vpop.eup %1834 }
 0x12b   :  { %v1837_v47 = vpop.eup %1836  ;;  %v413_v51 = vmul.f32 %v1835_v46, %v1833_v45 }
 0x12c   :  { %v1839_v48 = vpop.eup %1838  ;;  %v405_v53 = vadd.f32 1.0, %v1837_v47 }
 0x12d   :  { %v1841_v49 = vpop.eup %1840  ;;  %v411_v50 = vmul.f32 0.0, %v1839_v48  ;;  %v430_v48 = vunpack.c.h.bf16 %v423_v39 }
 0x12e   :  { %v1843_v52 = vpop.eup %1842  ;;  %v406_v57 = vadd.f32 1.0, %v1841_v49  ;;  %1848 = vrcp.f32 %v405_v53 }
 0x12f   :  { %v1845_v54 = vpop.eup %1844  ;;  %v2379_v55 = vadd.f32 %v413_v51, %v411_v50 }
 0x130   :  { %v1847_v56 = vpop.eup %1846  ;;  %v414_v59 = vmul.f32 %v1845_v54, %v1843_v52 }
 0x131   :  { %v412_v58 = vmul.f32 0.0, %v1847_v56  ;;  %1850 = vtanh.f32 %v2379_v55 }
 0x132   :  { %1852 = vrcp.f32 %v406_v57  ;;  %v422_v57 = vld [vmem:[#allocation4 + $0x28] sm:$0xff] }
 0x133   :  { %v2382_v60 = vadd.f32 %v414_v59, %v412_v58 }
 0x135   :  { %1854 = vtanh.f32 %v2382_v60 }
 0x13b   :  { %v1849_v61 = vpop.eup %1848 }
 0x13e   :  { %v1851_v62 = vpop.eup %1850 }
 0x13f   :  { %v1853_v63 = vpop.eup %1852  ;;  %v419_v34 = vmul.f32 %v1851_v62, %v1849_v61  ;;  %v428_v61 = vunpack.c.h.bf16 %v422_v57  ;;  %v424_v62 = vld [vmem:[#allocation4 + $0x38] sm:$0xff] }
 0x142   :  { %v1855_v33 = vpop.eup %1854 }
 0x143   :  { %v420_v35 = vmul.f32 %v1855_v33, %v1853_v63  ;;  %v427_v63 = vunpack.c.l.bf16 %v422_v57  ;;  %v432_v33 = vunpack.c.h.bf16 %v424_v62 }
 0x145   :  { %v433_v36 = vpack.c.bf16 %v420_v35, %v419_v34 }
 0x147   :  { %467 = vmatmul.mubr.bf16.vlgmr.msra.gmra.mxu0 %v433_v36  ;;  %510 = vmatmul.mubr.bf16.vlgmr.msra.gmra.mxu1 %v433_v36 }
 0x148   :  { %590 = vmatpush1.bf16.msra.mxu0 %v2249_v2  ;;  %633 = vmatpush1.bf16.msra.mxu1 %v2262_v7 }
 0x149   :  { %591 = vmatprep.subr.bf16.mxu0 %v2252_v3  ;;  %634 = vmatprep.subr.bf16.mxu1 %v2272_v10 }
 0x14a   :  { %621 = vmatprep.mubr.bf16.mxu0 %v2205_v0  ;;  %664 = vmatprep.mubr.bf16.mxu1 %v2205_v0 }
 0x14c   :  { %592 = vmatpush1.bf16.msra.mxu0 %v2255_v4  ;;  %635 = vmatpush1.bf16.msra.mxu1 %v2274_v11 }
 0x14d   :  { %593 = vmatprep.subr.bf16.mxu0 %v2258_v5  ;;  %636 = vmatprep.subr.bf16.mxu1 %v2282_v14 }
 0x150   :  { %594 = vmatpush1.bf16.msra.mxu0 %v2265_v8  ;;  %637 = vmatpush1.bf16.msra.mxu1 %v2286_v15 }
 0x151   :  { %595 = vmatprep.subr.bf16.mxu0 %v2269_v9  ;;  %638 = vmatprep.subr.bf16.mxu1 %v2289_v16 }
 0x154   :  { %596 = vmatpush1.bf16.msra.mxu0 %v2278_v12  ;;  %639 = vmatpush1.bf16.msra.mxu1 %v2298_v19 }
 0x155   :  { %597 = vmatprep.subr.bf16.mxu0 %v2280_v13  ;;  %640 = vmatprep.subr.bf16.mxu1 %v2301_v20 }
 0x158   :  { %598 = vmatpush1.bf16.msra.mxu0 %v2292_v17  ;;  %641 = vmatpush1.bf16.msra.mxu1 %v2310_v23 }
 0x159   :  { %599 = vmatprep.subr.bf16.mxu0 %v2295_v18  ;;  %642 = vmatprep.subr.bf16.mxu1 %v2313_v24 }
 0x15c   :  { %600 = vmatpush1.bf16.msra.mxu0 %v2304_v21  ;;  %643 = vmatpush1.bf16.msra.mxu1 %v2322_v27 }
 0x15d   :  { %601 = vmatprep.subr.bf16.mxu0 %v2306_v22  ;;  %644 = vmatprep.subr.bf16.mxu1 %v2325_v28 }
 0x160   :  { %602 = vmatpush1.bf16.msra.mxu0 %v2316_v25  ;;  %645 = vmatpush1.bf16.msra.mxu1 %v2332_v30 }
 0x161   :  { %603 = vmatprep.subr.bf16.mxu0 %v2319_v26  ;;  %646 = vmatprep.subr.bf16.mxu1 %v2335_v31 }
 0x164   :  { %604 = vmatpush1.bf16.msra.mxu0 %v2328_v29  ;;  %647 = vmatpush1.bf16.msra.mxu1 %v2339_v32 }
 0x165   :  { %744 = vmatprep.subr.bf16.mxu0 %v2247_v1  ;;  %787 = vmatprep.subr.bf16.mxu1 %v2260_v6 }
 0x207   :  { %v468_v41 = vpop.f32.mrf.mxu0  ;;  %v511_v43 = vpop.f32.mrf.mxu1 }
 0x208   :  { %v520_v42 = vadd.f32 %v468_v41, %v425_v38  ;;  %v522_v36 = vadd.f32 %v511_v43, %v427_v63 }
 0x209   :  { %v470_v45 = vpop.f32.mrf.mxu0  ;;  %v513_v51 = vpop.f32.mrf.mxu1 }
 0x20a   :  { %v1669_v46 = vmul.f32 -1.442695, %v520_v42  ;;  %v521_v47 = vadd.f32 %v470_v45, %v426_v40  ;;  %v523_v35 = vadd.f32 %v513_v51, %v428_v61  ;;  %v431_v40 = vunpack.c.l.bf16 %v424_v62 }
 0x20b   :  { %v472_v49 = vpop.f32.mrf.mxu0  ;;  %v515_v58 = vpop.f32.mrf.mxu1 }
 0x20c   :  { %1856 = vpow2.f32 %v1669_v46  ;;  %v1671_v50 = vmul.f32 -1.442695, %v521_v47  ;;  %v524_v52 = vadd.f32 %v472_v49, %v429_v44  ;;  %v1673_v39 = vmul.f32 -1.442695, %v523_v35 }
 0x20d   :  { %v474_v53 = vpop.f32.mrf.mxu0  ;;  %v517_v34 = vpop.f32.mrf.mxu1  ;;  %v526_v47 = vadd.f32 %v515_v58, %v431_v40 }
 0x20e   :  { %1858 = vpow2.f32 %v1671_v50  ;;  %v1670_v54 = vmul.f32 -1.442695, %v524_v52  ;;  %v525_v56 = vadd.f32 %v474_v53, %v430_v48  ;;  %v527_v37 = vadd.f32 %v517_v34, %v432_v33 }
 0x210   :  { %1860 = vpow2.f32 %v1670_v54  ;;  %v1672_v59 = vmul.f32 -1.442695, %v525_v56  ;;  %v1674_v44 = vmul.f32 -1.442695, %v527_v37 }
 0x212   :  { %1862 = vpow2.f32 %v1672_v59 }
 0x213   :  { %1864 = vtanh.f32 %v522_v36 }
 0x219   :  { %v1857_v38 = vpop.eup %1856 }
 0x21a   :  { %v534_v41 = vadd.f32 1.0, %v1857_v38 }
 0x21b   :  { %v1859_v42 = vpop.eup %1858 }
 0x21c   :  { %1866 = vrcp.f32 %v534_v41  ;;  %v546_v45 = vadd.f32 1.0, %v1859_v42 }
 0x21d   :  { %v1861_v46 = vpop.eup %1860  ;;  %1868 = vpow2.f32 %v1673_v39 }
 0x21e   :  { %1870 = vrcp.f32 %v546_v45  ;;  %v535_v48 = vadd.f32 1.0, %v1861_v46  ;;  %v578_v45 = vld [vmem:[#allocation4 + $0x50] sm:$0xff] }
 0x21f   :  { %v1863_v49 = vpop.eup %1862  ;;  %1872 = vpow2.f32 %v1674_v44 }
 0x220   :  { %1874 = vrcp.f32 %v535_v48  ;;  %v547_v50 = vadd.f32 1.0, %v1863_v49  ;;  %v1865_v43 = vpop.eup %1864 }
 0x221   :  { %1876 = vtanh.f32 %v526_v47 }
 0x222   :  { %1878 = vrcp.f32 %v547_v50  ;;  %v584_v50 = vunpack.c.l.bf16 %v578_v45 }
 0x229   :  { %v1867_v51 = vpop.eup %1866 }
 0x22a   :  { %v1869_v52 = vpop.eup %1868  ;;  %v568_v56 = vmul.f32 %v1867_v51, %v1865_v43 }
 0x22b   :  { %v1871_v53 = vpop.eup %1870  ;;  %v560_v61 = vadd.f32 1.0, %v1869_v52 }
 0x22c   :  { %v1873_v54 = vpop.eup %1872  ;;  %v566_v57 = vmul.f32 %v1871_v53, %v2379_v55  ;;  %v585_v53 = vunpack.c.h.bf16 %v578_v45 }
 0x22d   :  { %v1875_v59 = vpop.eup %1874  ;;  %v561_v33 = vadd.f32 1.0, %v1873_v54  ;;  %1880 = vrcp.f32 %v560_v61 }
 0x22e   :  { %v1877_v62 = vpop.eup %1876  ;;  %v2420_v58 = vadd.f32 %v568_v56, %v566_v57 }
 0x22f   :  { %v1879_v63 = vpop.eup %1878  ;;  %v569_v34 = vmul.f32 %v1877_v62, %v1875_v59 }
 0x230   :  { %v567_v35 = vmul.f32 %v1879_v63, %v2382_v60  ;;  %1882 = vtanh.f32 %v2420_v58  ;;  %v576_v60 = vld [vmem:[#allocation4 + $0x40] sm:$0xff] }
 0x231   :  { %1884 = vrcp.f32 %v561_v33  ;;  %v580_v44 = vunpack.c.l.bf16 %v576_v60  ;;  %v581_v46 = vunpack.c.h.bf16 %v576_v60  ;;  %v577_v33 = vld [vmem:[#allocation4 + $0x48] sm:$0xff] }
 0x232   :  { %v2423_v36 = vadd.f32 %v569_v34, %v567_v35 }
 0x234   :  { %1886 = vtanh.f32 %v2423_v36 }
 0x23a   :  { %v1881_v37 = vpop.eup %1880 }
 0x23d   :  { %v1883_v55 = vpop.eup %1882 }
 0x23e   :  { %v1885_v38 = vpop.eup %1884  ;;  %v574_v40 = vmul.f32 %v1883_v55, %v1881_v37  ;;  %v583_v37 = vunpack.c.h.bf16 %v577_v33  ;;  %v579_v55 = vld [vmem:[#allocation4 + $0x58] sm:$0xff] }
 0x241   :  { %v1887_v39 = vpop.eup %1886 }
 0x242   :  { %v575_v41 = vmul.f32 %v1887_v39, %v1885_v38  ;;  %v582_v38 = vunpack.c.l.bf16 %v577_v33  ;;  %v587_v39 = vunpack.c.h.bf16 %v579_v55 }
 0x244   :  { %v588_v42 = vpack.c.bf16 %v575_v41, %v574_v40 }
 0x246   :  { %622 = vmatmul.mubr.bf16.vlgmr.msra.gmra.mxu0 %v588_v42  ;;  %665 = vmatmul.mubr.bf16.vlgmr.msra.gmra.mxu1 %v588_v42 }
 0x247   :  { %745 = vmatpush1.bf16.msra.mxu0 %v2249_v2  ;;  %788 = vmatpush1.bf16.msra.mxu1 %v2262_v7 }
 0x248   :  { %746 = vmatprep.subr.bf16.mxu0 %v2252_v3  ;;  %789 = vmatprep.subr.bf16.mxu1 %v2272_v10 }
 0x249   :  { %776 = vmatprep.mubr.bf16.mxu0 %v2205_v0  ;;  %819 = vmatprep.mubr.bf16.mxu1 %v2205_v0 }
 0x24b   :  { %747 = vmatpush1.bf16.msra.mxu0 %v2255_v4  ;;  %790 = vmatpush1.bf16.msra.mxu1 %v2274_v11 }
 0x24c   :  { %748 = vmatprep.subr.bf16.mxu0 %v2258_v5  ;;  %791 = vmatprep.subr.bf16.mxu1 %v2282_v14 }
 0x24f   :  { %749 = vmatpush1.bf16.msra.mxu0 %v2265_v8  ;;  %792 = vmatpush1.bf16.msra.mxu1 %v2286_v15 }
 0x250   :  { %750 = vmatprep.subr.bf16.mxu0 %v2269_v9  ;;  %793 = vmatprep.subr.bf16.mxu1 %v2289_v16 }
 0x253   :  { %751 = vmatpush1.bf16.msra.mxu0 %v2278_v12  ;;  %794 = vmatpush1.bf16.msra.mxu1 %v2298_v19 }
 0x254   :  { %752 = vmatprep.subr.bf16.mxu0 %v2280_v13  ;;  %795 = vmatprep.subr.bf16.mxu1 %v2301_v20 }
 0x257   :  { %753 = vmatpush1.bf16.msra.mxu0 %v2292_v17  ;;  %796 = vmatpush1.bf16.msra.mxu1 %v2310_v23 }
 0x258   :  { %754 = vmatprep.subr.bf16.mxu0 %v2295_v18  ;;  %797 = vmatprep.subr.bf16.mxu1 %v2313_v24 }
 0x25b   :  { %755 = vmatpush1.bf16.msra.mxu0 %v2304_v21  ;;  %798 = vmatpush1.bf16.msra.mxu1 %v2322_v27 }
 0x25c   :  { %756 = vmatprep.subr.bf16.mxu0 %v2306_v22  ;;  %799 = vmatprep.subr.bf16.mxu1 %v2325_v28 }
 0x25f   :  { %757 = vmatpush1.bf16.msra.mxu0 %v2316_v25  ;;  %800 = vmatpush1.bf16.msra.mxu1 %v2332_v30 }
 0x260   :  { %758 = vmatprep.subr.bf16.mxu0 %v2319_v26  ;;  %801 = vmatprep.subr.bf16.mxu1 %v2335_v31 }
 0x263   :  { %759 = vmatpush1.bf16.msra.mxu0 %v2328_v29  ;;  %802 = vmatpush1.bf16.msra.mxu1 %v2339_v32 }
 0x264   :  { %899 = vmatprep.subr.bf16.mxu0 %v2247_v1  ;;  %942 = vmatprep.subr.bf16.mxu1 %v2260_v6 }
 0x306   :  { %v623_v47 = vpop.f32.mrf.mxu0  ;;  %v666_v49 = vpop.f32.mrf.mxu1 }
 0x307   :  { %v675_v48 = vadd.f32 %v623_v47, %v580_v44  ;;  %v677_v42 = vadd.f32 %v666_v49, %v582_v38 }
 0x308   :  { %v625_v43 = vpop.f32.mrf.mxu0  ;;  %v668_v57 = vpop.f32.mrf.mxu1 }
 0x309   :  { %v1675_v51 = vmul.f32 -1.442695, %v675_v48  ;;  %v676_v52 = vadd.f32 %v625_v43, %v581_v46  ;;  %v678_v41 = vadd.f32 %v668_v57, %v583_v37  ;;  %v586_v46 = vunpack.c.l.bf16 %v579_v55 }
 0x30a   :  { %v627_v54 = vpop.f32.mrf.mxu0  ;;  %v670_v34 = vpop.f32.mrf.mxu1 }
 0x30b   :  { %1888 = vpow2.f32 %v1675_v51  ;;  %v1677_v56 = vmul.f32 -1.442695, %v676_v52  ;;  %v679_v59 = vadd.f32 %v627_v54, %v584_v50  ;;  %v1679_v45 = vmul.f32 -1.442695, %v678_v41 }
 0x30c   :  { %v629_v61 = vpop.f32.mrf.mxu0  ;;  %v672_v40 = vpop.f32.mrf.mxu1  ;;  %v681_v52 = vadd.f32 %v670_v34, %v586_v46 }
 0x30d   :  { %1890 = vpow2.f32 %v1677_v56  ;;  %v1676_v62 = vmul.f32 -1.442695, %v679_v59  ;;  %v680_v63 = vadd.f32 %v629_v61, %v585_v53  ;;  %v682_v60 = vadd.f32 %v672_v40, %v587_v39 }
 0x30f   :  { %1892 = vpow2.f32 %v1676_v62  ;;  %v1678_v35 = vmul.f32 -1.442695, %v680_v63  ;;  %v1680_v50 = vmul.f32 -1.442695, %v682_v60 }
 0x311   :  { %1894 = vpow2.f32 %v1678_v35 }
 0x312   :  { %1896 = vtanh.f32 %v677_v42 }
 0x318   :  { %v1889_v44 = vpop.eup %1888 }
 0x319   :  { %v689_v47 = vadd.f32 1.0, %v1889_v44 }
 0x31a   :  { %v1891_v48 = vpop.eup %1890 }
 0x31b   :  { %1898 = vrcp.f32 %v689_v47  ;;  %v701_v43 = vadd.f32 1.0, %v1891_v48 }
 0x31c   :  { %v1893_v51 = vpop.eup %1892  ;;  %1900 = vpow2.f32 %v1679_v45 }
 0x31d   :  { %1902 = vrcp.f32 %v701_v43  ;;  %v690_v53 = vadd.f32 1.0, %v1893_v51 }
 0x31e   :  { %v1895_v54 = vpop.eup %1894  ;;  %1904 = vpow2.f32 %v1680_v50 }
 0x31f   :  { %1906 = vrcp.f32 %v690_v53  ;;  %v702_v56 = vadd.f32 1.0, %v1895_v54  ;;  %v1897_v49 = vpop.eup %1896 }
 0x320   :  { %1908 = vtanh.f32 %v681_v52 }
 0x321   :  { %1910 = vrcp.f32 %v702_v56 }
 0x328   :  { %v1899_v57 = vpop.eup %1898 }
 0x329   :  { %v1901_v59 = vpop.eup %1900  ;;  %v723_v63 = vmul.f32 %v1899_v57, %v1897_v49 }
 0x32a   :  { %v1903_v61 = vpop.eup %1902  ;;  %v715_v37 = vadd.f32 1.0, %v1901_v59 }
 0x32b   :  { %v1905_v62 = vpop.eup %1904  ;;  %v721_v33 = vmul.f32 %v1903_v61, %v2420_v58 }
 0x32c   :  { %v1907_v35 = vpop.eup %1906  ;;  %v716_v39 = vadd.f32 1.0, %v1905_v62  ;;  %1912 = vrcp.f32 %v715_v37 }
 0x32d   :  { %v1909_v55 = vpop.eup %1908  ;;  %v2462_v34 = vadd.f32 %v723_v63, %v721_v33 }
 0x32e   :  { %v1911_v38 = vpop.eup %1910  ;;  %v724_v40 = vmul.f32 %v1909_v55, %v1907_v35 }
 0x32f   :  { %v722_v41 = vmul.f32 %v1911_v38, %v2423_v36  ;;  %1914 = vtanh.f32 %v2462_v34 }
 0x330   :  { %1916 = vrcp.f32 %v716_v39 }
 0x331   :  { %v2465_v42 = vadd.f32 %v724_v40, %v722_v41 }
 0x333   :  { %1918 = vtanh.f32 %v2465_v42 }
 0x339   :  { %v1913_v60 = vpop.eup %1912 }
 0x33c   :  { %v1915_v58 = vpop.eup %1914 }
 0x33d   :  { %v1917_v44 = vpop.eup %1916  ;;  %v729_v46 = vmul.f32 %v1915_v58, %v1913_v60 }
 0x340   :  { %v1919_v45 = vpop.eup %1918 }
 0x341   :  { %v730_v47 = vmul.f32 %v1919_v45, %v1917_v44 }
 0x343   :  { %v743_v48 = vpack.c.bf16 %v730_v47, %v729_v46 }
 0x345   :  { %777 = vmatmul.mubr.bf16.vlgmr.msra.gmra.mxu0 %v743_v48  ;;  %820 = vmatmul.mubr.bf16.vlgmr.msra.gmra.mxu1 %v743_v48 }
 0x346   :  { %900 = vmatpush1.bf16.msra.mxu0 %v2249_v2  ;;  %943 = vmatpush1.bf16.msra.mxu1 %v2262_v7  ;;  %v731_v2 = vld [vmem:[#allocation4 + $0x60] sm:$0xff] }
 0x347   :  { %901 = vmatprep.subr.bf16.mxu0 %v2252_v3  ;;  %944 = vmatprep.subr.bf16.mxu1 %v2272_v10  ;;  %v735_v3 = vunpack.c.l.bf16 %v731_v2 }
 0x348   :  { %931 = vmatprep.mubr.bf16.mxu0 %v2205_v0  ;;  %974 = vmatprep.mubr.bf16.mxu1 %v2205_v0 }
 0x34a   :  { %902 = vmatpush1.bf16.msra.mxu0 %v2255_v4  ;;  %945 = vmatpush1.bf16.msra.mxu1 %v2274_v11  ;;  %v733_v4 = vld [vmem:[#allocation4 + $0x70] sm:$0xff] }
 0x34b   :  { %903 = vmatprep.subr.bf16.mxu0 %v2258_v5  ;;  %946 = vmatprep.subr.bf16.mxu1 %v2282_v14  ;;  %v736_v5 = vunpack.c.h.bf16 %v731_v2  ;;  %v739_v10 = vunpack.c.l.bf16 %v733_v4  ;;  %v740_v14 = vunpack.c.h.bf16 %v733_v4 }
 0x34e   :  { %904 = vmatpush1.bf16.msra.mxu0 %v2265_v8  ;;  %947 = vmatpush1.bf16.msra.mxu1 %v2286_v15 }
 0x34f   :  { %905 = vmatprep.subr.bf16.mxu0 %v2269_v9  ;;  %948 = vmatprep.subr.bf16.mxu1 %v2289_v16 }
 0x352   :  { %906 = vmatpush1.bf16.msra.mxu0 %v2278_v12  ;;  %949 = vmatpush1.bf16.msra.mxu1 %v2298_v19 }
 0x353   :  { %907 = vmatprep.subr.bf16.mxu0 %v2280_v13  ;;  %950 = vmatprep.subr.bf16.mxu1 %v2301_v20  ;;  %v732_v20 = vld [vmem:[#allocation4 + $0x68] sm:$0xff] }
 0x356   :  { %908 = vmatpush1.bf16.msra.mxu0 %v2292_v17  ;;  %951 = vmatpush1.bf16.msra.mxu1 %v2310_v23  ;;  %v738_v23 = vunpack.c.h.bf16 %v732_v20 }
 0x357   :  { %909 = vmatprep.subr.bf16.mxu0 %v2295_v18  ;;  %952 = vmatprep.subr.bf16.mxu1 %v2313_v24  ;;  %v734_v24 = vld [vmem:[#allocation4 + $0x78] sm:$0xff] }
 0x358   :  { %v741_v53 = vunpack.c.l.bf16 %v734_v24 }
 0x35a   :  { %910 = vmatpush1.bf16.msra.mxu0 %v2304_v21  ;;  %953 = vmatpush1.bf16.msra.mxu1 %v2322_v27 }
 0x35b   :  { %911 = vmatprep.subr.bf16.mxu0 %v2306_v22  ;;  %954 = vmatprep.subr.bf16.mxu1 %v2325_v28 }
 0x35e   :  { %912 = vmatpush1.bf16.msra.mxu0 %v2316_v25  ;;  %955 = vmatpush1.bf16.msra.mxu1 %v2332_v30  ;;  %v737_v25 = vunpack.c.l.bf16 %v732_v20  ;;  %v2549_v20 = vld [vmem:[#allocation7 + $0x80] ss:$16 sps:$4 sm:$0xff]  }
 0x35f   :  { %913 = vmatprep.subr.bf16.mxu0 %v2319_v26  ;;  %956 = vmatprep.subr.bf16.mxu1 %v2335_v31  ;;  %v742_v26 = vunpack.c.h.bf16 %v734_v24  ;;  %v2561_v24 = vld [vmem:[#allocation7 + $0x60] ss:$16 sps:$4 sm:$0xff]  }
 0x362   :  { %914 = vmatpush1.bf16.msra.mxu0 %v2328_v29  ;;  %957 = vmatpush1.bf16.msra.mxu1 %v2339_v32 }
 0x363   :  { %1054 = vmatprep.subr.bf16.mxu0 %v2247_v1  ;;  %1097 = vmatprep.subr.bf16.mxu1 %v2260_v6 }
 0x405   :  { %v778_v7 = vpop.f32.mrf.mxu0  ;;  %v821_v9 = vpop.f32.mrf.mxu1 }
 0x406   :  { %v830_v8 = vadd.f32 %v778_v7, %v735_v3  ;;  %v832_v50 = vadd.f32 %v821_v9, %v737_v25  ;;  %v2564_v25 = vld [vmem:[#allocation7 + $0x68] ss:$16 sps:$4 sm:$0xff]  }
 0x407   :  { %v780_v11 = vpop.f32.mrf.mxu0  ;;  %v823_v17 = vpop.f32.mrf.mxu1 }
 0x408   :  { %v1681_v12 = vmul.f32 -1.442695, %v830_v8  ;;  %v831_v13 = vadd.f32 %v780_v11, %v736_v5  ;;  %v833_v36 = vadd.f32 %v823_v17, %v738_v23  ;;  %v2511_v11 = vld [vmem:[#allocation7 + $0xe0] ss:$16 sps:$4 sm:$0xff]   ;;  %v2534_v17 = vld [vmem:[#allocation7 + $0xac] ss:$16 sps:$4 sm:$0xff]  }
 0x409   :  { %v782_v15 = vpop.f32.mrf.mxu0  ;;  %v825_v21 = vpop.f32.mrf.mxu1  ;;  %v2558_v23 = vld [vmem:[#allocation7 + $0x6c] ss:$16 sps:$4 sm:$0xff]  }
 0x40a   :  { %1920 = vpow2.f32 %v1681_v12  ;;  %v1683_v16 = vmul.f32 -1.442695, %v831_v13  ;;  %v834_v18 = vadd.f32 %v782_v15, %v739_v10  ;;  %v1685_v52 = vmul.f32 -1.442695, %v833_v36  ;;  %v2517_v12 = vld [vmem:[#allocation7 + $0xc4] ss:$16 sps:$4 sm:$0xff]  }
 0x40b   :  { %v784_v1 = vpop.f32.mrf.mxu0  ;;  %v827_v29 = vpop.f32.mrf.mxu1  ;;  %v836_v61 = vadd.f32 %v825_v21, %v741_v53  ;;  %v2520_v13 = vld [vmem:[#allocation7 + $0xcc] ss:$16 sps:$4 sm:$0xff]   ;;  %v2528_v15 = vld [vmem:[#allocation7 + $0xc8] ss:$16 sps:$4 sm:$0xff]   ;;  %v2573_v36 = vld [vmem:[#allocation7 + $0x40] ss:$16 sps:$4 sm:$0xff]  }
 0x40c   :  { %1922 = vpow2.f32 %v1683_v16  ;;  %v1682_v6 = vmul.f32 -1.442695, %v834_v18  ;;  %v835_v19 = vadd.f32 %v784_v1, %v740_v14  ;;  %v837_v43 = vadd.f32 %v827_v29, %v742_v26  ;;  %v2525_v14 = vld [vmem:[#allocation7 + $0xc0] ss:$16 sps:$4 sm:$0xff]   ;;  %v2531_v16 = vld [vmem:[#allocation7 + $0xa4] ss:$16 sps:$4 sm:$0xff]  }
 0x40d   :  { %v2537_v18 = vld [vmem:[#allocation7 + $0xa0] ss:$16 sps:$4 sm:$0xff]   ;;  %v2540_v1 = vld [vmem:[#allocation7 + $0xa8] ss:$16 sps:$4 sm:$0xff]   ;;  %v2567_v26 = vld [vmem:[#allocation7 + $0x44] ss:$16 sps:$4 sm:$0xff]  }
 0x40e   :  { %1924 = vpow2.f32 %v1682_v6  ;;  %v1684_v22 = vmul.f32 -1.442695, %v835_v19  ;;  %v1686_v49 = vmul.f32 -1.442695, %v837_v43  ;;  %v2543_v6 = vld [vmem:[#allocation7 + $0x84] ss:$16 sps:$4 sm:$0xff]  }
 0x40f   :  { %v2546_v19 = vld [vmem:[#allocation7 + $0x8c] ss:$16 sps:$4 sm:$0xff]   ;;  %v2552_v21 = vld [vmem:[#allocation7 + $0x88] ss:$16 sps:$4 sm:$0xff]   ;;  %v2581_v43 = vld [vmem:[#allocation7 + $0x20] ss:$16 sps:$4 sm:$0xff]  }
 0x410   :  { %1926 = vpow2.f32 %v1684_v22  ;;  %v2555_v22 = vld [vmem:[#allocation7 + $0x64] ss:$16 sps:$4 sm:$0xff]   ;;  %v2570_v29 = vld [vmem:[#allocation7 + $0x4c] ss:$16 sps:$4 sm:$0xff]  }
 0x411   :  { %1928 = vtanh.f32 %v832_v50  ;;  %v2577_v50 = vld [vmem:[#allocation7 + $0x24] ss:$16 sps:$4 sm:$0xff]  }
 0x417   :  { %v1921_v51 = vpop.eup %1920 }
 0x418   :  { %v844_v54 = vadd.f32 1.0, %v1921_v51  ;;  %v2585_v51 = vld [vmem:[#allocation7 + $0x4] ss:$16 sps:$4 sm:$0xff]  }
 0x419   :  { %v1923_v56 = vpop.eup %1922 }
 0x41a   :  { %1930 = vrcp.f32 %v844_v54  ;;  %v856_v57 = vadd.f32 1.0, %v1923_v56  ;;  %v888_v54 = vld [vmem:[#allocation4 + $0x90] sm:$0xff] }
 0x41b   :  { %v1925_v59 = vpop.eup %1924  ;;  %1932 = vpow2.f32 %v1685_v52  ;;  %v2589_v52 = vld [vmem:[#allocation7] ss:$16 sps:$4 sm:$0xff]  }
 0x41c   :  { %1934 = vrcp.f32 %v856_v57  ;;  %v845_v62 = vadd.f32 1.0, %v1925_v59  ;;  %v894_v59 = vunpack.c.l.bf16 %v888_v54 }
 0x41d   :  { %v1927_v63 = vpop.eup %1926  ;;  %1936 = vpow2.f32 %v1686_v49 }
 0x41e   :  { %1938 = vrcp.f32 %v845_v62  ;;  %v857_v33 = vadd.f32 1.0, %v1927_v63  ;;  %v1929_v35 = vpop.eup %1928 }
 0x41f   :  { %1940 = vtanh.f32 %v836_v61 }
 0x420   :  { %1942 = vrcp.f32 %v857_v33 }
 0x427   :  { %v1931_v37 = vpop.eup %1930 }
 0x428   :  { %v1933_v55 = vpop.eup %1932  ;;  %v878_v40 = vmul.f32 %v1931_v37, %v1929_v35 }
 0x429   :  { %v1935_v38 = vpop.eup %1934  ;;  %v870_v58 = vadd.f32 1.0, %v1933_v55 }
 0x42a   :  { %v1937_v39 = vpop.eup %1936  ;;  %v876_v41 = vmul.f32 %v1935_v38, %v2462_v34 }
 0x42b   :  { %v1939_v60 = vpop.eup %1938  ;;  %v871_v47 = vadd.f32 1.0, %v1937_v39  ;;  %1944 = vrcp.f32 %v870_v58 }
 0x42c   :  { %v1941_v44 = vpop.eup %1940  ;;  %v2504_v45 = vadd.f32 %v878_v40, %v876_v41  ;;  %v887_v41 = vld [vmem:[#allocation4 + $0x88] sm:$0xff] }
 0x42d   :  { %v1943_v46 = vpop.eup %1942  ;;  %v879_v48 = vmul.f32 %v1941_v44, %v1939_v60  ;;  %v893_v44 = vunpack.c.h.bf16 %v887_v41 }
 0x42e   :  { %v877_v2 = vmul.f32 %v1943_v46, %v2465_v42  ;;  %1946 = vtanh.f32 %v2504_v45  ;;  %v2514_v42 = vld [vmem:[#allocation7 + $0xe8] ss:$16 sps:$4 sm:$0xff]  }
 0x42f   :  { %1948 = vrcp.f32 %v871_v47  ;;  %v889_v46 = vld [vmem:[#allocation4 + $0x98] sm:$0xff]  ;;  %v892_v47 = vunpack.c.l.bf16 %v887_v41 }
 0x430   :  { %v2507_v3 = vadd.f32 %v879_v48, %v877_v2  ;;  %v897_v48 = vunpack.c.h.bf16 %v889_v46 }
 0x432   :  { %1950 = vtanh.f32 %v2507_v3 }
 0x438   :  { %v1945_v4 = vpop.eup %1944 }
 0x43b   :  { %v1947_v34 = vpop.eup %1946 }
 0x43c   :  { %v1949_v5 = vpop.eup %1948  ;;  %v884_v8 = vmul.f32 %v1947_v34, %v1945_v4 }
 0x43f   :  { %v1951_v7 = vpop.eup %1950 }
 0x440   :  { %v885_v9 = vmul.f32 %v1951_v7, %v1949_v5 }
 0x442   :  { %v898_v10 = vpack.c.bf16 %v885_v9, %v884_v8  ;;  %v896_v9 = vunpack.c.l.bf16 %v889_v46 }
 0x444   :  { %932 = vmatmul.mubr.bf16.vlgmr.msra.gmra.mxu0 %v898_v10  ;;  %975 = vmatmul.mubr.bf16.vlgmr.msra.gmra.mxu1 %v898_v10 }
 0x445   :  { %1055 = vmatpush1.bf16.msra.mxu0 %v2511_v11  ;;  %1098 = vmatpush1.bf16.msra.mxu1 %v2514_v42 }
 0x446   :  { %1056 = vmatprep.subr.bf16.mxu0 %v2517_v12  ;;  %1099 = vmatprep.subr.bf16.mxu1 %v2520_v13 }
 0x447   :  { %1086 = vmatprep.mubr.bf16.mxu0 %v2205_v0  ;;  %1129 = vmatprep.mubr.bf16.mxu1 %v2205_v0 }
 0x449   :  { %1057 = vmatpush1.bf16.msra.mxu0 %v2525_v14  ;;  %1100 = vmatpush1.bf16.msra.mxu1 %v2528_v15 }
 0x44a   :  { %1058 = vmatprep.subr.bf16.mxu0 %v2531_v16  ;;  %1101 = vmatprep.subr.bf16.mxu1 %v2534_v17 }
 0x44d   :  { %1059 = vmatpush1.bf16.msra.mxu0 %v2537_v18  ;;  %1102 = vmatpush1.bf16.msra.mxu1 %v2540_v1 }
 0x44e   :  { %1060 = vmatprep.subr.bf16.mxu0 %v2543_v6  ;;  %1103 = vmatprep.subr.bf16.mxu1 %v2546_v19 }
 0x451   :  { %1061 = vmatpush1.bf16.msra.mxu0 %v2549_v20  ;;  %1104 = vmatpush1.bf16.msra.mxu1 %v2552_v21 }
 0x452   :  { %1062 = vmatprep.subr.bf16.mxu0 %v2555_v22  ;;  %1105 = vmatprep.subr.bf16.mxu1 %v2558_v23 }
 0x455   :  { %1063 = vmatpush1.bf16.msra.mxu0 %v2561_v24  ;;  %1106 = vmatpush1.bf16.msra.mxu1 %v2564_v25 }
 0x456   :  { %1064 = vmatprep.subr.bf16.mxu0 %v2567_v26  ;;  %1107 = vmatprep.subr.bf16.mxu1 %v2570_v29 }
 0x459   :  { %1065 = vmatpush1.bf16.msra.mxu0 %v2573_v36  ;;  %1108 = vmatpush1.bf16.msra.mxu1 %v2322_v27  ;;  %v2593_v27 = vld [vmem:[#allocation7 + $0xe4] ss:$16 sps:$4 sm:$0xff]  }
 0x45a   :  { %1066 = vmatprep.subr.bf16.mxu0 %v2577_v50  ;;  %1109 = vmatprep.subr.bf16.mxu1 %v2325_v28  ;;  %v2596_v28 = vld [vmem:[#allocation7 + $0xec] ss:$16 sps:$4 sm:$0xff]  }
 0x45d   :  { %1067 = vmatpush1.bf16.msra.mxu0 %v2581_v43  ;;  %1110 = vmatpush1.bf16.msra.mxu1 %v2332_v30  ;;  %v886_v30 = vld [vmem:[#allocation4 + $0x80] sm:$0xff] }
 0x45e   :  { %1068 = vmatprep.subr.bf16.mxu0 %v2585_v51  ;;  %1111 = vmatprep.subr.bf16.mxu1 %v2335_v31  ;;  %v890_v53 = vunpack.c.l.bf16 %v886_v30  ;;  %v891_v56 = vunpack.c.h.bf16 %v886_v30 }
 0x461   :  { %1069 = vmatpush1.bf16.msra.mxu0 %v2589_v52  ;;  %1112 = vmatpush1.bf16.msra.mxu1 %v2339_v32  ;;  %v895_v32 = vunpack.c.h.bf16 %v888_v54 }
 0x462   :  { %1209 = vmatprep.subr.bf16.mxu0 %v2593_v27  ;;  %1252 = vmatprep.subr.bf16.mxu1 %v2596_v28 }
 0x504   :  { %v933_v49 = vpop.f32.mrf.mxu0  ;;  %v976_v57 = vpop.f32.mrf.mxu1 }
 0x505   :  { %v985_v31 = vadd.f32 %v933_v49, %v890_v53  ;;  %v987_v34 = vadd.f32 %v976_v57, %v892_v47 }
 0x506   :  { %v935_v61 = vpop.f32.mrf.mxu0  ;;  %v978_v37 = vpop.f32.mrf.mxu1 }
 0x507   :  { %v1687_v62 = vmul.f32 -1.442695, %v985_v31  ;;  %v986_v63 = vadd.f32 %v935_v61, %v891_v56  ;;  %v988_v4 = vadd.f32 %v978_v37, %v893_v44 }
 0x508   :  { %v937_v33 = vpop.f32.mrf.mxu0  ;;  %v980_v60 = vpop.f32.mrf.mxu1 }
 0x509   :  { %1952 = vpow2.f32 %v1687_v62  ;;  %v1689_v35 = vmul.f32 -1.442695, %v986_v63  ;;  %v989_v55 = vadd.f32 %v937_v33, %v894_v59  ;;  %v1691_v8 = vmul.f32 -1.442695, %v988_v4 }
 0x50a   :  { %v939_v38 = vpop.f32.mrf.mxu0  ;;  %v982_v2 = vpop.f32.mrf.mxu1  ;;  %v991_v49 = vadd.f32 %v980_v60, %v896_v9  ;;  %v2642_v9 = vld [vmem:[#allocation7 + $0xc] ss:$16 sps:$4 sm:$0xff]  }
 0x50b   :  { %1954 = vpow2.f32 %v1689_v35  ;;  %v1688_v39 = vmul.f32 -1.442695, %v989_v55  ;;  %v990_v40 = vadd.f32 %v939_v38, %v895_v32  ;;  %v992_v5 = vadd.f32 %v982_v2, %v897_v48 }
 0x50d   :  { %1956 = vpow2.f32 %v1688_v39  ;;  %v1690_v58 = vmul.f32 -1.442695, %v990_v40  ;;  %v1692_v53 = vmul.f32 -1.442695, %v992_v5 }
 0x50f   :  { %1958 = vpow2.f32 %v1690_v58 }
 0x510   :  { %1960 = vtanh.f32 %v987_v34 }
 0x516   :  { %v1953_v7 = vpop.eup %1952 }
 0x517   :  { %v999_v10 = vadd.f32 1.0, %v1953_v7  ;;  %v2634_v7 = vld [vmem:[#allocation7 + $0x2c] ss:$16 sps:$4 sm:$0xff]  }
 0x518   :  { %v1955_v30 = vpop.eup %1954 }
 0x519   :  { %1962 = vrcp.f32 %v999_v10  ;;  %v1011_v54 = vadd.f32 1.0, %v1955_v30  ;;  %v2646_v10 = vld [vmem:[#allocation7 + $0x8] ss:$16 sps:$4 sm:$0xff]   ;;  %v1041_v30 = vld [vmem:[#allocation4 + $0xa0] sm:$0xff] }
 0x51a   :  { %v1957_v56 = vpop.eup %1956  ;;  %1964 = vpow2.f32 %v1691_v8  ;;  %v2638_v8 = vld [vmem:[#allocation7 + $0x28] ss:$16 sps:$4 sm:$0xff]  }
 0x51b   :  { %1966 = vrcp.f32 %v1011_v54  ;;  %v1000_v31 = vadd.f32 1.0, %v1957_v56  ;;  %v1043_v54 = vld [vmem:[#allocation4 + $0xb0] sm:$0xff]  ;;  %v1046_v56 = vunpack.c.h.bf16 %v1041_v30 }
 0x51c   :  { %v1959_v59 = vpop.eup %1958  ;;  %1968 = vpow2.f32 %v1692_v53  ;;  %v1045_v53 = vunpack.c.l.bf16 %v1041_v30 }
 0x51d   :  { %1970 = vrcp.f32 %v1000_v31  ;;  %v1012_v61 = vadd.f32 1.0, %v1959_v59  ;;  %v1961_v57 = vpop.eup %1960 }
 0x51e   :  { %1972 = vtanh.f32 %v991_v49 }
 0x51f   :  { %1974 = vrcp.f32 %v1012_v61  ;;  %v1049_v61 = vunpack.c.l.bf16 %v1043_v54 }
 0x526   :  { %v1963_v62 = vpop.eup %1962 }
 0x527   :  { %v1965_v63 = vpop.eup %1964  ;;  %v1033_v35 = vmul.f32 %v1963_v62, %v1961_v57 }
 0x528   :  { %v1967_v32 = vpop.eup %1966  ;;  %v1025_v38 = vadd.f32 1.0, %v1965_v63 }
 0x529   :  { %v1969_v33 = vpop.eup %1968  ;;  %v1031_v37 = vmul.f32 %v1967_v32, %v2504_v45  ;;  %v1050_v32 = vunpack.c.h.bf16 %v1043_v54 }
 0x52a   :  { %v1971_v55 = vpop.eup %1970  ;;  %v1026_v60 = vadd.f32 1.0, %v1969_v33  ;;  %1976 = vrcp.f32 %v1025_v38 }
 0x52b   :  { %v1973_v39 = vpop.eup %1972  ;;  %v2600_v40 = vadd.f32 %v1033_v35, %v1031_v37 }
 0x52c   :  { %v1975_v41 = vpop.eup %1974  ;;  %v1034_v58 = vmul.f32 %v1973_v39, %v1971_v55  ;;  %v1042_v39 = vld [vmem:[#allocation4 + $0xa8] sm:$0xff] }
 0x52d   :  { %v1032_v44 = vmul.f32 %v1975_v41, %v2507_v3  ;;  %1978 = vtanh.f32 %v2600_v40  ;;  %v2630_v3 = vld [vmem:[#allocation7 + $0x48] ss:$16 sps:$4 sm:$0xff]  }
 0x52e   :  { %1980 = vrcp.f32 %v1026_v60 }
 0x52f   :  { %v2603_v46 = vadd.f32 %v1034_v58, %v1032_v44  ;;  %v1048_v58 = vunpack.c.h.bf16 %v1042_v39  ;;  %v1044_v44 = vld [vmem:[#allocation4 + $0xb8] sm:$0xff] }
 0x531   :  { %1982 = vtanh.f32 %v2603_v46 }
 0x537   :  { %v1977_v47 = vpop.eup %1976 }
 0x53a   :  { %v1979_v45 = vpop.eup %1978 }
 0x53b   :  { %v1981_v48 = vpop.eup %1980  ;;  %v1039_v4 = vmul.f32 %v1979_v45, %v1977_v47  ;;  %v1047_v47 = vunpack.c.l.bf16 %v1042_v39  ;;  %v1052_v45 = vunpack.c.h.bf16 %v1044_v44 }
 0x53e   :  { %v1983_v2 = vpop.eup %1982 }
 0x53f   :  { %v1040_v34 = vmul.f32 %v1983_v2, %v1981_v48 }
 0x541   :  { %v1053_v5 = vpack.c.bf16 %v1040_v34, %v1039_v4 }
 0x543   :  { %1087 = vmatmul.mubr.bf16.vlgmr.msra.gmra.mxu0 %v1053_v5  ;;  %1130 = vmatmul.mubr.bf16.vlgmr.msra.gmra.mxu1 %v1053_v5 }
 0x544   :  { %1210 = vmatpush1.bf16.msra.mxu0 %v2511_v11  ;;  %1253 = vmatpush1.bf16.msra.mxu1 %v2514_v42 }
 0x545   :  { %1211 = vmatprep.subr.bf16.mxu0 %v2517_v12  ;;  %1254 = vmatprep.subr.bf16.mxu1 %v2520_v13 }
 0x546   :  { %1241 = vmatprep.mubr.bf16.mxu0 %v2205_v0  ;;  %1284 = vmatprep.mubr.bf16.mxu1 %v2205_v0 }
 0x548   :  { %1212 = vmatpush1.bf16.msra.mxu0 %v2525_v14  ;;  %1255 = vmatpush1.bf16.msra.mxu1 %v2528_v15 }
 0x549   :  { %1213 = vmatprep.subr.bf16.mxu0 %v2531_v16  ;;  %1256 = vmatprep.subr.bf16.mxu1 %v2534_v17 }
 0x54c   :  { %1214 = vmatpush1.bf16.msra.mxu0 %v2537_v18  ;;  %1257 = vmatpush1.bf16.msra.mxu1 %v2540_v1 }
 0x54d   :  { %1215 = vmatprep.subr.bf16.mxu0 %v2543_v6  ;;  %1258 = vmatprep.subr.bf16.mxu1 %v2546_v19 }
 0x550   :  { %1216 = vmatpush1.bf16.msra.mxu0 %v2549_v20  ;;  %1259 = vmatpush1.bf16.msra.mxu1 %v2552_v21 }
 0x551   :  { %1217 = vmatprep.subr.bf16.mxu0 %v2555_v22  ;;  %1260 = vmatprep.subr.bf16.mxu1 %v2558_v23 }
 0x554   :  { %1218 = vmatpush1.bf16.msra.mxu0 %v2561_v24  ;;  %1261 = vmatpush1.bf16.msra.mxu1 %v2564_v25 }
 0x555   :  { %1219 = vmatprep.subr.bf16.mxu0 %v2567_v26  ;;  %1262 = vmatprep.subr.bf16.mxu1 %v2570_v29 }
 0x558   :  { %1220 = vmatpush1.bf16.msra.mxu0 %v2573_v36  ;;  %1263 = vmatpush1.bf16.msra.mxu1 %v2630_v3 }
 0x559   :  { %1221 = vmatprep.subr.bf16.mxu0 %v2577_v50  ;;  %1264 = vmatprep.subr.bf16.mxu1 %v2634_v7 }
 0x55c   :  { %1222 = vmatpush1.bf16.msra.mxu0 %v2581_v43  ;;  %1265 = vmatpush1.bf16.msra.mxu1 %v2638_v8 }
 0x55d   :  { %1223 = vmatprep.subr.bf16.mxu0 %v2585_v51  ;;  %1266 = vmatprep.subr.bf16.mxu1 %v2642_v9 }
 0x560   :  { %1224 = vmatpush1.bf16.msra.mxu0 %v2589_v52  ;;  %1267 = vmatpush1.bf16.msra.mxu1 %v2646_v10 }
 0x561   :  { %1364 = vmatprep.subr.bf16.mxu0 %v2593_v27  ;;  %1407 = vmatprep.subr.bf16.mxu1 %v2596_v28 }
 0x603   :  { %v1088_v49 = vpop.f32.mrf.mxu0  ;;  %v1131_v59 = vpop.f32.mrf.mxu1 }
 0x604   :  { %v1140_v31 = vadd.f32 %v1088_v49, %v1045_v53  ;;  %v1142_v4 = vadd.f32 %v1131_v59, %v1047_v47  ;;  %v1051_v53 = vunpack.c.l.bf16 %v1044_v44 }
 0x605   :  { %v1090_v57 = vpop.f32.mrf.mxu0  ;;  %v1133_v37 = vpop.f32.mrf.mxu1 }
 0x606   :  { %v1693_v62 = vmul.f32 -1.442695, %v1140_v31  ;;  %v1141_v63 = vadd.f32 %v1090_v57, %v1046_v56  ;;  %v1143_v2 = vadd.f32 %v1133_v37, %v1048_v58 }
 0x607   :  { %v1092_v33 = vpop.f32.mrf.mxu0  ;;  %v1135_v41 = vpop.f32.mrf.mxu1 }
 0x608   :  { %1984 = vpow2.f32 %v1693_v62  ;;  %v1695_v35 = vmul.f32 -1.442695, %v1141_v63  ;;  %v1144_v55 = vadd.f32 %v1092_v33, %v1049_v61  ;;  %v1697_v30 = vmul.f32 -1.442695, %v1143_v2 }
 0x609   :  { %v1094_v27 = vpop.f32.mrf.mxu0  ;;  %v1137_v48 = vpop.f32.mrf.mxu1  ;;  %v1146_v57 = vadd.f32 %v1135_v41, %v1051_v53 }
 0x60a   :  { %1986 = vpow2.f32 %v1695_v35  ;;  %v1694_v28 = vmul.f32 -1.442695, %v1144_v55  ;;  %v1145_v38 = vadd.f32 %v1094_v27, %v1050_v32  ;;  %v1147_v34 = vadd.f32 %v1137_v48, %v1052_v45 }
 0x60c   :  { %1988 = vpow2.f32 %v1694_v28  ;;  %v1696_v60 = vmul.f32 -1.442695, %v1145_v38  ;;  %v1698_v49 = vmul.f32 -1.442695, %v1147_v34 }
 0x60e   :  { %1990 = vpow2.f32 %v1696_v60 }
 0x60f   :  { %1992 = vtanh.f32 %v1142_v4 }
 0x615   :  { %v1985_v5 = vpop.eup %1984 }
 0x616   :  { %v1154_v54 = vadd.f32 1.0, %v1985_v5 }
 0x617   :  { %v1987_v56 = vpop.eup %1986 }
 0x618   :  { %1994 = vrcp.f32 %v1154_v54  ;;  %v1166_v31 = vadd.f32 1.0, %v1987_v56 }
 0x619   :  { %v1989_v61 = vpop.eup %1988  ;;  %1996 = vpow2.f32 %v1697_v30 }
 0x61a   :  { %1998 = vrcp.f32 %v1166_v31  ;;  %v1155_v62 = vadd.f32 1.0, %v1989_v61 }
 0x61b   :  { %v1991_v63 = vpop.eup %1990  ;;  %2000 = vpow2.f32 %v1698_v49 }
 0x61c   :  { %2002 = vrcp.f32 %v1155_v62  ;;  %v1167_v32 = vadd.f32 1.0, %v1991_v63  ;;  %v1993_v59 = vpop.eup %1992 }
 0x61d   :  { %2004 = vtanh.f32 %v1146_v57 }
 0x61e   :  { %2006 = vrcp.f32 %v1167_v32 }
 0x625   :  { %v1995_v33 = vpop.eup %1994 }
 0x626   :  { %v1997_v35 = vpop.eup %1996  ;;  %v1188_v27 = vmul.f32 %v1995_v33, %v1993_v59 }
 0x627   :  { %v1999_v37 = vpop.eup %1998  ;;  %v1180_v39 = vadd.f32 1.0, %v1997_v35 }
 0x628   :  { %v2001_v55 = vpop.eup %2000  ;;  %v1186_v28 = vmul.f32 %v1999_v37, %v2600_v40 }
 0x629   :  { %v2003_v38 = vpop.eup %2002  ;;  %v1181_v44 = vadd.f32 1.0, %v2001_v55  ;;  %2008 = vrcp.f32 %v1180_v39 }
 0x62a   :  { %v2005_v60 = vpop.eup %2004  ;;  %v2652_v41 = vadd.f32 %v1188_v27, %v1186_v28 }
 0x62b   :  { %v2007_v58 = vpop.eup %2006  ;;  %v1189_v47 = vmul.f32 %v2005_v60, %v2003_v38 }
 0x62c   :  { %v1187_v45 = vmul.f32 %v2007_v58, %v2603_v46  ;;  %2010 = vtanh.f32 %v2652_v41 }
 0x62d   :  { %2012 = vrcp.f32 %v1181_v44 }
 0x62e   :  { %v2655_v48 = vadd.f32 %v1189_v47, %v1187_v45 }
 0x630   :  { %2014 = vtanh.f32 %v2655_v48 }
 0x636   :  { %v2009_v2 = vpop.eup %2008 }
 0x639   :  { %v2011_v40 = vpop.eup %2010 }
 0x63a   :  { %v2013_v4 = vpop.eup %2012  ;;  %v1194_v5 = vmul.f32 %v2011_v40, %v2009_v2 }
 0x63d   :  { %v2015_v34 = vpop.eup %2014 }
 0x63e   :  { %v1195_v30 = vmul.f32 %v2015_v34, %v2013_v4 }
 0x640   :  { %v1208_v53 = vpack.c.bf16 %v1195_v30, %v1194_v5 }
 0x642   :  { %1242 = vmatmul.mubr.bf16.vlgmr.msra.gmra.mxu0 %v1208_v53  ;;  %1285 = vmatmul.mubr.bf16.vlgmr.msra.gmra.mxu1 %v1208_v53 }
 0x643   :  { %1365 = vmatpush1.bf16.msra.mxu0 %v2511_v11  ;;  %1408 = vmatpush1.bf16.msra.mxu1 %v2514_v42  ;;  %v1198_v42 = vld [vmem:[#allocation4 + $0xd0] sm:$0xff] }
 0x644   :  { %1366 = vmatprep.subr.bf16.mxu0 %v2517_v12  ;;  %1409 = vmatprep.subr.bf16.mxu1 %v2520_v13 }
 0x645   :  { %1396 = vmatprep.mubr.bf16.mxu0 %v2205_v0  ;;  %1439 = vmatprep.mubr.bf16.mxu1 %v2205_v0  ;;  %v1196_v0 = vld [vmem:[#allocation4 + $0xc0] sm:$0xff] }
 0x646   :  { %v1200_v11 = vunpack.c.l.bf16 %v1196_v0  ;;  %v1201_v12 = vunpack.c.h.bf16 %v1196_v0 }
 0x647   :  { %1367 = vmatpush1.bf16.msra.mxu0 %v2525_v14  ;;  %1410 = vmatpush1.bf16.msra.mxu1 %v2528_v15 }
 0x648   :  { %1368 = vmatprep.subr.bf16.mxu0 %v2531_v16  ;;  %1411 = vmatprep.subr.bf16.mxu1 %v2534_v17  ;;  %v1204_v16 = vunpack.c.l.bf16 %v1198_v42 }
 0x64b   :  { %1369 = vmatpush1.bf16.msra.mxu0 %v2537_v18  ;;  %1412 = vmatpush1.bf16.msra.mxu1 %v2540_v1 }
 0x64c   :  { %1370 = vmatprep.subr.bf16.mxu0 %v2543_v6  ;;  %1413 = vmatprep.subr.bf16.mxu1 %v2546_v19  ;;  %v1205_v6 = vunpack.c.h.bf16 %v1198_v42  ;;  %v1528_v42 = vld [vmem:[#allocation9 + $0x78] sm:$0xff] }
 0x64f   :  { %1371 = vmatpush1.bf16.msra.mxu0 %v2549_v20  ;;  %1414 = vmatpush1.bf16.msra.mxu1 %v2552_v21 }
 0x650   :  { %1372 = vmatprep.subr.bf16.mxu0 %v2555_v22  ;;  %1415 = vmatprep.subr.bf16.mxu1 %v2558_v23 }
 0x653   :  { %1373 = vmatpush1.bf16.msra.mxu0 %v2561_v24  ;;  %1416 = vmatpush1.bf16.msra.mxu1 %v2564_v25 }
 0x654   :  { %1374 = vmatprep.subr.bf16.mxu0 %v2567_v26  ;;  %1417 = vmatprep.subr.bf16.mxu1 %v2570_v29  ;;  %v1197_v26 = vld [vmem:[#allocation4 + $0xc8] sm:$0xff] }
 0x657   :  { %1375 = vmatpush1.bf16.msra.mxu0 %v2573_v36  ;;  %1418 = vmatpush1.bf16.msra.mxu1 %v2630_v3 }
 0x658   :  { %1376 = vmatprep.subr.bf16.mxu0 %v2577_v50  ;;  %1419 = vmatprep.subr.bf16.mxu1 %v2634_v7  ;;  %v1203_v50 = vunpack.c.h.bf16 %v1197_v26 }
 0x65b   :  { %1377 = vmatpush1.bf16.msra.mxu0 %v2581_v43  ;;  %1420 = vmatpush1.bf16.msra.mxu1 %v2638_v8  ;;  %v1199_v43 = vld [vmem:[#allocation4 + $0xd8] sm:$0xff] }
 0x65c   :  { %1378 = vmatprep.subr.bf16.mxu0 %v2585_v51  ;;  %1421 = vmatprep.subr.bf16.mxu1 %v2642_v9  ;;  %v1202_v51 = vunpack.c.l.bf16 %v1197_v26  ;;  %v1206_v54 = vunpack.c.l.bf16 %v1199_v43  ;;  %v1353_v26 = vld [vmem:[#allocation4 + $0xf0] sm:$0xff] }
 0x65f   :  { %1379 = vmatpush1.bf16.msra.mxu0 %v2589_v52  ;;  %1422 = vmatpush1.bf16.msra.mxu1 %v2646_v10  ;;  %v1207_v52 = vunpack.c.h.bf16 %v1199_v43 }
 0x660   :  { %1730 = vmatprep.subr.mxu0 %v1528_v42 }
 0x702   :  { %v1243_v13 = vpop.f32.mrf.mxu0  ;;  %v1286_v15 = vpop.f32.mrf.mxu1 }
 0x703   :  { %v1295_v14 = vadd.f32 %v1243_v13, %v1200_v11  ;;  %v1297_v7 = vadd.f32 %v1286_v15, %v1202_v51  ;;  %v1525_v13 = vld [vmem:[#allocation9 + $0x60] sm:$0xff]  ;;  %v1523_v15 = vld [vmem:[#allocation9 + $0x50] sm:$0xff]  ;;  %v1359_v51 = vunpack.c.l.bf16 %v1353_v26 }
 0x704   :  { %v1245_v17 = vpop.f32.mrf.mxu0  ;;  %v1288_v21 = vpop.f32.mrf.mxu1 }
 0x705   :  { %v1699_v18 = vmul.f32 -1.442695, %v1295_v14  ;;  %v1296_v1 = vadd.f32 %v1245_v17, %v1201_v12  ;;  %v1298_v3 = vadd.f32 %v1288_v21, %v1203_v50  ;;  %v1526_v12 = vld [vmem:[#allocation9 + $0x68] sm:$0xff]  ;;  %v1524_v14 = vld [vmem:[#allocation9 + $0x58] sm:$0xff]  ;;  %v1521_v17 = vld [vmem:[#allocation9 + $0x40] sm:$0xff] }
 0x706   :  { %v1247_v19 = vpop.f32.mrf.mxu0  ;;  %v1290_v29 = vpop.f32.mrf.mxu1  ;;  %v1515_v21 = vld [vmem:[#allocation9 + $0x10] sm:$0xff] }
 0x707   :  { %2016 = vpow2.f32 %v1699_v18  ;;  %v1701_v20 = vmul.f32 -1.442695, %v1296_v1  ;;  %v1299_v22 = vadd.f32 %v1247_v19, %v1204_v16  ;;  %v1703_v10 = vmul.f32 -1.442695, %v1298_v3  ;;  %v1522_v16 = vld [vmem:[#allocation9 + $0x48] sm:$0xff]  ;;  %v1520_v18 = vld [vmem:[#allocation9 + $0x38] sm:$0xff] }
 0x708   :  { %v1249_v23 = vpop.f32.mrf.mxu0  ;;  %v1292_v46 = vpop.f32.mrf.mxu1  ;;  %v1301_v62 = vadd.f32 %v1290_v29, %v1206_v54  ;;  %v1519_v1 = vld [vmem:[#allocation9 + $0x30] sm:$0xff]  ;;  %v1517_v19 = vld [vmem:[#allocation9 + $0x20] sm:$0xff] }
 0x709   :  { %2018 = vpow2.f32 %v1701_v20  ;;  %v1700_v24 = vmul.f32 -1.442695, %v1299_v22  ;;  %v1300_v25 = vadd.f32 %v1249_v23, %v1205_v6  ;;  %v1302_v8 = vadd.f32 %v1292_v46, %v1207_v52  ;;  %v1518_v6 = vld [vmem:[#allocation9 + $0x28] sm:$0xff]  ;;  %v1516_v20 = vld [vmem:[#allocation9 + $0x18] sm:$0xff]  ;;  %v1513_v23 = vld [vmem:[#allocation9] sm:$0xff] }
 0x70a   :  { %v1514_v22 = vld [vmem:[#allocation9 + $0x8] sm:$0xff] }
 0x70b   :  { %2020 = vpow2.f32 %v1700_v24  ;;  %v1702_v36 = vmul.f32 -1.442695, %v1300_v25  ;;  %v1704_v31 = vmul.f32 -1.442695, %v1302_v8  ;;  %v1351_v24 = vld [vmem:[#allocation4 + $0xe0] sm:$0xff] }
 0x70c   :  { %v1355_v25 = vunpack.c.l.bf16 %v1351_v24  ;;  %v1356_v29 = vunpack.c.h.bf16 %v1351_v24 }
 0x70d   :  { %2022 = vpow2.f32 %v1702_v36 }
 0x70e   :  { %2024 = vtanh.f32 %v1297_v7  ;;  %v1360_v7 = vunpack.c.h.bf16 %v1353_v26 }
 0x714   :  { %v2017_v9 = vpop.eup %2016 }
 0x715   :  { %v1309_v56 = vadd.f32 1.0, %v2017_v9 }
 0x716   :  { %v2019_v49 = vpop.eup %2018 }
 0x717   :  { %2026 = vrcp.f32 %v1309_v56  ;;  %v1321_v61 = vadd.f32 1.0, %v2019_v49  ;;  %v1352_v49 = vld [vmem:[#allocation4 + $0xe8] sm:$0xff] }
 0x718   :  { %v2021_v57 = vpop.eup %2020  ;;  %2028 = vpow2.f32 %v1703_v10 }
 0x719   :  { %2030 = vrcp.f32 %v1321_v61  ;;  %v1310_v63 = vadd.f32 1.0, %v2021_v57  ;;  %v1358_v57 = vunpack.c.h.bf16 %v1352_v49 }
 0x71a   :  { %v2023_v32 = vpop.eup %2022  ;;  %2032 = vpow2.f32 %v1704_v31 }
 0x71b   :  { %2034 = vrcp.f32 %v1310_v63  ;;  %v1322_v59 = vadd.f32 1.0, %v2023_v32  ;;  %v2025_v33 = vpop.eup %2024  ;;  %v1354_v32 = vld [vmem:[#allocation4 + $0xf8] sm:$0xff] }
 0x71c   :  { %2036 = vtanh.f32 %v1301_v62 }
 0x71d   :  { %2038 = vrcp.f32 %v1322_v59 }
 0x724   :  { %v2027_v35 = vpop.eup %2026 }
 0x725   :  { %v2029_v37 = vpop.eup %2028  ;;  %v1343_v28 = vmul.f32 %v2027_v35, %v2025_v33  ;;  %v1362_v33 = vunpack.c.h.bf16 %v1354_v32 }
 0x726   :  { %v2031_v55 = vpop.eup %2030  ;;  %v1335_v60 = vadd.f32 1.0, %v2029_v37  ;;  %v1357_v37 = vunpack.c.l.bf16 %v1352_v49 }
 0x727   :  { %v2033_v27 = vpop.eup %2032  ;;  %v1341_v38 = vmul.f32 %v2031_v55, %v2652_v41 }
 0x728   :  { %v2035_v39 = vpop.eup %2034  ;;  %v1336_v45 = vadd.f32 1.0, %v2033_v27  ;;  %2040 = vrcp.f32 %v1335_v60 }
 0x729   :  { %v2037_v58 = vpop.eup %2036  ;;  %v2692_v44 = vadd.f32 %v1343_v28, %v1341_v38 }
 0x72a   :  { %v2039_v47 = vpop.eup %2038  ;;  %v1344_v2 = vmul.f32 %v2037_v58, %v2035_v39  ;;  %v1361_v39 = vunpack.c.l.bf16 %v1354_v32 }
 0x72b   :  { %v1342_v40 = vmul.f32 %v2039_v47, %v2655_v48  ;;  %2042 = vtanh.f32 %v2692_v44  ;;  %v1527_v48 = vld [vmem:[#allocation9 + $0x70] sm:$0xff] }
 0x72c   :  { %2044 = vrcp.f32 %v1336_v45 }
 0x72d   :  { %v2695_v4 = vadd.f32 %v1344_v2, %v1342_v40 }
 0x72f   :  { %2046 = vtanh.f32 %v2695_v4 }
 0x735   :  { %v2041_v34 = vpop.eup %2040 }
 0x738   :  { %v2043_v41 = vpop.eup %2042 }
 0x739   :  { %v2045_v5 = vpop.eup %2044  ;;  %v1349_v53 = vmul.f32 %v2043_v41, %v2041_v34 }
 0x73c   :  { %v2047_v30 = vpop.eup %2046 }
 0x73d   :  { %v1350_v0 = vmul.f32 %v2047_v30, %v2045_v5 }
 0x73f   :  { %v1363_v11 = vpack.c.bf16 %v1350_v0, %v1349_v53 }
 0x741   :  { %1397 = vmatmul.mubr.bf16.vlgmr.msra.gmra.mxu0 %v1363_v11  ;;  %1440 = vmatmul.mubr.bf16.vlgmr.msra.gmra.mxu1 %v1363_v11 }
 0x742   :  { %1731 = vmatpush3.msra.mxu0 %v1528_v42 }
 0x743   :  { %1732 = vmatprep.subr.mxu0 %v1527_v48 }
 0x744   :  { %1733 = vmatpush3.msra.mxu0 %v1527_v48 }
 0x745   :  { %1734 = vmatprep.subr.mxu0 %v1526_v12 }
 0x746   :  { %1735 = vmatpush3.msra.mxu0 %v1526_v12 }
 0x747   :  { %1736 = vmatprep.subr.mxu0 %v1525_v13 }
 0x748   :  { %1737 = vmatpush3.msra.mxu0 %v1525_v13 }
 0x749   :  { %1738 = vmatprep.subr.mxu0 %v1524_v14 }
 0x74a   :  { %1739 = vmatpush3.msra.mxu0 %v1524_v14 }
 0x74b   :  { %1740 = vmatprep.subr.mxu0 %v1523_v15 }
 0x74c   :  { %1741 = vmatpush3.msra.mxu0 %v1523_v15 }
 0x74d   :  { %1742 = vmatprep.subr.mxu0 %v1522_v16 }
 0x74e   :  { %1743 = vmatpush3.msra.mxu0 %v1522_v16 }
 0x74f   :  { %1744 = vmatprep.subr.mxu0 %v1521_v17 }
 0x750   :  { %1745 = vmatpush3.msra.mxu0 %v1521_v17 }
 0x751   :  { %1746 = vmatprep.subr.mxu0 %v1520_v18 }
 0x752   :  { %1747 = vmatpush3.msra.mxu0 %v1520_v18 }
 0x753   :  { %1748 = vmatprep.subr.mxu0 %v1519_v1 }
 0x754   :  { %1749 = vmatpush3.msra.mxu0 %v1519_v1 }
 0x755   :  { %1750 = vmatprep.subr.mxu0 %v1518_v6 }
 0x756   :  { %1751 = vmatpush3.msra.mxu0 %v1518_v6 }
 0x757   :  { %1752 = vmatprep.subr.mxu0 %v1517_v19 }
 0x758   :  { %1753 = vmatpush3.msra.mxu0 %v1517_v19 }
 0x759   :  { %1754 = vmatprep.subr.mxu0 %v1516_v20 }
 0x75a   :  { %1755 = vmatpush3.msra.mxu0 %v1516_v20 }
 0x75b   :  { %1756 = vmatprep.subr.mxu0 %v1515_v21 }
 0x75c   :  { %1757 = vmatpush3.msra.mxu0 %v1515_v21 }
 0x75d   :  { %1758 = vmatprep.subr.mxu0 %v1514_v22 }
 0x75e   :  { %1759 = vmatpush3.msra.mxu0 %v1514_v22 }
 0x75f   :  { %1760 = vmatprep.subr.mxu0 %v1513_v23 }
 0x760   :  { %1761 = vmatpush3.msra.mxu0 %v1513_v23 }
 0x801   :  { %v1398_v36 = vpop.f32.mrf.mxu0  ;;  %v1441_v43 = vpop.f32.mrf.mxu1 }
 0x802   :  { %v1450_v50 = vadd.f32 %v1398_v36, %v1355_v25  ;;  %v1452_v38 = vadd.f32 %v1441_v43, %v1357_v37  ;;  %v1711_v25 = vld [vmem:[%s2713_s3] ss:$0 sm:$0xff] }
 0x803   :  { %v1400_v52 = vpop.f32.mrf.mxu0  ;;  %v1443_v10 = vpop.f32.mrf.mxu1 }
 0x804   :  { %v1705_v46 = vmul.f32 -1.442695, %v1450_v50  ;;  %v1451_v3 = vadd.f32 %v1400_v52, %v1356_v29  ;;  %v1453_v59 = vadd.f32 %v1443_v10, %v1358_v57 }
 0x805   :  { %v1402_v8 = vpop.f32.mrf.mxu0  ;;  %v1445_v62 = vpop.f32.mrf.mxu1 }
 0x806   :  { %2048 = vpow2.f32 %v1705_v46  ;;  %v1707_v9 = vmul.f32 -1.442695, %v1451_v3  ;;  %v1454_v54 = vadd.f32 %v1402_v8, %v1359_v51  ;;  %v1709_v55 = vmul.f32 -1.442695, %v1453_v59 }
 0x807   :  { %v1404_v56 = vpop.f32.mrf.mxu0  ;;  %v1447_v35 = vpop.f32.mrf.mxu1  ;;  %v1456_v40 = vadd.f32 %v1445_v62, %v1361_v39 }
 0x808   :  { %2050 = vpow2.f32 %v1707_v9  ;;  %v1706_v31 = vmul.f32 -1.442695, %v1454_v54  ;;  %v1455_v61 = vadd.f32 %v1404_v56, %v1360_v7  ;;  %v1457_v27 = vadd.f32 %v1447_v35, %v1362_v33 }
 0x80a   :  { %2052 = vpow2.f32 %v1706_v31  ;;  %v1708_v63 = vmul.f32 -1.442695, %v1455_v61  ;;  %v1710_v47 = vmul.f32 -1.442695, %v1457_v27 }
 0x80c   :  { %2054 = vpow2.f32 %v1708_v63 }
 0x80d   :  { %2056 = vpow2.f32 %v1709_v55 }
 0x813   :  { %v2049_v28 = vpop.eup %2048 }
 0x814   :  { %v1464_v60 = vadd.f32 1.0, %v2049_v28 }
 0x815   :  { %v2051_v58 = vpop.eup %2050 }
 0x816   :  { %2058 = vrcp.f32 %v1464_v60  ;;  %v1476_v45 = vadd.f32 1.0, %v2051_v58 }
 0x817   :  { %v2053_v2 = vpop.eup %2052  ;;  %2060 = vtanh.f32 %v1452_v38 }
 0x818   :  { %2062 = vrcp.f32 %v1476_v45  ;;  %v1465_v34 = vadd.f32 1.0, %v2053_v2 }
 0x819   :  { %v2055_v41 = vpop.eup %2054  ;;  %2064 = vpow2.f32 %v1710_v47 }
 0x81a   :  { %2066 = vrcp.f32 %v1465_v34  ;;  %v1477_v5 = vadd.f32 1.0, %v2055_v41  ;;  %v2057_v30 = vpop.eup %2056 }
 0x81b   :  { %2068 = vtanh.f32 %v1456_v40  ;;  %v1490_v42 = vadd.f32 1.0, %v2057_v30 }
 0x81c   :  { %2070 = vrcp.f32 %v1477_v5 }
 0x81d   :  { %2072 = vrcp.f32 %v1490_v42 }
 0x823   :  { %v2059_v53 = vpop.eup %2058 }
 0x824   :  { %v2061_v0 = vpop.eup %2060 }
 0x825   :  { %v2063_v11 = vpop.eup %2062  ;;  %v1498_v12 = vmul.f32 %v2061_v0, %v2059_v53 }
 0x826   :  { %v2065_v48 = vpop.eup %2064  ;;  %v1496_v13 = vmul.f32 %v2063_v11, %v2692_v44 }
 0x827   :  { %v2067_v14 = vpop.eup %2066  ;;  %v1491_v18 = vadd.f32 1.0, %v2065_v48 }
 0x828   :  { %v2069_v15 = vpop.eup %2068  ;;  %v1500_v16 = vadd.f32 %v1498_v12, %v1496_v13 }
 0x829   :  { %v2071_v17 = vpop.eup %2070  ;;  %v1499_v1 = vmul.f32 %v2069_v15, %v2067_v14 }
 0x82a   :  { %v1497_v6 = vmul.f32 %v2071_v17, %v2695_v4  ;;  %2074 = vtanh.f32 %v1500_v16  ;;  %v2073_v20 = vpop.eup %2072 }
 0x82b   :  { %2076 = vrcp.f32 %v1491_v18 }
 0x82c   :  { %v1501_v19 = vadd.f32 %v1499_v1, %v1497_v6 }
 0x82e   :  { %2078 = vtanh.f32 %v1501_v19 }
 0x837   :  { %v2075_v21 = vpop.eup %2074 }
 0x838   :  { %v1504_v22 = vmul.f32 %v2075_v21, %v2073_v20  ;;  %v2077_v23 = vpop.eup %2076 }
 0x83a   :  { %1762 = vmatprep.mubr.f32.mxu0 %v1504_v22 }
 0x83b   :  { %v2079_v24 = vpop.eup %2078 }
 0x83c   :  { %v1505_v44 = vmul.f32 %v2079_v24, %v2077_v23 }
 0x83e   :  { %1763 = vmatmul.mubr.f32.vlgmr.msra.gmra.mxu0 %v1505_v44 }
 0x8fe   :  { %v1764_v26 = vpop.f32.mrf.mxu0 }
 0x8ff   :  { %v1608_v4 = vadd.f32 %v1764_v26, %v1711_v25 }
 0x900   :  { %v1602_v29 = vpop.f32.mrf.mxu0 }
 0x901   :  { %v1603_v36 = vadd.f32 %v1711_v25, %v1602_v29  ;;  %1612 = vst [vmem:[#allocation10 + $0x8] sm:$0xff] %v1608_v4 }
 0x903   :  { %1611 = vst [vmem:[#allocation10] sm:$0xff] %v1603_v36 }
 0x904   :  { %2183 = shalt.err (!%p2180_p5)
}
 0x905   :  { %1624 = dma.vmem_to_hbm [thread:$0]  %s1619_s8, 256, %s2714_s4, [#allocation6], %s2203_s1, %s2203_s1, %s2204_s30  }
 0x906   :  { %2196 = dma.done.wait [#allocation6], 256  }
 0x907   :  { %2197 = vsyncadd [#allocation6], 4294967040 }
 0x908   :  { %1628 = vsyncpa [#allocation5], 1 }
 0x909   :  { %1629 = vsyncpa [#allocation8], 1 }
 0x90a   :  { %1630 = vsyncpa [#allocation6], 1 }

</bundles_post_ra>
